<compile_context>
chip_gen: v7x
topology: tpu7x:2x2x1
jax: 0.10.0
libtpu: 0.0.40
codegen_flags: <defaults>
</compile_context>

<pallas_src>
import functools

import jax
import jax.numpy as jnp
from jax import lax
from jax.experimental import pallas as pl
from jax.experimental.pallas import tpu as pltpu


def _round_up(v, m):
    return ((v + m - 1) // m) * m


def nlnet_kernel(x_ref, inv_ref, mask_ref, w1_ref, w2_ref, w3_ref,
                 out_ref, p_ref, *, img_w):
    """One grid step = `ipb` whole images, channel-major, lanes = ipb*H*W."""
    c_in, L = x_ref.shape
    ch = w2_ref.shape[0]
    g1 = (w1_ref.shape[1] - 1) // 9          # padded conv1 per-tap group (>= 2*Cin)
    k1 = 9 * g1                              # conv1 K (bias row excluded)
    k2 = 9 * ch                              # conv2/conv3 K (bias row excluded)
    mdt = w1_ref.dtype                       # MXU operand dtype (bf16 default)

    def tap(v, k):
        """Shifted+masked copy of v: pixel p reads p + (dy-1)*W + (dx-1).

        The roll is cyclic over the whole lane axis; every position where it would
        read across an image boundary (or wrap around the block) is exactly a
        position whose per-tap validity mask is zero, so no explicit padding and no
        inter-image halo is needed.
        """
        dy, dx = divmod(k, 3)
        delta = (dy - 1) * img_w + (dx - 1)
        if delta == 0:                       # centre tap: no shift, mask is all-ones
            return v
        shifted = pltpu.roll(v, (-delta) % L, axis=1)   # XLU lane rotate (free slot)
        return shifted * mask_ref[k:k + 1, :]           # f32 mask multiply (VPU)

    x = x_ref[...]                                       # (Cin, L) f32, lane-dense

    # ---- AvgPool2d(3, stride=1, pad=1, count_include_pad=False) --------------------
    psum = x                                             # centre tap
    for k in range(9):
        if k != 4:
            psum = psum + tap(x, k)
    pooled = psum * inv_ref[...]                         # (Cin, L)

    # ---- conv1 (2*Cin -> Ch) + ReLU -------------------------------------------------
    # cat(x, pooled) padded to g1 rows so each per-tap slab store is sublane-aligned;
    # per-tap shift/mask/cast/store is fused (one tap live at a time).
    parts = [x, pooled]
    if g1 > 2 * c_in:
        parts.append(jnp.zeros((g1 - 2 * c_in, L), jnp.float32))
    cat = jnp.concatenate(parts, axis=0)                 # (g1, L) f32
    for k in range(9):
        p_ref[g1 * k:g1 * (k + 1), :] = tap(cat, k).astype(mdt)
    p_ref[k1:k1 + 1, :] = jnp.ones((1, L), mdt)          # ones row -> folded bias
    h = jnp.maximum(
        jnp.dot(w1_ref[...], p_ref[0:k1 + 1, :],
                preferred_element_type=jnp.float32), 0.0)           # (Ch, L) f32

    # ---- conv2 (Ch -> Ch) + ReLU (same shared scratch, K = 9*Ch + 1) ----------------
    for k in range(9):
        p_ref[ch * k:ch * (k + 1), :] = tap(h, k).astype(mdt)
    p_ref[k2:k2 + 1, :] = jnp.ones((1, L), mdt)
    h = jnp.maximum(
        jnp.dot(w2_ref[...], p_ref[0:k2 + 1, :],
                preferred_element_type=jnp.float32), 0.0)           # (Ch, L) f32

    # ---- conv3 (Ch -> Cin) + Softplus(beta=1, threshold=20) -------------------------
    for k in range(9):
        p_ref[ch * k:ch * (k + 1), :] = tap(h, k).astype(mdt)
    # ones row at k2 is still in place (the loop above only touched rows [0, k2)).
    z = jnp.dot(w3_ref[...], p_ref[0:k2 + 1, :],
                preferred_element_type=jnp.float32)                 # (Cin, L) f32
    out_ref[...] = jnp.where(z > 20.0, z,
                             jnp.log1p(jnp.exp(jnp.minimum(z, 20.0))))


def nlnet_forward(x_nchw, w1, b1, w2, b2, w3, b3, *,
                  matmul_dtype=jnp.bfloat16, vmem_budget_bytes=None):
    """x_nchw: (N, Cin, H, W) f32.  Weights HWIO: w1 (3,3,2*Cin,Ch), w2 (3,3,Ch,Ch),
    w3 (3,3,Ch,Cin).  Biases (Cout,).  Returns (N, Cin, H, W) float32."""
    N, c_in, H, W = x_nchw.shape
    HW = H * W
    ch = w1.shape[-1]
    g1 = _round_up(2 * c_in, 8)                       # aligned conv1 per-tap group
    patch_rows = max(9 * g1, 9 * ch) + 1              # shared im2col scratch rows
    mdt_bytes = jnp.dtype(matmul_dtype).itemsize

    # Per-generation VMEM budget (v7x: 64 MiB/TC, v5e/v6e: 128 MiB); conservative
    # fallback if the query is unavailable.
    if vmem_budget_bytes is None:
        try:
            vmem_budget_bytes = int(0.6 * pltpu.get_tpu_info().vmem_capacity_bytes)
        except Exception:
            vmem_budget_bytes = 40 * 1024 * 1024

    def est_bytes(ipb):
        L = ipb * HW
        per_lane = (2 * 2 * c_in * 4          # x + out blocks, double-buffered
                    + 10 * 4                  # masks (9) + inv (1), resident
                    + patch_rows * mdt_bytes  # shared im2col scratch
                    + 3 * ch * 4)             # live activation headroom (h1/h2/z)
        w_bytes = (2 * ch + c_in) * (9 * ch + 1) * mdt_bytes
        return L * per_lane + w_bytes + (1 << 20)     # +1 MiB slack

    # Fold as many whole images as fit into one lane-dense block (largest divisor of
    # N whose block stays within the VMEM budget and keeps the lane dim 128-aligned).
    ipb = None
    for cand in sorted([d for d in range(1, N + 1) if N % d == 0], reverse=True):
        lane_ok = ((cand * HW) % 128 == 0) or (cand == N)
        if lane_ok and est_bytes(cand) <= vmem_budget_bytes:
            ipb = cand
            break
    if ipb is None:
        # TODO(synk): fall back to intra-image row strips here for very large images.
        ipb = N
    L = ipb * HW

    # Channel-major, batch folded into lanes: x_cm[c, n*HW + p] = x[n, c, p].
    x_cm = jnp.transpose(x_nchw.reshape(N, c_in, HW), (1, 0, 2)).reshape(c_in, N * HW)

    # Per-tap validity masks and inverse valid-neighbour counts for ONE image,
    # tiled across the ipb images of a block (resident, constant index map).
    yy, xx = jnp.meshgrid(jnp.arange(H), jnp.arange(W), indexing="ij")
    rows = []
    for k in range(9):
        dy, dx = divmod(k, 3)
        ok = ((yy + dy - 1 >= 0) & (yy + dy - 1 < H) &
              (xx + dx - 1 >= 0) & (xx + dx - 1 < W))
        rows.append(ok.reshape(HW))
    masks1 = jnp.stack(rows).astype(jnp.float32)                  # (9, HW)
    inv1 = 1.0 / jnp.sum(masks1, axis=0, keepdims=True)           # (1, HW)
    masks = jnp.tile(masks1, (1, ipb))                            # (9, L)
    inv = jnp.tile(inv1, (1, ipb))                                # (1, L)

    # Stack HWIO weights to (Cout, 9*G + 1): conv1's per-tap group zero-padded from
    # 2*Cin to G rows (aligned patch stores), bias appended as an extra column that
    # pairs with the all-ones patch row written in-kernel.
    w1p = jnp.zeros((9, g1, ch), jnp.float32).at[:, :2 * c_in, :].set(
        w1.reshape(9, 2 * c_in, ch))
    w1k = jnp.concatenate([w1p.reshape(9 * g1, ch).T, b1.reshape(ch, 1)],
                          axis=1).astype(matmul_dtype)            # (Ch, 9*G+1)
    w2k = jnp.concatenate([w2.reshape(9 * ch, ch).T, b2.reshape(ch, 1)],
                          axis=1).astype(matmul_dtype)            # (Ch, 9*Ch+1)
    w3k = jnp.concatenate([w3.reshape(9 * ch, c_in).T, b3.reshape(c_in, 1)],
                          axis=1).astype(matmul_dtype)            # (Cin, 9*Ch+1)

    kernel = functools.partial(nlnet_kernel, img_w=W)
    vmem_limit = int(min(max(2 * est_bytes(ipb), 32 * 1024 * 1024),
                         64 * 1024 * 1024))

    out_cm = pl.pallas_call(
        kernel,
        out_shape=jax.ShapeDtypeStruct((c_in, N * HW), jnp.float32),
        grid_spec=pltpu.PrefetchScalarGridSpec(
            num_scalar_prefetch=0,
            grid=(N // ipb,),
            in_specs=[
                pl.BlockSpec((c_in, L), lambda g: (0, g)),            # x (ipb images)
                pl.BlockSpec((1, L), lambda g: (0, 0)),               # 1/neighbour count
                pl.BlockSpec((9, L), lambda g: (0, 0)),               # per-tap masks
                pl.BlockSpec((ch, 9 * g1 + 1), lambda g: (0, 0)),     # [w1 | b1]
                pl.BlockSpec((ch, 9 * ch + 1), lambda g: (0, 0)),     # [w2 | b2]
                pl.BlockSpec((c_in, 9 * ch + 1), lambda g: (0, 0)),   # [w3 | b3]
            ],
            out_specs=pl.BlockSpec((c_in, L), lambda g: (0, g)),
            scratch_shapes=[
                pltpu.VMEM((patch_rows, L), matmul_dtype),  # ONE shared im2col scratch
            ],
        ),
        compiler_params=pltpu.CompilerParams(
            dimension_semantics=("parallel",),
            vmem_limit_bytes=vmem_limit,
        ),
    )(x_cm, inv, masks, w1k, w2k, w3k)

    return jnp.transpose(out_cm.reshape(c_in, N, HW), (1, 0, 2)).reshape(N, c_in, H, W)


def ref_forward(x_nchw, w1, b1, w2, b2, w3, b3):
    """Pure-JAX reference (NHWC internally, HWIO weights)."""
    x = jnp.transpose(x_nchw, (0, 2, 3, 1))               # NHWC
    s = lax.reduce_window(x, 0.0, lax.add, (1, 3, 3, 1), (1, 1, 1, 1), "SAME")
    cnt = lax.reduce_window(jnp.ones_like(x[..., :1]), 0.0, lax.add,
                            (1, 3, 3, 1), (1, 1, 1, 1), "SAME")
    pooled = s / cnt                                       # count_include_pad=False
    h = jnp.concatenate([x, pooled], axis=-1)

    def conv(a, w, b):
        y = lax.conv_general_dilated(a, w, (1, 1), "SAME",
                                     dimension_numbers=("NHWC", "HWIO", "NHWC"))
        return y + b.reshape(1, 1, 1, -1)

    h = jax.nn.relu(conv(h, w1, b1))
    h = jax.nn.relu(conv(h, w2, b2))
    z = conv(h, w3, b3)
    sp = jnp.where(z > 20.0, z, jnp.log1p(jnp.exp(jnp.minimum(z, 20.0))))
    return jnp.transpose(sp, (0, 3, 1, 2))                 # back to NCHW


if __name__ == "__main__":
    N, H, W = 2, 16, 16
    in_nc, channel = 3, 32   # scaled-down analogue of NLNet(in_nc=3, channel=64)

    key = jax.random.PRNGKey(0)
    ks = jax.random.split(key, 7)
    x = jax.random.normal(ks[0], (N, in_nc, H, W), jnp.float32)        # NCHW like PyTorch

    # Deterministic synthetic parameters (HWIO weights, (Cout,) biases).
    w1 = jax.random.normal(ks[1], (3, 3, 2 * in_nc, channel), jnp.float32) * 0.1
    b1 = jax.random.normal(ks[2], (channel,), jnp.float32) * 0.1
    w2 = jax.random.normal(ks[3], (3, 3, channel, channel), jnp.float32) * 0.05
    b2 = jax.random.normal(ks[4], (channel,), jnp.float32) * 0.1
    w3 = jax.random.normal(ks[5], (3, 3, channel, in_nc), jnp.float32) * 0.05
    b3 = jax.random.normal(ks[6], (in_nc,), jnp.float32) * 0.1

    ref = ref_forward(x, w1, b1, w2, b2, w3, b3)

    # Strict-precision path (f32 MXU operands).
    out_f32 = nlnet_forward(x, w1, b1, w2, b2, w3, b3, matmul_dtype=jnp.float32)
    jax.block_until_ready(out_f32)
    err32 = float(jnp.max(jnp.abs(out_f32 - ref)))
    assert jnp.allclose(out_f32, ref, atol=5e-4, rtol=5e-4), f"f32 max_err={err32}"

    # Default path (bf16 MXU operands, f32 accumulation / elementwise) -> looser check.
    out_bf16 = nlnet_forward(x, w1, b1, w2, b2, w3, b3)
    jax.block_until_ready(out_bf16)
    errbf = float(jnp.max(jnp.abs(out_bf16 - ref)))
    assert jnp.allclose(out_bf16, ref, atol=5e-2, rtol=5e-2), f"bf16 max_err={errbf}"

    print("KERNEL_OK")
</pallas_src>

<mosaic_0001>
module attributes {stable_mosaic.version = 11 : i64} {
  func.func @nlnet_kernel(%arg0: i32, %arg1: memref<3x512xf32, #tpu.memory_space<vmem>>, %arg2: memref<1x512xf32, #tpu.memory_space<vmem>>, %arg3: memref<9x512xf32, #tpu.memory_space<vmem>>, %arg4: memref<32x73xf32, #tpu.memory_space<vmem>>, %arg5: memref<32x289xf32, #tpu.memory_space<vmem>>, %arg6: memref<3x289xf32, #tpu.memory_space<vmem>>, %arg7: memref<3x512xf32, #tpu.memory_space<vmem>>, %arg8: memref<289x512xf32, #tpu.memory_space<vmem>>) attributes {dimension_semantics = [#tpu.dimension_semantics<parallel>], iteration_bounds = array<i64: 1>, scalar_prefetch = 0 : i64, scratch_operands = 1 : i64, tpu.core_type = #tpu.core_type<tc>, window_params = [{transform_indices = @transform_0, window_bounds = array<i64: 3, 512>}, {pipeline_mode = #tpu.pipeline_mode<synchronous>, transform_indices = @transform_1, window_bounds = array<i64: 1, 512>}, {pipeline_mode = #tpu.pipeline_mode<synchronous>, transform_indices = @transform_2, window_bounds = array<i64: 9, 512>}, {pipeline_mode = #tpu.pipeline_mode<synchronous>, transform_indices = @transform_3, window_bounds = array<i64: 32, 73>}, {pipeline_mode = #tpu.pipeline_mode<synchronous>, transform_indices = @transform_4, window_bounds = array<i64: 32, 289>}, {pipeline_mode = #tpu.pipeline_mode<synchronous>, transform_indices = @transform_5, window_bounds = array<i64: 3, 289>}, {transform_indices = @transform_6, window_bounds = array<i64: 3, 512>}]} {
    %c0 = arith.constant 0 : index
    %c0_0 = arith.constant 0 : index
    %0 = vector.load %arg1[%c0, %c0_0] : memref<3x512xf32, #tpu.memory_space<vmem>>, vector<3x512xf32>
    %c17_i32 = arith.constant 17 : i32
    %1 = tpu.dynamic_rotate %0 by %c17_i32 dim 1 : vector<3x512xf32>, i32 -> vector<3x512xf32>
    %c0_1 = arith.constant 0 : index
    %c0_2 = arith.constant 0 : index
    %2 = vector.load %arg3[%c0_1, %c0_2] : memref<9x512xf32, #tpu.memory_space<vmem>>, vector<1x512xf32>
    %3 = vector.broadcast %2 : vector<1x512xf32> to vector<3x512xf32>
    %4 = arith.mulf %1, %3 : vector<3x512xf32>
    %5 = arith.addf %0, %4 : vector<3x512xf32>
    %c16_i32 = arith.constant 16 : i32
    %6 = tpu.dynamic_rotate %0 by %c16_i32 dim 1 : vector<3x512xf32>, i32 -> vector<3x512xf32>
    %c1 = arith.constant 1 : index
    %c0_3 = arith.constant 0 : index
    %7 = vector.load %arg3[%c1, %c0_3] : memref<9x512xf32, #tpu.memory_space<vmem>>, vector<1x512xf32>
    %8 = vector.broadcast %7 : vector<1x512xf32> to vector<3x512xf32>
    %9 = arith.mulf %6, %8 : vector<3x512xf32>
    %10 = arith.addf %5, %9 : vector<3x512xf32>
    %c15_i32 = arith.constant 15 : i32
    %11 = tpu.dynamic_rotate %0 by %c15_i32 dim 1 : vector<3x512xf32>, i32 -> vector<3x512xf32>
    %c2 = arith.constant 2 : index
    %c0_4 = arith.constant 0 : index
    %12 = vector.load %arg3[%c2, %c0_4] : memref<9x512xf32, #tpu.memory_space<vmem>>, vector<1x512xf32>
    %13 = vector.broadcast %12 : vector<1x512xf32> to vector<3x512xf32>
    %14 = arith.mulf %11, %13 : vector<3x512xf32>
    %15 = arith.addf %10, %14 : vector<3x512xf32>
    %c1_i32 = arith.constant 1 : i32
    %16 = tpu.dynamic_rotate %0 by %c1_i32 dim 1 : vector<3x512xf32>, i32 -> vector<3x512xf32>
    %c3 = arith.constant 3 : index
    %c0_5 = arith.constant 0 : index
    %17 = vector.load %arg3[%c3, %c0_5] : memref<9x512xf32, #tpu.memory_space<vmem>>, vector<1x512xf32>
    %18 = vector.broadcast %17 : vector<1x512xf32> to vector<3x512xf32>
    %19 = arith.mulf %16, %18 : vector<3x512xf32>
    %20 = arith.addf %15, %19 : vector<3x512xf32>
    %c511_i32 = arith.constant 511 : i32
    %21 = tpu.dynamic_rotate %0 by %c511_i32 dim 1 : vector<3x512xf32>, i32 -> vector<3x512xf32>
    %c5 = arith.constant 5 : index
    %c0_6 = arith.constant 0 : index
    %22 = vector.load %arg3[%c5, %c0_6] : memref<9x512xf32, #tpu.memory_space<vmem>>, vector<1x512xf32>
    %23 = vector.broadcast %22 : vector<1x512xf32> to vector<3x512xf32>
    %24 = arith.mulf %21, %23 : vector<3x512xf32>
    %25 = arith.addf %20, %24 : vector<3x512xf32>
    %c497_i32 = arith.constant 497 : i32
    %26 = tpu.dynamic_rotate %0 by %c497_i32 dim 1 : vector<3x512xf32>, i32 -> vector<3x512xf32>
    %c6 = arith.constant 6 : index
    %c0_7 = arith.constant 0 : index
    %27 = vector.load %arg3[%c6, %c0_7] : memref<9x512xf32, #tpu.memory_space<vmem>>, vector<1x512xf32>
    %28 = vector.broadcast %27 : vector<1x512xf32> to vector<3x512xf32>
    %29 = arith.mulf %26, %28 : vector<3x512xf32>
    %30 = arith.addf %25, %29 : vector<3x512xf32>
    %c496_i32 = arith.constant 496 : i32
    %31 = tpu.dynamic_rotate %0 by %c496_i32 dim 1 : vector<3x512xf32>, i32 -> vector<3x512xf32>
    %c7 = arith.constant 7 : index
    %c0_8 = arith.constant 0 : index
    %32 = vector.load %arg3[%c7, %c0_8] : memref<9x512xf32, #tpu.memory_space<vmem>>, vector<1x512xf32>
    %33 = vector.broadcast %32 : vector<1x512xf32> to vector<3x512xf32>
    %34 = arith.mulf %31, %33 : vector<3x512xf32>
    %35 = arith.addf %30, %34 : vector<3x512xf32>
    %c495_i32 = arith.constant 495 : i32
    %36 = tpu.dynamic_rotate %0 by %c495_i32 dim 1 : vector<3x512xf32>, i32 -> vector<3x512xf32>
    %c8 = arith.constant 8 : index
    %c0_9 = arith.constant 0 : index
    %37 = vector.load %arg3[%c8, %c0_9] : memref<9x512xf32, #tpu.memory_space<vmem>>, vector<1x512xf32>
    %38 = vector.broadcast %37 : vector<1x512xf32> to vector<3x512xf32>
    %39 = arith.mulf %36, %38 : vector<3x512xf32>
    %40 = arith.addf %35, %39 : vector<3x512xf32>
    %c0_10 = arith.constant 0 : index
    %c0_11 = arith.constant 0 : index
    %41 = vector.load %arg2[%c0_10, %c0_11] : memref<1x512xf32, #tpu.memory_space<vmem>>, vector<1x512xf32>
    %42 = vector.broadcast %41 : vector<1x512xf32> to vector<3x512xf32>
    %43 = arith.mulf %40, %42 : vector<3x512xf32>
    %cst = arith.constant 0.000000e+00 : f32
    %44 = vector.broadcast %cst : f32 to vector<2x512xf32>
    %45 = tpu.concatenate %0, %43, %44 in 0 : vector<3x512xf32>, vector<3x512xf32>, vector<2x512xf32> -> vector<8x512xf32>
    %c17_i32_12 = arith.constant 17 : i32
    %46 = tpu.dynamic_rotate %45 by %c17_i32_12 dim 1 : vector<8x512xf32>, i32 -> vector<8x512xf32>
    %c0_13 = arith.constant 0 : index
    %c0_14 = arith.constant 0 : index
    %47 = vector.load %arg3[%c0_13, %c0_14] : memref<9x512xf32, #tpu.memory_space<vmem>>, vector<1x512xf32>
    %48 = vector.broadcast %47 : vector<1x512xf32> to vector<8x512xf32>
    %49 = arith.mulf %46, %48 : vector<8x512xf32>
    %c0_15 = arith.constant 0 : index
    %c0_16 = arith.constant 0 : index
    %50 = vector.load %arg8[%c0_15, %c0_16] : memref<289x512xf32, #tpu.memory_space<vmem>>, vector<8x512xf32>
    tpu.vector_store %arg8[%c0_15, %c0_16], %49 {strides = array<i32>} : memref<289x512xf32, #tpu.memory_space<vmem>>, vector<8x512xf32>,
    %c16_i32_17 = arith.constant 16 : i32
    %51 = tpu.dynamic_rotate %45 by %c16_i32_17 dim 1 : vector<8x512xf32>, i32 -> vector<8x512xf32>
    %c1_18 = arith.constant 1 : index
    %c0_19 = arith.constant 0 : index
    %52 = vector.load %arg3[%c1_18, %c0_19] : memref<9x512xf32, #tpu.memory_space<vmem>>, vector<1x512xf32>
    %53 = vector.broadcast %52 : vector<1x512xf32> to vector<8x512xf32>
    %54 = arith.mulf %51, %53 : vector<8x512xf32>
    %c8_20 = arith.constant 8 : index
    %c0_21 = arith.constant 0 : index
    %55 = vector.load %arg8[%c8_20, %c0_21] : memref<289x512xf32, #tpu.memory_space<vmem>>, vector<8x512xf32>
    tpu.vector_store %arg8[%c8_20, %c0_21], %54 {strides = array<i32>} : memref<289x512xf32, #tpu.memory_space<vmem>>, vector<8x512xf32>,
    %c15_i32_22 = arith.constant 15 : i32
    %56 = tpu.dynamic_rotate %45 by %c15_i32_22 dim 1 : vector<8x512xf32>, i32 -> vector<8x512xf32>
    %c2_23 = arith.constant 2 : index
    %c0_24 = arith.constant 0 : index
    %57 = vector.load %arg3[%c2_23, %c0_24] : memref<9x512xf32, #tpu.memory_space<vmem>>, vector<1x512xf32>
    %58 = vector.broadcast %57 : vector<1x512xf32> to vector<8x512xf32>
    %59 = arith.mulf %56, %58 : vector<8x512xf32>
    %c16 = arith.constant 16 : index
    %c0_25 = arith.constant 0 : index
    %60 = vector.load %arg8[%c16, %c0_25] : memref<289x512xf32, #tpu.memory_space<vmem>>, vector<8x512xf32>
    tpu.vector_store %arg8[%c16, %c0_25], %59 {strides = array<i32>} : memref<289x512xf32, #tpu.memory_space<vmem>>, vector<8x512xf32>,
    %c1_i32_26 = arith.constant 1 : i32
    %61 = tpu.dynamic_rotate %45 by %c1_i32_26 dim 1 : vector<8x512xf32>, i32 -> vector<8x512xf32>
    %c3_27 = arith.constant 3 : index
    %c0_28 = arith.constant 0 : index
    %62 = vector.load %arg3[%c3_27, %c0_28] : memref<9x512xf32, #tpu.memory_space<vmem>>, vector<1x512xf32>
    %63 = vector.broadcast %62 : vector<1x512xf32> to vector<8x512xf32>
    %64 = arith.mulf %61, %63 : vector<8x512xf32>
    %c24 = arith.constant 24 : index
    %c0_29 = arith.constant 0 : index
    %65 = vector.load %arg8[%c24, %c0_29] : memref<289x512xf32, #tpu.memory_space<vmem>>, vector<8x512xf32>
    tpu.vector_store %arg8[%c24, %c0_29], %64 {strides = array<i32>} : memref<289x512xf32, #tpu.memory_space<vmem>>, vector<8x512xf32>,
    %c32 = arith.constant 32 : index
    %c0_30 = arith.constant 0 : index
    %66 = vector.load %arg8[%c32, %c0_30] : memref<289x512xf32, #tpu.memory_space<vmem>>, vector<8x512xf32>
    tpu.vector_store %arg8[%c32, %c0_30], %45 {strides = array<i32>} : memref<289x512xf32, #tpu.memory_space<vmem>>, vector<8x512xf32>,
    %c511_i32_31 = arith.constant 511 : i32
    %67 = tpu.dynamic_rotate %45 by %c511_i32_31 dim 1 : vector<8x512xf32>, i32 -> vector<8x512xf32>
    %c5_32 = arith.constant 5 : index
    %c0_33 = arith.constant 0 : index
    %68 = vector.load %arg3[%c5_32, %c0_33] : memref<9x512xf32, #tpu.memory_space<vmem>>, vector<1x512xf32>
    %69 = vector.broadcast %68 : vector<1x512xf32> to vector<8x512xf32>
    %70 = arith.mulf %67, %69 : vector<8x512xf32>
    %c40 = arith.constant 40 : index
    %c0_34 = arith.constant 0 : index
    %71 = vector.load %arg8[%c40, %c0_34] : memref<289x512xf32, #tpu.memory_space<vmem>>, vector<8x512xf32>
    tpu.vector_store %arg8[%c40, %c0_34], %70 {strides = array<i32>} : memref<289x512xf32, #tpu.memory_space<vmem>>, vector<8x512xf32>,
    %c497_i32_35 = arith.constant 497 : i32
    %72 = tpu.dynamic_rotate %45 by %c497_i32_35 dim 1 : vector<8x512xf32>, i32 -> vector<8x512xf32>
    %c6_36 = arith.constant 6 : index
    %c0_37 = arith.constant 0 : index
    %73 = vector.load %arg3[%c6_36, %c0_37] : memref<9x512xf32, #tpu.memory_space<vmem>>, vector<1x512xf32>
    %74 = vector.broadcast %73 : vector<1x512xf32> to vector<8x512xf32>
    %75 = arith.mulf %72, %74 : vector<8x512xf32>
    %c48 = arith.constant 48 : index
    %c0_38 = arith.constant 0 : index
    %76 = vector.load %arg8[%c48, %c0_38] : memref<289x512xf32, #tpu.memory_space<vmem>>, vector<8x512xf32>
    tpu.vector_store %arg8[%c48, %c0_38], %75 {strides = array<i32>} : memref<289x512xf32, #tpu.memory_space<vmem>>, vector<8x512xf32>,
    %c496_i32_39 = arith.constant 496 : i32
    %77 = tpu.dynamic_rotate %45 by %c496_i32_39 dim 1 : vector<8x512xf32>, i32 -> vector<8x512xf32>
    %c7_40 = arith.constant 7 : index
    %c0_41 = arith.constant 0 : index
    %78 = vector.load %arg3[%c7_40, %c0_41] : memref<9x512xf32, #tpu.memory_space<vmem>>, vector<1x512xf32>
    %79 = vector.broadcast %78 : vector<1x512xf32> to vector<8x512xf32>
    %80 = arith.mulf %77, %79 : vector<8x512xf32>
    %c56 = arith.constant 56 : index
    %c0_42 = arith.constant 0 : index
    %81 = vector.load %arg8[%c56, %c0_42] : memref<289x512xf32, #tpu.memory_space<vmem>>, vector<8x512xf32>
    tpu.vector_store %arg8[%c56, %c0_42], %80 {strides = array<i32>} : memref<289x512xf32, #tpu.memory_space<vmem>>, vector<8x512xf32>,
    %c495_i32_43 = arith.constant 495 : i32
    %82 = tpu.dynamic_rotate %45 by %c495_i32_43 dim 1 : vector<8x512xf32>, i32 -> vector<8x512xf32>
    %c8_44 = arith.constant 8 : index
    %c0_45 = arith.constant 0 : index
    %83 = vector.load %arg3[%c8_44, %c0_45] : memref<9x512xf32, #tpu.memory_space<vmem>>, vector<1x512xf32>
    %84 = vector.broadcast %83 : vector<1x512xf32> to vector<8x512xf32>
    %85 = arith.mulf %82, %84 : vector<8x512xf32>
    %c64 = arith.constant 64 : index
    %c0_46 = arith.constant 0 : index
    %86 = vector.load %arg8[%c64, %c0_46] : memref<289x512xf32, #tpu.memory_space<vmem>>, vector<8x512xf32>
    tpu.vector_store %arg8[%c64, %c0_46], %85 {strides = array<i32>} : memref<289x512xf32, #tpu.memory_space<vmem>>, vector<8x512xf32>,
    %cst_47 = arith.constant 1.000000e+00 : f32
    %87 = vector.broadcast %cst_47 : f32 to vector<1x512xf32>
    %c72 = arith.constant 72 : index
    %c0_48 = arith.constant 0 : index
    %88 = vector.load %arg8[%c72, %c0_48] : memref<289x512xf32, #tpu.memory_space<vmem>>, vector<1x512xf32>
    tpu.vector_store %arg8[%c72, %c0_48], %87 {strides = array<i32>} : memref<289x512xf32, #tpu.memory_space<vmem>>, vector<1x512xf32>,
    %c0_49 = arith.constant 0 : index
    %c0_50 = arith.constant 0 : index
    %89 = vector.load %arg4[%c0_49, %c0_50] : memref<32x73xf32, #tpu.memory_space<vmem>>, vector<32x73xf32>
    %c0_51 = arith.constant 0 : index
    %c0_52 = arith.constant 0 : index
    %90 = vector.load %arg8[%c0_51, %c0_52] : memref<289x512xf32, #tpu.memory_space<vmem>>, vector<73x512xf32>
    %cst_53 = arith.constant dense<0.000000e+00> : vector<32x512xf32>
    %91 = tpu.matmul %89, %90, %cst_53 {dimension_numbers = #tpu.dot_dimension_numbers<[1], [0], [0], [1], [0, 0, 1, 1], [], []>} : vector<32x73xf32>, vector<73x512xf32>, vector<32x512xf32> -> vector<32x512xf32>
    %cst_54 = arith.constant 0.000000e+00 : f32
    %92 = vector.broadcast %cst_54 : f32 to vector<32x512xf32>
    %93 = arith.maximumf %91, %92 : vector<32x512xf32>
    %c17_i32_55 = arith.constant 17 : i32
    %94 = tpu.dynamic_rotate %93 by %c17_i32_55 dim 1 : vector<32x512xf32>, i32 -> vector<32x512xf32>
    %c0_56 = arith.constant 0 : index
    %c0_57 = arith.constant 0 : index
    %95 = vector.load %arg3[%c0_56, %c0_57] : memref<9x512xf32, #tpu.memory_space<vmem>>, vector<1x512xf32>
    %96 = vector.broadcast %95 : vector<1x512xf32> to vector<32x512xf32>
    %97 = arith.mulf %94, %96 : vector<32x512xf32>
    %c0_58 = arith.constant 0 : index
    %c0_59 = arith.constant 0 : index
    %98 = vector.load %arg8[%c0_58, %c0_59] : memref<289x512xf32, #tpu.memory_space<vmem>>, vector<32x512xf32>
    tpu.vector_store %arg8[%c0_58, %c0_59], %97 {strides = array<i32>} : memref<289x512xf32, #tpu.memory_space<vmem>>, vector<32x512xf32>,
    %c16_i32_60 = arith.constant 16 : i32
    %99 = tpu.dynamic_rotate %93 by %c16_i32_60 dim 1 : vector<32x512xf32>, i32 -> vector<32x512xf32>
    %c1_61 = arith.constant 1 : index
    %c0_62 = arith.constant 0 : index
    %100 = vector.load %arg3[%c1_61, %c0_62] : memref<9x512xf32, #tpu.memory_space<vmem>>, vector<1x512xf32>
    %101 = vector.broadcast %100 : vector<1x512xf32> to vector<32x512xf32>
    %102 = arith.mulf %99, %101 : vector<32x512xf32>
    %c32_63 = arith.constant 32 : index
    %c0_64 = arith.constant 0 : index
    %103 = vector.load %arg8[%c32_63, %c0_64] : memref<289x512xf32, #tpu.memory_space<vmem>>, vector<32x512xf32>
    tpu.vector_store %arg8[%c32_63, %c0_64], %102 {strides = array<i32>} : memref<289x512xf32, #tpu.memory_space<vmem>>, vector<32x512xf32>,
    %c15_i32_65 = arith.constant 15 : i32
    %104 = tpu.dynamic_rotate %93 by %c15_i32_65 dim 1 : vector<32x512xf32>, i32 -> vector<32x512xf32>
    %c2_66 = arith.constant 2 : index
    %c0_67 = arith.constant 0 : index
    %105 = vector.load %arg3[%c2_66, %c0_67] : memref<9x512xf32, #tpu.memory_space<vmem>>, vector<1x512xf32>
    %106 = vector.broadcast %105 : vector<1x512xf32> to vector<32x512xf32>
    %107 = arith.mulf %104, %106 : vector<32x512xf32>
    %c64_68 = arith.constant 64 : index
    %c0_69 = arith.constant 0 : index
    %108 = vector.load %arg8[%c64_68, %c0_69] : memref<289x512xf32, #tpu.memory_space<vmem>>, vector<32x512xf32>
    tpu.vector_store %arg8[%c64_68, %c0_69], %107 {strides = array<i32>} : memref<289x512xf32, #tpu.memory_space<vmem>>, vector<32x512xf32>,
    %c1_i32_70 = arith.constant 1 : i32
    %109 = tpu.dynamic_rotate %93 by %c1_i32_70 dim 1 : vector<32x512xf32>, i32 -> vector<32x512xf32>
    %c3_71 = arith.constant 3 : index
    %c0_72 = arith.constant 0 : index
    %110 = vector.load %arg3[%c3_71, %c0_72] : memref<9x512xf32, #tpu.memory_space<vmem>>, vector<1x512xf32>
    %111 = vector.broadcast %110 : vector<1x512xf32> to vector<32x512xf32>
    %112 = arith.mulf %109, %111 : vector<32x512xf32>
    %c96 = arith.constant 96 : index
    %c0_73 = arith.constant 0 : index
    %113 = vector.load %arg8[%c96, %c0_73] : memref<289x512xf32, #tpu.memory_space<vmem>>, vector<32x512xf32>
    tpu.vector_store %arg8[%c96, %c0_73], %112 {strides = array<i32>} : memref<289x512xf32, #tpu.memory_space<vmem>>, vector<32x512xf32>,
    %c128 = arith.constant 128 : index
    %c0_74 = arith.constant 0 : index
    %114 = vector.load %arg8[%c128, %c0_74] : memref<289x512xf32, #tpu.memory_space<vmem>>, vector<32x512xf32>
    tpu.vector_store %arg8[%c128, %c0_74], %93 {strides = array<i32>} : memref<289x512xf32, #tpu.memory_space<vmem>>, vector<32x512xf32>,
    %c511_i32_75 = arith.constant 511 : i32
    %115 = tpu.dynamic_rotate %93 by %c511_i32_75 dim 1 : vector<32x512xf32>, i32 -> vector<32x512xf32>
    %c5_76 = arith.constant 5 : index
    %c0_77 = arith.constant 0 : index
    %116 = vector.load %arg3[%c5_76, %c0_77] : memref<9x512xf32, #tpu.memory_space<vmem>>, vector<1x512xf32>
    %117 = vector.broadcast %116 : vector<1x512xf32> to vector<32x512xf32>
    %118 = arith.mulf %115, %117 : vector<32x512xf32>
    %c160 = arith.constant 160 : index
    %c0_78 = arith.constant 0 : index
    %119 = vector.load %arg8[%c160, %c0_78] : memref<289x512xf32, #tpu.memory_space<vmem>>, vector<32x512xf32>
    tpu.vector_store %arg8[%c160, %c0_78], %118 {strides = array<i32>} : memref<289x512xf32, #tpu.memory_space<vmem>>, vector<32x512xf32>,
    %c497_i32_79 = arith.constant 497 : i32
    %120 = tpu.dynamic_rotate %93 by %c497_i32_79 dim 1 : vector<32x512xf32>, i32 -> vector<32x512xf32>
    %c6_80 = arith.constant 6 : index
    %c0_81 = arith.constant 0 : index
    %121 = vector.load %arg3[%c6_80, %c0_81] : memref<9x512xf32, #tpu.memory_space<vmem>>, vector<1x512xf32>
    %122 = vector.broadcast %121 : vector<1x512xf32> to vector<32x512xf32>
    %123 = arith.mulf %120, %122 : vector<32x512xf32>
    %c192 = arith.constant 192 : index
    %c0_82 = arith.constant 0 : index
    %124 = vector.load %arg8[%c192, %c0_82] : memref<289x512xf32, #tpu.memory_space<vmem>>, vector<32x512xf32>
    tpu.vector_store %arg8[%c192, %c0_82], %123 {strides = array<i32>} : memref<289x512xf32, #tpu.memory_space<vmem>>, vector<32x512xf32>,
    %c496_i32_83 = arith.constant 496 : i32
    %125 = tpu.dynamic_rotate %93 by %c496_i32_83 dim 1 : vector<32x512xf32>, i32 -> vector<32x512xf32>
    %c7_84 = arith.constant 7 : index
    %c0_85 = arith.constant 0 : index
    %126 = vector.load %arg3[%c7_84, %c0_85] : memref<9x512xf32, #tpu.memory_space<vmem>>, vector<1x512xf32>
    %127 = vector.broadcast %126 : vector<1x512xf32> to vector<32x512xf32>
    %128 = arith.mulf %125, %127 : vector<32x512xf32>
    %c224 = arith.constant 224 : index
    %c0_86 = arith.constant 0 : index
    %129 = vector.load %arg8[%c224, %c0_86] : memref<289x512xf32, #tpu.memory_space<vmem>>, vector<32x512xf32>
    tpu.vector_store %arg8[%c224, %c0_86], %128 {strides = array<i32>} : memref<289x512xf32, #tpu.memory_space<vmem>>, vector<32x512xf32>,
    %c495_i32_87 = arith.constant 495 : i32
    %130 = tpu.dynamic_rotate %93 by %c495_i32_87 dim 1 : vector<32x512xf32>, i32 -> vector<32x512xf32>
    %c8_88 = arith.constant 8 : index
    %c0_89 = arith.constant 0 : index
    %131 = vector.load %arg3[%c8_88, %c0_89] : memref<9x512xf32, #tpu.memory_space<vmem>>, vector<1x512xf32>
    %132 = vector.broadcast %131 : vector<1x512xf32> to vector<32x512xf32>
    %133 = arith.mulf %130, %132 : vector<32x512xf32>
    %c256 = arith.constant 256 : index
    %c0_90 = arith.constant 0 : index
    %134 = vector.load %arg8[%c256, %c0_90] : memref<289x512xf32, #tpu.memory_space<vmem>>, vector<32x512xf32>
    tpu.vector_store %arg8[%c256, %c0_90], %133 {strides = array<i32>} : memref<289x512xf32, #tpu.memory_space<vmem>>, vector<32x512xf32>,
    %cst_91 = arith.constant 1.000000e+00 : f32
    %135 = vector.broadcast %cst_91 : f32 to vector<1x512xf32>
    %c288 = arith.constant 288 : index
    %c0_92 = arith.constant 0 : index
    %136 = vector.load %arg8[%c288, %c0_92] : memref<289x512xf32, #tpu.memory_space<vmem>>, vector<1x512xf32>
    tpu.vector_store %arg8[%c288, %c0_92], %135 {strides = array<i32>} : memref<289x512xf32, #tpu.memory_space<vmem>>, vector<1x512xf32>,
    %c0_93 = arith.constant 0 : index
    %c0_94 = arith.constant 0 : index
    %137 = vector.load %arg5[%c0_93, %c0_94] : memref<32x289xf32, #tpu.memory_space<vmem>>, vector<32x289xf32>
    %c0_95 = arith.constant 0 : index
    %c0_96 = arith.constant 0 : index
    %138 = vector.load %arg8[%c0_95, %c0_96] : memref<289x512xf32, #tpu.memory_space<vmem>>, vector<289x512xf32>
    %cst_97 = arith.constant dense<0.000000e+00> : vector<32x512xf32>
    %139 = tpu.matmul %137, %138, %cst_97 {dimension_numbers = #tpu.dot_dimension_numbers<[1], [0], [0], [1], [0, 0, 1, 1], [], []>} : vector<32x289xf32>, vector<289x512xf32>, vector<32x512xf32> -> vector<32x512xf32>
    %cst_98 = arith.constant 0.000000e+00 : f32
    %140 = vector.broadcast %cst_98 : f32 to vector<32x512xf32>
    %141 = arith.maximumf %139, %140 : vector<32x512xf32>
    %c17_i32_99 = arith.constant 17 : i32
    %142 = tpu.dynamic_rotate %141 by %c17_i32_99 dim 1 : vector<32x512xf32>, i32 -> vector<32x512xf32>
    %c0_100 = arith.constant 0 : index
    %c0_101 = arith.constant 0 : index
    %143 = vector.load %arg3[%c0_100, %c0_101] : memref<9x512xf32, #tpu.memory_space<vmem>>, vector<1x512xf32>
    %144 = vector.broadcast %143 : vector<1x512xf32> to vector<32x512xf32>
    %145 = arith.mulf %142, %144 : vector<32x512xf32>
    %c0_102 = arith.constant 0 : index
    %c0_103 = arith.constant 0 : index
    %146 = vector.load %arg8[%c0_102, %c0_103] : memref<289x512xf32, #tpu.memory_space<vmem>>, vector<32x512xf32>
    tpu.vector_store %arg8[%c0_102, %c0_103], %145 {strides = array<i32>} : memref<289x512xf32, #tpu.memory_space<vmem>>, vector<32x512xf32>,
    %c16_i32_104 = arith.constant 16 : i32
    %147 = tpu.dynamic_rotate %141 by %c16_i32_104 dim 1 : vector<32x512xf32>, i32 -> vector<32x512xf32>
    %c1_105 = arith.constant 1 : index
    %c0_106 = arith.constant 0 : index
    %148 = vector.load %arg3[%c1_105, %c0_106] : memref<9x512xf32, #tpu.memory_space<vmem>>, vector<1x512xf32>
    %149 = vector.broadcast %148 : vector<1x512xf32> to vector<32x512xf32>
    %150 = arith.mulf %147, %149 : vector<32x512xf32>
    %c32_107 = arith.constant 32 : index
    %c0_108 = arith.constant 0 : index
    %151 = vector.load %arg8[%c32_107, %c0_108] : memref<289x512xf32, #tpu.memory_space<vmem>>, vector<32x512xf32>
    tpu.vector_store %arg8[%c32_107, %c0_108], %150 {strides = array<i32>} : memref<289x512xf32, #tpu.memory_space<vmem>>, vector<32x512xf32>,
    %c15_i32_109 = arith.constant 15 : i32
    %152 = tpu.dynamic_rotate %141 by %c15_i32_109 dim 1 : vector<32x512xf32>, i32 -> vector<32x512xf32>
    %c2_110 = arith.constant 2 : index
    %c0_111 = arith.constant 0 : index
    %153 = vector.load %arg3[%c2_110, %c0_111] : memref<9x512xf32, #tpu.memory_space<vmem>>, vector<1x512xf32>
    %154 = vector.broadcast %153 : vector<1x512xf32> to vector<32x512xf32>
    %155 = arith.mulf %152, %154 : vector<32x512xf32>
    %c64_112 = arith.constant 64 : index
    %c0_113 = arith.constant 0 : index
    %156 = vector.load %arg8[%c64_112, %c0_113] : memref<289x512xf32, #tpu.memory_space<vmem>>, vector<32x512xf32>
    tpu.vector_store %arg8[%c64_112, %c0_113], %155 {strides = array<i32>} : memref<289x512xf32, #tpu.memory_space<vmem>>, vector<32x512xf32>,
    %c1_i32_114 = arith.constant 1 : i32
    %157 = tpu.dynamic_rotate %141 by %c1_i32_114 dim 1 : vector<32x512xf32>, i32 -> vector<32x512xf32>
    %c3_115 = arith.constant 3 : index
    %c0_116 = arith.constant 0 : index
    %158 = vector.load %arg3[%c3_115, %c0_116] : memref<9x512xf32, #tpu.memory_space<vmem>>, vector<1x512xf32>
    %159 = vector.broadcast %158 : vector<1x512xf32> to vector<32x512xf32>
    %160 = arith.mulf %157, %159 : vector<32x512xf32>
    %c96_117 = arith.constant 96 : index
    %c0_118 = arith.constant 0 : index
    %161 = vector.load %arg8[%c96_117, %c0_118] : memref<289x512xf32, #tpu.memory_space<vmem>>, vector<32x512xf32>
    tpu.vector_store %arg8[%c96_117, %c0_118], %160 {strides = array<i32>} : memref<289x512xf32, #tpu.memory_space<vmem>>, vector<32x512xf32>,
    %c128_119 = arith.constant 128 : index
    %c0_120 = arith.constant 0 : index
    %162 = vector.load %arg8[%c128_119, %c0_120] : memref<289x512xf32, #tpu.memory_space<vmem>>, vector<32x512xf32>
    tpu.vector_store %arg8[%c128_119, %c0_120], %141 {strides = array<i32>} : memref<289x512xf32, #tpu.memory_space<vmem>>, vector<32x512xf32>,
    %c511_i32_121 = arith.constant 511 : i32
    %163 = tpu.dynamic_rotate %141 by %c511_i32_121 dim 1 : vector<32x512xf32>, i32 -> vector<32x512xf32>
    %c5_122 = arith.constant 5 : index
    %c0_123 = arith.constant 0 : index
    %164 = vector.load %arg3[%c5_122, %c0_123] : memref<9x512xf32, #tpu.memory_space<vmem>>, vector<1x512xf32>
    %165 = vector.broadcast %164 : vector<1x512xf32> to vector<32x512xf32>
    %166 = arith.mulf %163, %165 : vector<32x512xf32>
    %c160_124 = arith.constant 160 : index
    %c0_125 = arith.constant 0 : index
    %167 = vector.load %arg8[%c160_124, %c0_125] : memref<289x512xf32, #tpu.memory_space<vmem>>, vector<32x512xf32>
    tpu.vector_store %arg8[%c160_124, %c0_125], %166 {strides = array<i32>} : memref<289x512xf32, #tpu.memory_space<vmem>>, vector<32x512xf32>,
    %c497_i32_126 = arith.constant 497 : i32
    %168 = tpu.dynamic_rotate %141 by %c497_i32_126 dim 1 : vector<32x512xf32>, i32 -> vector<32x512xf32>
    %c6_127 = arith.constant 6 : index
    %c0_128 = arith.constant 0 : index
    %169 = vector.load %arg3[%c6_127, %c0_128] : memref<9x512xf32, #tpu.memory_space<vmem>>, vector<1x512xf32>
    %170 = vector.broadcast %169 : vector<1x512xf32> to vector<32x512xf32>
    %171 = arith.mulf %168, %170 : vector<32x512xf32>
    %c192_129 = arith.constant 192 : index
    %c0_130 = arith.constant 0 : index
    %172 = vector.load %arg8[%c192_129, %c0_130] : memref<289x512xf32, #tpu.memory_space<vmem>>, vector<32x512xf32>
    tpu.vector_store %arg8[%c192_129, %c0_130], %171 {strides = array<i32>} : memref<289x512xf32, #tpu.memory_space<vmem>>, vector<32x512xf32>,
    %c496_i32_131 = arith.constant 496 : i32
    %173 = tpu.dynamic_rotate %141 by %c496_i32_131 dim 1 : vector<32x512xf32>, i32 -> vector<32x512xf32>
    %c7_132 = arith.constant 7 : index
    %c0_133 = arith.constant 0 : index
    %174 = vector.load %arg3[%c7_132, %c0_133] : memref<9x512xf32, #tpu.memory_space<vmem>>, vector<1x512xf32>
    %175 = vector.broadcast %174 : vector<1x512xf32> to vector<32x512xf32>
    %176 = arith.mulf %173, %175 : vector<32x512xf32>
    %c224_134 = arith.constant 224 : index
    %c0_135 = arith.constant 0 : index
    %177 = vector.load %arg8[%c224_134, %c0_135] : memref<289x512xf32, #tpu.memory_space<vmem>>, vector<32x512xf32>
    tpu.vector_store %arg8[%c224_134, %c0_135], %176 {strides = array<i32>} : memref<289x512xf32, #tpu.memory_space<vmem>>, vector<32x512xf32>,
    %c495_i32_136 = arith.constant 495 : i32
    %178 = tpu.dynamic_rotate %141 by %c495_i32_136 dim 1 : vector<32x512xf32>, i32 -> vector<32x512xf32>
    %c8_137 = arith.constant 8 : index
    %c0_138 = arith.constant 0 : index
    %179 = vector.load %arg3[%c8_137, %c0_138] : memref<9x512xf32, #tpu.memory_space<vmem>>, vector<1x512xf32>
    %180 = vector.broadcast %179 : vector<1x512xf32> to vector<32x512xf32>
    %181 = arith.mulf %178, %180 : vector<32x512xf32>
    %c256_139 = arith.constant 256 : index
    %c0_140 = arith.constant 0 : index
    %182 = vector.load %arg8[%c256_139, %c0_140] : memref<289x512xf32, #tpu.memory_space<vmem>>, vector<32x512xf32>
    tpu.vector_store %arg8[%c256_139, %c0_140], %181 {strides = array<i32>} : memref<289x512xf32, #tpu.memory_space<vmem>>, vector<32x512xf32>,
    %c0_141 = arith.constant 0 : index
    %c0_142 = arith.constant 0 : index
    %183 = vector.load %arg6[%c0_141, %c0_142] : memref<3x289xf32, #tpu.memory_space<vmem>>, vector<3x289xf32>
    %c0_143 = arith.constant 0 : index
    %c0_144 = arith.constant 0 : index
    %184 = vector.load %arg8[%c0_143, %c0_144] : memref<289x512xf32, #tpu.memory_space<vmem>>, vector<289x512xf32>
    %cst_145 = arith.constant dense<0.000000e+00> : vector<3x512xf32>
    %185 = tpu.matmul %183, %184, %cst_145 {dimension_numbers = #tpu.dot_dimension_numbers<[1], [0], [0], [1], [0, 0, 1, 1], [], []>} : vector<3x289xf32>, vector<289x512xf32>, vector<3x512xf32> -> vector<3x512xf32>
    %cst_146 = arith.constant 2.000000e+01 : f32
    %186 = vector.broadcast %cst_146 : f32 to vector<3x512xf32>
    %187 = arith.cmpf ogt, %185, %186 : vector<3x512xf32>
    %cst_147 = arith.constant 2.000000e+01 : f32
    %188 = vector.broadcast %cst_147 : f32 to vector<3x512xf32>
    %189 = arith.minimumf %185, %188 : vector<3x512xf32>
    %190 = math.exp %189 : vector<3x512xf32>
    %191 = math.log1p %190 : vector<3x512xf32>
    %192 = arith.select %187, %185, %191 : vector<3x512xi1>, vector<3x512xf32>
    %c0_148 = arith.constant 0 : index
    %c0_149 = arith.constant 0 : index
    %193 = vector.load %arg7[%c0_148, %c0_149] : memref<3x512xf32, #tpu.memory_space<vmem>>, vector<3x512xf32>
    tpu.vector_store %arg7[%c0_148, %c0_149], %192 {strides = array<i32>} : memref<3x512xf32, #tpu.memory_space<vmem>>, vector<3x512xf32>,
    return
  }
  func.func @transform_0(%arg0: i32) -> (i32, i32) {
    %c0_i32 = arith.constant 0 : i32
    %c0_i32_0 = arith.constant 0 : i32
    return %c0_i32, %arg0 : i32, i32
  }
  func.func @transform_1(%arg0: i32) -> (i32, i32) {
    %c0_i32 = arith.constant 0 : i32
    %c0_i32_0 = arith.constant 0 : i32
    %c0_i32_1 = arith.constant 0 : i32
    return %c0_i32, %c0_i32_0 : i32, i32
  }
  func.func @transform_2(%arg0: i32) -> (i32, i32) {
    %c0_i32 = arith.constant 0 : i32
    %c0_i32_0 = arith.constant 0 : i32
    %c0_i32_1 = arith.constant 0 : i32
    return %c0_i32, %c0_i32_0 : i32, i32
  }
  func.func @transform_3(%arg0: i32) -> (i32, i32) {
    %c0_i32 = arith.constant 0 : i32
    %c0_i32_0 = arith.constant 0 : i32
    %c0_i32_1 = arith.constant 0 : i32
    return %c0_i32, %c0_i32_0 : i32, i32
  }
  func.func @transform_4(%arg0: i32) -> (i32, i32) {
    %c0_i32 = arith.constant 0 : i32
    %c0_i32_0 = arith.constant 0 : i32
    %c0_i32_1 = arith.constant 0 : i32
    return %c0_i32, %c0_i32_0 : i32, i32
  }
  func.func @transform_5(%arg0: i32) -> (i32, i32) {
    %c0_i32 = arith.constant 0 : i32
    %c0_i32_0 = arith.constant 0 : i32
    %c0_i32_1 = arith.constant 0 : i32
    return %c0_i32, %c0_i32_0 : i32, i32
  }
  func.func @transform_6(%arg0: i32) -> (i32, i32) {
    %c0_i32 = arith.constant 0 : i32
    %c0_i32_0 = arith.constant 0 : i32
    return %c0_i32, %arg0 : i32, i32
  }
}

</mosaic_0001>

<bundles_post_ra>
// kernel: tpu_custom_call.1
= control target key start
LH: loop header
LB: loop body
LE: loop exit
PB: predicated region body
PF: predicated region fallthrough
CT: control target
= control target key end

     0   :  { %11 = vsyncpa [#allocation4], 0  ;;  %s7673_s0 = inlined_call_operand.hbm [shape: f32[3,512], index: 0, kind: input, shape index: {}]   ;;  %s7674_s1 = inlined_call_operand.hbm [shape: f32[1,512], index: 1, kind: input, shape index: {}]   ;;  %s7675_s2 = inlined_call_operand.hbm [shape: f32[9,512], index: 2, kind: input, shape index: {}]   ;;  %s7676_s3 = inlined_call_operand.hbm [shape: f32[32,73], index: 3, kind: input, shape index: {}]   ;;  %s7677_s4 = inlined_call_operand.hbm [shape: f32[32,289], index: 4, kind: input, shape index: {}]   ;;  %s7678_s5 = inlined_call_operand.vmem [shape: f32[3,289], index: 5, kind: input, shape index: {}]   ;;  %s7679_s6 = inlined_call_operand.hbm [shape: f32[3,512], index: 6, kind: output, shape index: {}]  }
   0x1   :  { %12 = vsyncpa [#allocation7], 0 }
   0x2   :  { %13 = vsyncpa [#allocation10], 0 }
   0x3   :  { %14 = vsyncpa [#allocation5], 0  ;;  %s4467_s21 = smov [#allocation6]   ;;  %s4468_s23 = smov [#allocation9]  }
   0x4   :  { %s31_s22 = sshll.u32 %s4467_s21, 4  ;;  %s52_s24 = sshll.u32 %s4468_s23, 4  ;;  %s32_s22 = int_to_ptr.vmem [resolvable:$true] %s31_s22  ;;  %s4525_s24 = int_to_ptr.vmem [resolvable:$true] %s52_s24 }
   0x5   :  { %s4327_s27 = scalar_lea.hbm %s7674_s1, 64 }
   0x6   :  { %p4328_p0 = scmp.ne.s32.totalorder %s7674_s1, %s4327_s27  ;;  %p4331_p1 = scmp.lt.u32.totalorder %s4327_s27, %s7674_s1 }
   0x8   :  { %p4333_p2 = pnand %p4331_p1, %p4328_p0 }
   0xa   :  { %4336 = shalt.err (!%p4333_p2)
}
   0xb   :  { %s4337_s8 = scalar_lea.vmem %s32_s22, 64  ;;  %p4342_p4 = scmp.lt.s32.totalorder %s32_s22, %s32_s22 }
   0xc   :  { %p4338_p3 = scmp.ne.s32.totalorder %s32_s22, %s4337_s8  ;;  %p4343_p5 = scmp.lt.s32.totalorder %s4337_s8, %s4337_s8 }
   0xe   :  { %p4344_p6 = por %p4343_p5, %p4342_p4 }
  0x10   :  { %p4345_p7 = pnand %p4344_p6, %p4338_p3 }
  0x12   :  { %4348 = shalt.err (!%p4345_p7)
}
  0x13   :  { %34 = dma.hbm_to_vmem [thread:$0]  %s7674_s1, 64, %s32_s22, [#allocation7]  }
  0x14   :  { %s4349_s13 = scalar_lea.hbm %s7676_s3, 512 }
  0x15   :  { %p4350_p8 = scmp.ne.s32.totalorder %s7676_s3, %s4349_s13  ;;  %p4353_p9 = scmp.lt.u32.totalorder %s4349_s13, %s7676_s3 }
  0x17   :  { %p4355_p10 = pnand %p4353_p9, %p4350_p8 }
  0x19   :  { %4358 = shalt.err (!%p4355_p10)
}
  0x1a   :  { %s4359_s18 = scalar_lea.vmem %s4525_s24, 512  ;;  %p4364_p12 = scmp.lt.s32.totalorder %s4525_s24, %s4525_s24 }
  0x1b   :  { %p4360_p11 = scmp.ne.s32.totalorder %s4525_s24, %s4359_s18  ;;  %p4365_p13 = scmp.lt.s32.totalorder %s4359_s18, %s4359_s18 }
  0x1d   :  { %p4366_p0 = por %p4365_p13, %p4364_p12 }
  0x1f   :  { %p4367_p1 = pnand %p4366_p0, %p4360_p11 }
  0x21   :  { %4370 = shalt.err (!%p4367_p1)
}
  0x22   :  { %s4469_s1 = smov 128   ;;  %s4470_s19 = smov 8  }
  0x23   :  { %58 = dma.hbm_to_vmem [thread:$0]  %s7676_s3, 512, %s4525_s24, [#allocation10], %s4469_s1, %s4469_s1, %s4470_s19  }
  0x24   :  { %s4471_s22 = smov [#allocation3]   ;;  %s4472_s25 = smov [#allocation8]  }
  0x25   :  { %s21_s23 = sshll.u32 %s4471_s22, 4  ;;  %s40_s26 = sshll.u32 %s4472_s25, 4  ;;  %s22_s23 = int_to_ptr.vmem [resolvable:$true] %s21_s23  ;;  %s4556_s26 = int_to_ptr.vmem [resolvable:$true] %s40_s26 }
  0x26   :  { %s4371_s29 = scalar_lea.hbm %s7673_s0, 256 }
  0x27   :  { %p4372_p2 = scmp.ne.s32.totalorder %s7673_s0, %s4371_s29  ;;  %p4375_p3 = scmp.lt.u32.totalorder %s4371_s29, %s7673_s0 }
  0x29   :  { %p4377_p4 = pnand %p4375_p3, %p4372_p2 }
  0x2b   :  { %4380 = shalt.err (!%p4377_p4)
}
  0x2c   :  { %s4381_s3 = scalar_lea.vmem %s22_s23, 256  ;;  %p4386_p6 = scmp.lt.s32.totalorder %s22_s23, %s22_s23 }
  0x2d   :  { %p4382_p5 = scmp.ne.s32.totalorder %s22_s23, %s4381_s3  ;;  %p4387_p7 = scmp.lt.s32.totalorder %s4381_s3, %s4381_s3 }
  0x2f   :  { %p4388_p8 = por %p4387_p7, %p4386_p6 }
  0x31   :  { %p4389_p9 = pnand %p4388_p8, %p4382_p5 }
  0x33   :  { %4392 = shalt.err (!%p4389_p9)
}
  0x34   :  { %24 = dma.hbm_to_vmem [thread:$0]  %s7673_s0, 256, %s22_s23, [#allocation4]  }
  0x35   :  { %s4393_s13 = scalar_lea.hbm %s7675_s2, 1024 }
  0x36   :  { %p4394_p10 = scmp.ne.s32.totalorder %s7675_s2, %s4393_s13  ;;  %p4397_p11 = scmp.lt.u32.totalorder %s4393_s13, %s7675_s2 }
  0x38   :  { %p4399_p12 = pnand %p4397_p11, %p4394_p10 }
  0x3a   :  { %4402 = shalt.err (!%p4399_p12)
}
  0x3b   :  { %s4403_s18 = scalar_lea.vmem %s4556_s26, 1024  ;;  %p4408_p0 = scmp.lt.s32.totalorder %s4556_s26, %s4556_s26 }
  0x3c   :  { %p4404_p13 = scmp.ne.s32.totalorder %s4556_s26, %s4403_s18  ;;  %p4409_p1 = scmp.lt.s32.totalorder %s4403_s18, %s4403_s18 }
  0x3e   :  { %p4410_p2 = por %p4409_p1, %p4408_p0 }
  0x40   :  { %p4411_p3 = pnand %p4410_p2, %p4404_p13 }
  0x42   :  { %4414 = shalt.err (!%p4411_p3)
}
  0x43   :  { %s4473_s0 = smov 512   ;;  %s4474_s1 = smov 32  }
  0x44   :  { %46 = dma.hbm_to_vmem [thread:$0]  %s7675_s2, 1024, %s4556_s26, [#allocation7], %s4473_s0, %s4473_s0, %s4474_s1  }
  0x45   :  { %s4475_s21 = smov [#allocation11]   ;;  %s4415_s27 = scalar_lea.hbm %s7677_s4, 1536 }
  0x46   :  { %s64_s22 = sshll.u32 %s4475_s21, 4  ;;  %p4416_p4 = scmp.ne.s32.totalorder %s7677_s4, %s4415_s27  ;;  %s65_s22 = int_to_ptr.vmem [resolvable:$true] %s64_s22 }
  0x47   :  { %p4419_p5 = scmp.lt.u32.totalorder %s4415_s27, %s7677_s4 }
  0x49   :  { %p4421_p6 = pnand %p4419_p5, %p4416_p4 }
  0x4b   :  { %4424 = shalt.err (!%p4421_p6)
}
  0x4c   :  { %s4425_s8 = scalar_lea.vmem %s65_s22, 1536  ;;  %p4430_p8 = scmp.lt.s32.totalorder %s65_s22, %s65_s22 }
  0x4d   :  { %p4426_p7 = scmp.ne.s32.totalorder %s65_s22, %s4425_s8  ;;  %p4431_p9 = scmp.lt.s32.totalorder %s4425_s8, %s4425_s8 }
  0x4f   :  { %p4432_p10 = por %p4431_p9, %p4430_p8 }
  0x51   :  { %p4433_p11 = pnand %p4432_p10, %p4426_p7 }
  0x53   :  { %4436 = shalt.err (!%p4433_p11)
}
  0x54   :  { %s4476_s2 = smov 384   ;;  %s4477_s26 = smov 24  }
  0x55   :  { %70 = dma.hbm_to_vmem [thread:$0]  %s7677_s4, 1536, %s65_s22, [#allocation10], %s4476_s2, %s4476_s2, %s4477_s26  }
  0x56   :  { %4459 = dma.done.wait [#allocation4], 256  }
  0x57   :  { %4460 = vsyncadd [#allocation4], 4294967040 }
  0x58   :  { %4461 = dma.done.wait [#allocation7], 1088  }
  0x59   :  { %4462 = vsyncadd [#allocation7], 4294966208 }
  0x5a   :  { %4463 = dma.done.wait [#allocation10], 2048  }
  0x5b   :  { %4464 = vsyncadd [#allocation10], 4294965248  ;;  %v4599_v0 = vld [vmem:[#allocation3 + $0x8] sm:$0x77]  ;;  %v4601_v1 = vld [vmem:[#allocation3] sm:$0x77]  ;;  %v7680_v14 = vlaneseq }
  0x5c   :  { %s4478_s24 = smov 17   ;;  %v4609_v2 = vcombine.high %v4599_v0, %v4599_v0  ;;  %s4479_s4 = smov 16   ;;  %v4617_v3 = vcombine.high %v4601_v1, %v4601_v1  ;;  %v111_v22 = vld [vmem:[#allocation8] ss:$8 sm:$0xf]  ;;  %vm533_vm8 = vcmask 1042432  }
  0x5d   :  { %100 = vrot.lane.b32.xlu1 %v4599_v0, %s4478_s24  ;;  %96 = vrot.lane.b32.xlu0 %v4601_v1, %s4478_s24  ;;  %s4480_s10 = smov 15   ;;  %s4481_s11 = smov 1   ;;  %v114_v17 = vshrl.u32 %v7680_v14, 7  ;;  %v4693_v20 = vand.u32 127, %v7680_v14  ;;  %vm538_vm9 = vcmask 1045504   ;;  %vm4488_vm11 = vmmov 1  }
  0x5e   :  { %s4482_s12 = smov 127   ;;  %s4483_s13 = smov 113   ;;  %v161_v26 = vld [vmem:[#allocation8 + $0x1] ss:$8 sm:$0xf]  ;;  %vm4315_vm12 = vmpackc.low %vm4488_vm11, %vm538_vm9  ;;  %vm925_vm13 = vcmask 1040384  }
  0x5f   :  { %s4484_s14 = smov 112   ;;  %s4485_s15 = smov 111   ;;  %v4695_v21 = vsub.s32 0, %v114_v17  ;;  %v4697_v23 = vsub.s32 3, %v114_v17  ;;  %v4699_v24 = vsub.s32 1, %v114_v17  ;;  %v4701_v25 = vsub.s32 2, %v114_v17  ;;  %vm3938_vm14 = vmpackc.low %vm925_vm13, %vm4488_vm11 }
  0x60   :  { %vm106_vm0 = vcmp.lt.s32.totalorder %v4693_v20, 17  ;;  %vm155_vm1 = vcmp.lt.s32.totalorder %v4693_v20, 16  ;;  %v4712_v30 = vld [vmem:[#allocation8 + $0x2] ss:$8 sm:$0xf]  ;;  %vm205_vm2 = vcmp.lt.s32.totalorder %v4693_v20, 15 }
  0x61   :  { %102 = vrot.lane.b32.xlu1 %v4609_v2, %s4478_s24  ;;  %147 = vrot.lane.b32.xlu0 %v4601_v1, %s4479_s4  ;;  %7840 = vst [vmem:[#allocation17_spill] sm:$0xff] %v4695_v21  ;;  %7841 = vst [vmem:[#allocation18_spill] sm:$0xff] %v4701_v25  ;;  %v4709_v29 = vrot.slane %v111_v22, %v4695_v21  ;;  %v4715_v31 = vrot.slane %v111_v22, %v4697_v23  ;;  %v4724_v35 = vld [vmem:[#allocation8 + $0x3] ss:$8 sm:$0xf]  ;;  %vm255_vm3 = vcmp.lt.s32.totalorder %v4693_v20, 1 }
  0x62   :  { %v170_v32 = vrot.slane %v161_v26, %v4699_v24  ;;  %v4719_v33 = vrot.slane %v111_v22, %v4699_v24  ;;  %v4722_v34 = vrot.slane %v111_v22, %v4701_v25  ;;  %v166_v36 = vrot.slane %v161_v26, %v4695_v21  ;;  %v4742_v45 = vld [vmem:[#allocation8 + $0x5] ss:$8 sm:$0xf] }
  0x63   :  { %v174_v37 = vrot.slane %v161_v26, %v4701_v25  ;;  %v178_v38 = vrot.slane %v161_v26, %v4697_v23  ;;  %v220_v41 = vrot.slane %v4712_v30, %v4699_v24  ;;  %v216_v42 = vrot.slane %v4712_v30, %v4695_v21 }
  0x64   :  { %v224_v43 = vrot.slane %v4712_v30, %v4701_v25  ;;  %v228_v44 = vrot.slane %v4712_v30, %v4697_v23  ;;  %v270_v48 = vrot.slane %v4724_v35, %v4699_v24  ;;  %v266_v49 = vrot.slane %v4724_v35, %v4695_v21 }
  0x65   :  { %149 = vrot.lane.b32.xlu1 %v4617_v3, %s4479_s4  ;;  %98 = vrot.lane.b32.xlu0 %v4617_v3, %s4478_s24  ;;  %v274_v52 = vrot.slane %v4724_v35, %v4701_v25  ;;  %v278_v53 = vrot.slane %v4724_v35, %v4697_v23  ;;  %v320_v63 = vrot.slane %v4742_v45, %v4699_v24  ;;  %vm305_vm4 = vcmp.lt.s32.totalorder %v4693_v20, 127 }
  0x66   :  { %vm355_vm5 = vcmp.lt.s32.totalorder %v4693_v20, 113  ;;  %vm405_vm6 = vcmp.lt.s32.totalorder %v4693_v20, 112  ;;  %vm455_vm7 = vcmp.lt.s32.totalorder %v4693_v20, 111  ;;  %v7842_v35 = vrot.slane %v4742_v45, %v4697_v23 }
  0x67   :  { %vm912_vm15 = vcmask 596992  }
  0x69   :  { %153 = vrot.lane.b32.xlu1 %v4609_v2, %s4479_s4  ;;  %151 = vrot.lane.b32.xlu0 %v4599_v0, %s4479_s4 }
  0x6d   :  { %199 = vrot.lane.b32.xlu1 %v4617_v3, %s4480_s10  ;;  %197 = vrot.lane.b32.xlu0 %v4601_v1, %s4480_s10 }
  0x71   :  { %203 = vrot.lane.b32.xlu1 %v4609_v2, %s4480_s10  ;;  %201 = vrot.lane.b32.xlu0 %v4599_v0, %s4480_s10 }
  0x75   :  { %249 = vrot.lane.b32.xlu1 %v4617_v3, %s4481_s11  ;;  %247 = vrot.lane.b32.xlu0 %v4601_v1, %s4481_s11 }
  0x79   :  { %253 = vrot.lane.b32.xlu1 %v4609_v2, %s4481_s11  ;;  %251 = vrot.lane.b32.xlu0 %v4599_v0, %s4481_s11 }
  0x7d   :  { %299 = vrot.lane.b32.xlu1 %v4617_v3, %s4482_s12  ;;  %297 = vrot.lane.b32.xlu0 %v4601_v1, %s4482_s12 }
  0x81   :  { %303 = vrot.lane.b32.xlu1 %v4609_v2, %s4482_s12  ;;  %301 = vrot.lane.b32.xlu0 %v4599_v0, %s4482_s12 }
  0x85   :  { %349 = vrot.lane.b32.xlu1 %v4617_v3, %s4483_s13  ;;  %347 = vrot.lane.b32.xlu0 %v4601_v1, %s4483_s13 }
  0x89   :  { %353 = vrot.lane.b32.xlu1 %v4609_v2, %s4483_s13  ;;  %351 = vrot.lane.b32.xlu0 %v4599_v0, %s4483_s13 }
  0x8d   :  { %399 = vrot.lane.b32.xlu1 %v4617_v3, %s4484_s14  ;;  %397 = vrot.lane.b32.xlu0 %v4601_v1, %s4484_s14 }
  0x91   :  { %403 = vrot.lane.b32.xlu1 %v4609_v2, %s4484_s14  ;;  %401 = vrot.lane.b32.xlu0 %v4599_v0, %s4484_s14 }
  0x95   :  { %449 = vrot.lane.b32.xlu1 %v4617_v3, %s4485_s15  ;;  %447 = vrot.lane.b32.xlu0 %v4601_v1, %s4485_s15 }
  0x99   :  { %453 = vrot.lane.b32.xlu1 %v4609_v2, %s4485_s15  ;;  %451 = vrot.lane.b32.xlu0 %v4599_v0, %s4485_s15 }
  0xcf   :  { %v101_v4 = vpop.permute.xlu1 %100  ;;  %v97_v5 = vpop.permute.xlu0 %96 }
  0xd3   :  { %v103_v6 = vpop.permute.xlu1 %102  ;;  %v4675_v7 = vpop.permute.xlu0 %147 }
  0xd4   :  { %v107_v50 = vsel %vm106_vm0, %v101_v4, %v103_v6  ;;  %v110_v51 = vsel %vm106_vm0, %v103_v6, %v97_v5 }
  0xd5   :  { %v136_v6 = vmul.f32 %v4715_v31, %v107_v50 }
  0xd7   :  { %v4677_v8 = vpop.permute.xlu1 %149  ;;  %v99_v9 = vpop.permute.xlu0 %98 }
  0xd8   :  { %v108_v46 = vsel %vm106_vm0, %v99_v9, %v101_v4  ;;  %v109_v47 = vsel %vm106_vm0, %v97_v5, %v99_v9  ;;  %v4777_v4 = vld [vmem:[#allocation8 + $0x6] ss:$8 sm:$0xf]  ;;  %v133_v5 = vmul.f32 %v4709_v29, %v110_v51  ;;  %v158_v9 = vsel %vm155_vm1, %v4675_v7, %v4677_v8 }
  0xd9   :  { %v134_v60 = vmul.f32 %v4719_v33, %v109_v47  ;;  %v135_v61 = vmul.f32 %v4722_v34, %v108_v46  ;;  %v4792_v46 = vld [vmem:[#allocation8 + $0x7] ss:$8 sm:$0xf]  ;;  %v378_v50 = vrot.slane %v4777_v4, %v4697_v23 }
  0xda   :  { %v416_v14 = vrot.slane %v4792_v46, %v4695_v21 }
  0xdb   :  { %v154_v10 = vpop.permute.xlu1 %153  ;;  %v152_v11 = vpop.permute.xlu0 %151  ;;  %v142_v51 = vcombine.low %v135_v61, %v136_v6  ;;  %v420_v6 = vrot.slane %v4792_v46, %v4699_v24 }
  0xdc   :  { %v159_v54 = vsel %vm155_vm1, %v154_v10, %v4675_v7  ;;  %v156_v55 = vsel %vm155_vm1, %v152_v11, %v154_v10  ;;  %v157_v56 = vsel %vm155_vm1, %v4677_v8, %v152_v11  ;;  %v324_v10 = vrot.slane %v4742_v45, %v4701_v25 }
  0xdd   :  { %v183_v11 = vmul.f32 %v166_v36, %v159_v54  ;;  %v185_v17 = vmul.f32 %v174_v37, %v157_v56  ;;  %v186_v22 = vmul.f32 %v178_v38, %v156_v55  ;;  %v370_v36 = vrot.slane %v4777_v4, %v4699_v24 }
  0xde   :  { %v184_v37 = vmul.f32 %v170_v32, %v158_v9  ;;  %v141_v38 = vcombine.low %v133_v5, %v134_v60  ;;  %v374_v56 = vrot.slane %v4777_v4, %v4701_v25  ;;  %v428_v7 = vrot.slane %v4792_v46, %v4697_v23 }
  0xdf   :  { %v4679_v12 = vpop.permute.xlu1 %199  ;;  %v4681_v13 = vpop.permute.xlu0 %197  ;;  %v192_v62 = vcombine.low %v185_v17, %v186_v22 }
  0xe0   :  { %v208_v54 = vsel %vm205_vm2, %v4681_v13, %v4679_v12  ;;  %v191_v57 = vcombine.low %v183_v11, %v184_v37  ;;  %v145_v9 = vadd.f32 %v141_v38, %v4601_v1 }
  0xe3   :  { %v4683_v15 = vpop.permute.xlu1 %203  ;;  %v4685_v16 = vpop.permute.xlu0 %201 }
  0xe4   :  { %v209_v26 = vsel %vm205_vm2, %v4683_v15, %v4681_v13  ;;  %v206_v32 = vsel %vm205_vm2, %v4685_v16, %v4683_v15  ;;  %v207_v13 = vsel %vm205_vm2, %v4679_v12, %v4685_v16  ;;  %v424_v15 = vrot.slane %v4792_v46, %v4701_v25 }
  0xe5   :  { %v233_v55 = vmul.f32 %v216_v42, %v209_v26  ;;  %v234_v42 = vmul.f32 %v220_v41, %v208_v54  ;;  %v146_v12 = vadd.f32 %v142_v51, %v4599_v0  ;;  %v235_v17 = vmul.f32 %v224_v43, %v207_v13 }
  0xe6   :  { %v236_v22 = vmul.f32 %v228_v44, %v206_v32 }
  0xe7   :  { %v4688_v18 = vpop.permute.xlu1 %249  ;;  %v4690_v19 = vpop.permute.xlu0 %247  ;;  %v241_v11 = vcombine.low %v233_v55, %v234_v42  ;;  %v196_v37 = vadd.f32 %v192_v62, %v146_v12  ;;  %v7843_v42 = vrot.slane %v4742_v45, %v4695_v21 }
  0xe8   :  { %v258_v26 = vsel %vm255_vm3, %v4690_v19, %v4688_v18 }
  0xeb   :  { %v4703_v27 = vpop.permute.xlu1 %253  ;;  %v4705_v28 = vpop.permute.xlu0 %251 }
  0xec   :  { %v259_v60 = vsel %vm255_vm3, %v4703_v27, %v4690_v19  ;;  %v256_v16 = vsel %vm255_vm3, %v4705_v28, %v4703_v27  ;;  %v257_v41 = vsel %vm255_vm3, %v4688_v18, %v4705_v28  ;;  %v195_v27 = vadd.f32 %v191_v57, %v145_v9 }
  0xed   :  { %v283_v38 = vmul.f32 %v266_v49, %v259_v60  ;;  %v285_v51 = vmul.f32 %v274_v52, %v257_v41  ;;  %v286_v54 = vmul.f32 %v278_v53, %v256_v16  ;;  %v284_v18 = vmul.f32 %v270_v48, %v258_v26  ;;  %v497_v26 = vld [vmem:[#allocation6] sm:$0xf] }
  0xee   :  { %v245_v53 = vadd.f32 %v241_v11, %v195_v27  ;;  %v242_v57 = vcombine.low %v235_v17, %v236_v22  ;;  %v7844_v41 = vrot.slane %v4777_v4, %v4695_v21 }
  0xef   :  { %v4730_v39 = vpop.permute.xlu1 %299  ;;  %v4732_v40 = vpop.permute.xlu0 %297  ;;  %v291_v62 = vcombine.low %v283_v38, %v284_v18  ;;  %v292_v13 = vcombine.low %v285_v51, %v286_v54 }
  0xf0   :  { %v308_v19 = vsel %vm305_vm4, %v4732_v40, %v4730_v39  ;;  %v246_v11 = vadd.f32 %v242_v57, %v196_v37 }
  0xf1   :  { %v333_v60 = vmul.f32 %v7843_v42, %v308_v19 }
  0xf3   :  { %v304_v58 = vpop.permute.xlu1 %303  ;;  %v302_v59 = vpop.permute.xlu0 %301 }
  0xf4   :  { %v307_v28 = vsel %vm305_vm4, %v4730_v39, %v302_v59  ;;  %v309_v43 = vsel %vm305_vm4, %v304_v58, %v4732_v40  ;;  %v306_v30 = vsel %vm305_vm4, %v302_v59, %v304_v58  ;;  %v461_v40 = vld [vmem:[#allocation8 + $0x20] ss:$8 sm:$0xf] }
  0xf5   :  { %v334_v58 = vmul.f32 %v320_v63, %v307_v28  ;;  %v336_v48 = vmul.f32 %v7842_v35, %v309_v43  ;;  %v335_v32 = vmul.f32 %v324_v10, %v306_v30  ;;  %v296_v43 = vadd.f32 %v292_v13, %v246_v11 }
  0xf6   :  { %v470_v18 = vrot.slane %v461_v40, %v4699_v24  ;;  %v474_v37 = vrot.slane %v461_v40, %v4701_v25 }
  0xf7   :  { %v350_v47 = vpop.permute.xlu1 %349  ;;  %v348_v8 = vpop.permute.xlu0 %347  ;;  %v342_v17 = vcombine.low %v335_v32, %v336_v48 }
  0xf8   :  { %v358_v39 = vsel %vm355_vm5, %v348_v8, %v350_v47 }
  0xf9   :  { %v383_v45 = vmul.f32 %v7844_v41, %v358_v39 }
  0xfb   :  { %v354_v61 = vpop.permute.xlu1 %353  ;;  %v352_v5 = vpop.permute.xlu0 %351 }
  0xfc   :  { %v359_v49 = vsel %vm355_vm5, %v354_v61, %v348_v8  ;;  %v357_v52 = vsel %vm355_vm5, %v350_v47, %v352_v5  ;;  %v356_v59 = vsel %vm355_vm5, %v352_v5, %v354_v61  ;;  %v341_v8 = vcombine.low %v333_v60, %v334_v58 }
  0xfd   :  { %v386_v9 = vmul.f32 %v378_v50, %v359_v49  ;;  %v384_v63 = vmul.f32 %v370_v36, %v357_v52  ;;  %v385_v61 = vmul.f32 %v374_v56, %v356_v59  ;;  %v466_v50 = vrot.slane %v461_v40, %v4695_v21 }
  0xfe   :  { %v478_v36 = vrot.slane %v461_v40, %v4697_v23  ;;  %v295_v56 = vadd.f32 %v291_v62, %v245_v53  ;;  %v506_v49 = vrot.slane %v497_v26, %v4699_v24  ;;  %v514_v52 = vrot.slane %v497_v26, %v4697_v23 }
  0xff   :  { %v400_v44 = vpop.permute.xlu1 %399  ;;  %v398_v55 = vpop.permute.xlu0 %397  ;;  %v391_v27 = vcombine.low %v383_v45, %v384_v63  ;;  %v392_v30 = vcombine.low %v385_v61, %v386_v9 }
 0x100   :  { %v408_v22 = vsel %vm405_vm6, %v398_v55, %v400_v44  ;;  %v345_v19 = vadd.f32 %v341_v8, %v295_v56 }
 0x102   :  { %v395_v53 = vadd.f32 %v391_v27, %v345_v19 }
 0x103   :  { %v404_v12 = vpop.permute.xlu1 %403  ;;  %v402_v16 = vpop.permute.xlu0 %401 }
 0x104   :  { %v409_v5 = vsel %vm405_vm6, %v404_v12, %v398_v55  ;;  %v406_v10 = vsel %vm405_vm6, %v402_v16, %v404_v12  ;;  %v407_v47 = vsel %vm405_vm6, %v400_v44, %v402_v16  ;;  %v433_v44 = vmul.f32 %v416_v14, %v408_v22 }
 0x105   :  { %v436_v38 = vmul.f32 %v428_v7, %v409_v5  ;;  %v434_v28 = vmul.f32 %v420_v6, %v407_v47  ;;  %v435_v51 = vmul.f32 %v424_v15, %v406_v10  ;;  %v502_v55 = vrot.slane %v497_v26, %v4695_v21 }
 0x106   :  { %v346_v7 = vadd.f32 %v342_v17, %v296_v43  ;;  %v510_v15 = vrot.slane %v497_v26, %v4701_v25  ;;  %v575_v43 = vld [vmem:[#allocation8 + $0x1] ss:$8 sm:$0xf] }
 0x107   :  { %v450_v4 = vpop.permute.xlu1 %449  ;;  %v448_v54 = vpop.permute.xlu0 %447  ;;  %v441_v57 = vcombine.low %v433_v44, %v434_v28  ;;  %v442_v58 = vcombine.low %v435_v51, %v436_v38  ;;  %v515_v42 = vcombine.low %v502_v55, %v506_v49  ;;  %v7681_v28 = vmov 0.0  }
 0x108   :  { %v458_v6 = vsel %vm455_vm7, %v448_v54, %v450_v4  ;;  %v396_v35 = vadd.f32 %v392_v30, %v346_v7  ;;  %v516_v60 = vcombine.low %v510_v15, %v514_v52  ;;  %1002 = vmatprep.mubr.f32.mxu0 %v7681_v28  ;;  %1091 = vmatprep.mubr.f32.mxu1 %v7681_v28 }
 0x109   :  { %v483_v32 = vmul.f32 %v466_v50, %v458_v6  ;;  %v445_v9 = vadd.f32 %v441_v57, %v395_v53  ;;  %v588_v49 = vrot.slane %v575_v43, %v4701_v25  ;;  %v580_v52 = vrot.slane %v575_v43, %v4695_v21 }
 0x10a   :  { %v446_v63 = vadd.f32 %v442_v58, %v396_v35  ;;  %v592_v53 = vrot.slane %v575_v43, %v4697_v23 }
 0x10b   :  { %v454_v59 = vpop.permute.xlu1 %453  ;;  %v452_v62 = vpop.permute.xlu0 %451 }
 0x10c   :  { %v459_v14 = vsel %vm455_vm7, %v454_v59, %v448_v54  ;;  %v456_v46 = vsel %vm455_vm7, %v452_v62, %v454_v59  ;;  %v457_v48 = vsel %vm455_vm7, %v450_v4, %v452_v62 }
 0x10d   :  { %v486_v39 = vmul.f32 %v478_v36, %v459_v14  ;;  %v484_v40 = vmul.f32 %v470_v18, %v457_v48  ;;  %v485_v13 = vmul.f32 %v474_v37, %v456_v46  ;;  %v584_v37 = vrot.slane %v575_v43, %v4699_v24 }
 0x10f   :  { %v491_v12 = vcombine.low %v483_v32, %v484_v40  ;;  %v492_v16 = vcombine.low %v485_v13, %v486_v39 }
 0x111   :  { %v495_v61 = vadd.f32 %v491_v12, %v445_v9  ;;  %v496_v5 = vadd.f32 %v492_v16, %v446_v63 }
 0x113   :  { %v519_v10 = vmul.f32 %v515_v42, %v495_v61  ;;  %v520_v47 = vmul.f32 %v516_v60, %v496_v5  ;;  %v617_v5 = vld [vmem:[#allocation8 + $0x2] ss:$8 sm:$0xf] }
 0x115   :  { %v523_v8 = vcombine.high %v519_v10, %v519_v10  ;;  %v524_v41 = vcombine.high %v520_v47, %v520_v47  ;;  %v525_v45 = vrot.slane %v519_v10, 5  ;;  %v527_v11 = vrot.slane %v520_v47, 5  ;;  %v659_v10 = vld [vmem:[#allocation8 + $0x3] ss:$8 sm:$0xf] }
 0x117   :  { %v526_v50 = vrot.slane %v523_v8, 5  ;;  %v528_v36 = vrot.slane %v524_v41, 5  ;;  %v4912_v56 = vsel %vm533_vm8, %v4601_v1, %v525_v45  ;;  %v4920_v26 = vsel %vm533_vm8, %v4599_v0, %v527_v11 }
 0x118   :  { %v539_v17 = vsel %vm538_vm9, %v4912_v56, 0.0  ;;  %v541_v1 = vsel %vm538_vm9, %v4920_v26, 0.0  ;;  %v7845_v0 = vlaneseq  ;;  %v668_v8 = vrot.slane %v659_v10, %v4699_v24 }
 0x119   :  { %v4917_v22 = vsel %vm533_vm8, %v4617_v3, %v526_v50  ;;  %543 = vrot.lane.b32.xlu0 %v539_v17, %s4478_s24  ;;  %v4926_v38 = vsel %vm533_vm8, %v4609_v2, %v528_v36  ;;  %v4486_v2 = vmov 1.0   ;;  %v622_v45 = vrot.slane %v617_v5, %v4695_v21 }
 0x11a   :  { %v540_v27 = vsel %vm538_vm9, %v4917_v22, 0.0  ;;  %v542_v3 = vsel %vm538_vm9, %v4926_v38, 0.0  ;;  %vm863_vm10 = vcmp.lt.s32.totalorder %v7845_v0, 512  ;;  %v634_v11 = vrot.slane %v617_v5, %v4697_v23 }
 0x11b   :  { %545 = vrot.lane.b32.xlu1 %v540_v27, %s4478_s24  ;;  %866 = vst.msk [vmem:[#allocation2 + $0x120] ss:$8 sm:$0xf] %vm863_vm10, %v4486_v2  ;;  %1965 = vst.msk [vmem:[#allocation2 + $0x480] ss:$8 sm:$0xf] %vm863_vm10, %v4486_v2  ;;  %v672_v36 = vrot.slane %v659_v10, %v4701_v25  ;;  %v676_v0 = vrot.slane %v659_v10, %v4697_v23  ;;  %v630_v2 = vrot.slane %v617_v5, %v4701_v25 }
 0x11c   :  { %vm2127_vm8 = vcmask 269312  }
 0x11d   :  { %547 = vrot.lane.b32.xlu0 %v541_v1, %s4478_s24 }
 0x11f   :  { %549 = vrot.lane.b32.xlu1 %v542_v3, %s4478_s24 }
 0x121   :  { %563 = vrot.lane.b32.xlu0 %v539_v17, %s4479_s4 }
 0x122   :  { %v3505_v20 = vld [vmem:[#allocation2 + $0x498] sm:$0x1] }
 0x123   :  { %565 = vrot.lane.b32.xlu1 %v540_v27, %s4479_s4 }
 0x125   :  { %567 = vrot.lane.b32.xlu0 %v541_v1, %s4479_s4 }
 0x127   :  { %569 = vrot.lane.b32.xlu1 %v542_v3, %s4479_s4 }
 0x129   :  { %605 = vrot.lane.b32.xlu0 %v539_v17, %s4480_s10 }
 0x12b   :  { %607 = vrot.lane.b32.xlu1 %v540_v27, %s4480_s10 }
 0x12d   :  { %609 = vrot.lane.b32.xlu0 %v541_v1, %s4480_s10 }
 0x12f   :  { %611 = vrot.lane.b32.xlu1 %v542_v3, %s4480_s10 }
 0x131   :  { %647 = vrot.lane.b32.xlu0 %v539_v17, %s4481_s11 }
 0x133   :  { %649 = vrot.lane.b32.xlu1 %v540_v27, %s4481_s11 }
 0x135   :  { %651 = vrot.lane.b32.xlu0 %v541_v1, %s4481_s11 }
 0x137   :  { %653 = vrot.lane.b32.xlu1 %v542_v3, %s4481_s11 }
 0x139   :  { %693 = vrot.lane.b32.xlu0 %v539_v17, %s4482_s12 }
 0x13b   :  { %695 = vrot.lane.b32.xlu1 %v540_v27, %s4482_s12 }
 0x13d   :  { %697 = vrot.lane.b32.xlu0 %v541_v1, %s4482_s12 }
 0x13f   :  { %699 = vrot.lane.b32.xlu1 %v542_v3, %s4482_s12 }
 0x141   :  { %735 = vrot.lane.b32.xlu0 %v539_v17, %s4483_s13 }
 0x143   :  { %737 = vrot.lane.b32.xlu1 %v540_v27, %s4483_s13 }
 0x145   :  { %739 = vrot.lane.b32.xlu0 %v541_v1, %s4483_s13 }
 0x147   :  { %741 = vrot.lane.b32.xlu1 %v542_v3, %s4483_s13 }
 0x149   :  { %777 = vrot.lane.b32.xlu0 %v539_v17, %s4484_s14 }
 0x14b   :  { %779 = vrot.lane.b32.xlu1 %v540_v27, %s4484_s14 }
 0x14d   :  { %781 = vrot.lane.b32.xlu0 %v541_v1, %s4484_s14 }
 0x14f   :  { %783 = vrot.lane.b32.xlu1 %v542_v3, %s4484_s14 }
 0x151   :  { %819 = vrot.lane.b32.xlu0 %v539_v17, %s4485_s15 }
 0x153   :  { %821 = vrot.lane.b32.xlu1 %v540_v27, %s4485_s15 }
 0x155   :  { %823 = vrot.lane.b32.xlu0 %v541_v1, %s4485_s15 }
 0x157   :  { %825 = vrot.lane.b32.xlu1 %v542_v3, %s4485_s15  ;;  %v664_v3 = vrot.slane %v659_v10, %v4695_v21 }
 0x18b   :  { %v544_v51 = vpop.permute.xlu0 %543 }
 0x18d   :  { %v546_v4 = vpop.permute.xlu1 %545 }
 0x18e   :  { %v553_v19 = vsel %vm106_vm0, %v544_v51, %v546_v4 }
 0x18f   :  { %v548_v54 = vpop.permute.xlu0 %547  ;;  %v556_v7 = vmul.f32 %v553_v19, %v4719_v33 }
 0x190   :  { %v552_v62 = vsel %vm106_vm0, %v546_v4, %v548_v54 }
 0x191   :  { %v550_v30 = vpop.permute.xlu1 %549  ;;  %v557_v60 = vmul.f32 %v552_v62, %v4722_v34 }
 0x192   :  { %v551_v57 = vsel %vm106_vm0, %v548_v54, %v550_v30  ;;  %v554_v58 = vsel %vm106_vm0, %v550_v30, %v544_v51 }
 0x193   :  { %v564_v18 = vpop.permute.xlu0 %563  ;;  %v555_v32 = vmul.f32 %v554_v58, %v4709_v29  ;;  %v558_v39 = vmul.f32 %v551_v57, %v4715_v31  ;;  %v626_v29 = vrot.slane %v617_v5, %v4699_v24 }
 0x195   :  { %v566_v44 = vpop.permute.xlu1 %565 }
 0x196   :  { %v573_v55 = vsel %vm155_vm1, %v564_v18, %v566_v44 }
 0x197   :  { %v598_v6 = vmul.f32 %v584_v37, %v573_v55  ;;  %v568_v15 = vpop.permute.xlu0 %567 }
 0x198   :  { %v572_v59 = vsel %vm155_vm1, %v566_v44, %v568_v15 }
 0x199   :  { %v570_v35 = vpop.permute.xlu1 %569  ;;  %v3921_v33 = vpack.c.bf16 %v598_v6, %v556_v7  ;;  %v599_v14 = vmul.f32 %v588_v49, %v572_v59 }
 0x19a   :  { %v571_v46 = vsel %vm155_vm1, %v568_v15, %v570_v35  ;;  %v574_v48 = vsel %vm155_vm1, %v570_v35, %v564_v18  ;;  %v705_v18 = vld [vmem:[#allocation8 + $0x5] ss:$8 sm:$0xf] }
 0x19b   :  { %v597_v40 = vmul.f32 %v580_v52, %v574_v48  ;;  %v600_v13 = vmul.f32 %v592_v53, %v571_v46  ;;  %v606_v42 = vpop.permute.xlu0 %605  ;;  %3922 = vmatprep.subr.bf16.mxu0 %v3921_v33  ;;  %v3945_v16 = vpack.c.bf16 %v599_v14, %v557_v60  ;;  %v710_v57 = vrot.slane %v705_v18, %v4695_v21 }
 0x19c   :  { %v714_v59 = vrot.slane %v705_v18, %v4699_v24  ;;  %v718_v48 = vrot.slane %v705_v18, %v4701_v25 }
 0x19d   :  { %v608_v9 = vpop.permute.xlu1 %607  ;;  %v3923_v63 = vpack.c.bf16 %v597_v40, %v555_v32  ;;  %v3943_v12 = vpack.c.bf16 %v600_v13, %v558_v39  ;;  %v722_v32 = vrot.slane %v705_v18, %v4697_v23 }
 0x19e   :  { %v615_v41 = vsel %vm205_vm2, %v606_v42, %v608_v9 }
 0x19f   :  { %v610_v61 = vpop.permute.xlu0 %609  ;;  %3924 = vmatpush1.bf16.msra.mxu0 %v3923_v63  ;;  %3944 = vmatprep.subr.bf16.mxu1 %v3943_v12  ;;  %v640_v17 = vmul.f32 %v626_v29, %v615_v41  ;;  %v789_v41 = vld [vmem:[#allocation8 + $0x7] ss:$8 sm:$0xf] }
 0x1a0   :  { %3946 = vmatpush1.bf16.msra.mxu1 %v3945_v16  ;;  %v614_v43 = vsel %vm205_vm2, %v608_v9, %v610_v61 }
 0x1a1   :  { %v612_v47 = vpop.permute.xlu1 %611  ;;  %v641_v53 = vmul.f32 %v630_v2, %v614_v43  ;;  %v802_v2 = vrot.slane %v789_v41, %v4701_v25 }
 0x1a2   :  { %v613_v51 = vsel %vm205_vm2, %v610_v61, %v612_v47  ;;  %v616_v4 = vsel %vm205_vm2, %v612_v47, %v606_v42 }
 0x1a3   :  { %v648_v31 = vpop.permute.xlu0 %647  ;;  %v639_v49 = vmul.f32 %v622_v45, %v616_v4  ;;  %v642_v7 = vmul.f32 %v634_v11, %v613_v51  ;;  %v794_v11 = vrot.slane %v789_v41, %v4695_v21  ;;  %v806_v51 = vrot.slane %v789_v41, %v4697_v23 }
 0x1a5   :  { %v650_v34 = vpop.permute.xlu1 %649 }
 0x1a6   :  { %v657_v50 = vsel %vm255_vm3, %v648_v31, %v650_v34 }
 0x1a7   :  { %v682_v27 = vmul.f32 %v668_v8, %v657_v50  ;;  %v652_v1 = vpop.permute.xlu0 %651 }
 0x1a8   :  { %v656_v54 = vsel %vm255_vm3, %v650_v34, %v652_v1  ;;  %v747_v34 = vld [vmem:[#allocation8 + $0x6] ss:$8 sm:$0xf] }
 0x1a9   :  { %v654_v30 = vpop.permute.xlu1 %653  ;;  %v3925_v37 = vpack.c.bf16 %v682_v27, %v640_v17  ;;  %v683_v19 = vmul.f32 %v672_v36, %v656_v54  ;;  %v752_v50 = vrot.slane %v747_v34, %v4695_v21  ;;  %v760_v17 = vrot.slane %v747_v34, %v4701_v25 }
 0x1aa   :  { %v655_v44 = vsel %vm255_vm3, %v652_v1, %v654_v30  ;;  %v658_v55 = vsel %vm255_vm3, %v654_v30, %v648_v31 }
 0x1ab   :  { %v681_v6 = vmul.f32 %v664_v3, %v658_v55  ;;  %v684_v15 = vmul.f32 %v676_v0, %v655_v44  ;;  %v694_v52 = vpop.permute.xlu0 %693  ;;  %3926 = vmatprep.subr.bf16.mxu0 %v3925_v37  ;;  %v3949_v14 = vpack.c.bf16 %v683_v19, %v641_v53  ;;  %v831_v19 = vld [vmem:[#allocation8 + $0x20] ss:$8 sm:$0xf] }
 0x1ad   :  { %v696_v58 = vpop.permute.xlu1 %695  ;;  %v3927_v62 = vpack.c.bf16 %v681_v6, %v639_v49  ;;  %v3947_v35 = vpack.c.bf16 %v684_v15, %v642_v7 }
 0x1ae   :  { %v703_v33 = vsel %vm305_vm4, %v694_v52, %v696_v58 }
 0x1af   :  { %v698_v46 = vpop.permute.xlu0 %697  ;;  %3928 = vmatpush1.bf16.msra.mxu0 %v3927_v62  ;;  %3948 = vmatprep.subr.bf16.mxu1 %v3947_v35  ;;  %v727_v39 = vmul.f32 %v710_v57, %v703_v33  ;;  %v840_v35 = vrot.slane %v831_v19, %v4699_v24 }
 0x1b0   :  { %v702_v40 = vsel %vm305_vm4, %v696_v58, %v698_v46  ;;  %3950 = vmatpush1.bf16.msra.mxu1 %v3949_v14  ;;  %v836_v58 = vrot.slane %v831_v19, %v4695_v21 }
 0x1b1   :  { %v728_v13 = vmul.f32 %v714_v59, %v702_v40  ;;  %v700_v42 = vpop.permute.xlu1 %699  ;;  %v4319_v10 = vpack.c.bf16 %v727_v39, %v4912_v56  ;;  %v798_v56 = vrot.slane %v789_v41, %v4699_v24  ;;  %v848_v39 = vrot.slane %v831_v19, %v4697_v23 }
 0x1b2   :  { %v701_v60 = vsel %vm305_vm4, %v698_v46, %v700_v42  ;;  %v704_v9 = vsel %vm305_vm4, %v700_v42, %v694_v52  ;;  %v909_v42 = vld [vmem:[#allocation2 + $0x128] sm:$0x1] }
 0x1b3   :  { %v729_v63 = vmul.f32 %v718_v48, %v701_v60  ;;  %v730_v12 = vmul.f32 %v722_v32, %v704_v9  ;;  %v736_v16 = vpop.permute.xlu0 %735  ;;  %v4316_v5 = vpack.c.bf16 %v728_v13, %v4917_v22  ;;  %v756_v22 = vrot.slane %v747_v34, %v4699_v24 }
 0x1b4   :  { %v844_v32 = vrot.slane %v831_v19, %v4701_v25 }
 0x1b5   :  { %v738_v61 = vpop.permute.xlu1 %737  ;;  %4317 = vmatprep.subr.msk.bf16.mxu0 %vm4315_vm12, %v4316_v5  ;;  %v4322_v29 = vpack.c.bf16 %v730_v12, %v4926_v38  ;;  %v4325_v31 = vpack.c.bf16 %v729_v63, %v4920_v26  ;;  %v764_v26 = vrot.slane %v747_v34, %v4697_v23  ;;  %v908_v63 = vld [vmem:[#allocation2 + $0x120] sm:$0x1]  ;;  %v910_v5 = vld [vmem:[#allocation2 + $0x130] sm:$0x1]  ;;  %v868_v34 = vld [vmem:[#allocation9] sm:$0xff] }
 0x1b6   :  { %4320 = vmatpush1.bf16.msk.msra.mxu0 %vm4315_vm12, %v4319_v10  ;;  %v745_v1 = vsel %vm355_vm5, %v736_v16, %v738_v61 }
 0x1b7   :  { %v740_v47 = vpop.permute.xlu0 %739  ;;  %4323 = vmatprep.subr.msk.bf16.mxu1 %vm4315_vm12, %v4322_v29  ;;  %v769_v44 = vmul.f32 %v752_v50, %v745_v1  ;;  %v871_v50 = vld [vmem:[#allocation9 + $0x18] sm:$0xff] }
 0x1b8   :  { %4326 = vmatpush1.bf16.msk.msra.mxu1 %vm4315_vm12, %v4325_v31  ;;  %v744_v38 = vsel %vm355_vm5, %v738_v61, %v740_v47  ;;  %v911_v61 = vld [vmem:[#allocation2 + $0x138] sm:$0x1] }
 0x1b9   :  { %v742_v8 = vpop.permute.xlu1 %741  ;;  %v770_v30 = vmul.f32 %v756_v22, %v744_v38 }
 0x1ba   :  { %v743_v3 = vsel %vm355_vm5, %v740_v47, %v742_v8  ;;  %v746_v4 = vsel %vm355_vm5, %v742_v8, %v736_v16 }
 0x1bb   :  { %v778_v45 = vpop.permute.xlu0 %777  ;;  %v771_v55 = vmul.f32 %v760_v17, %v743_v3  ;;  %v772_v6 = vmul.f32 %v764_v26, %v746_v4 }
 0x1bd   :  { %v780_v36 = vpop.permute.xlu1 %779 }
 0x1be   :  { %v787_v27 = vsel %vm405_vm6, %v778_v45, %v780_v36 }
 0x1bf   :  { %v782_v0 = vpop.permute.xlu0 %781  ;;  %v811_v54 = vmul.f32 %v794_v11, %v787_v27  ;;  %v870_v11 = vld [vmem:[#allocation9 + $0x10] sm:$0xff] }
 0x1c0   :  { %v786_v43 = vsel %vm405_vm6, %v780_v36, %v782_v0 }
 0x1c1   :  { %v812_v18 = vmul.f32 %v798_v56, %v786_v43  ;;  %v784_v37 = vpop.permute.xlu1 %783  ;;  %v3935_v59 = vpack.c.bf16 %v811_v54, %v769_v44 }
 0x1c2   :  { %v785_v49 = vsel %vm405_vm6, %v782_v0, %v784_v37  ;;  %v788_v7 = vsel %vm405_vm6, %v784_v37, %v778_v45  ;;  %v869_v45 = vld [vmem:[#allocation9 + $0x8] sm:$0xff] }
 0x1c3   :  { %v813_v15 = vmul.f32 %v802_v2, %v785_v49  ;;  %v814_v52 = vmul.f32 %v806_v51, %v788_v7  ;;  %v820_v53 = vpop.permute.xlu0 %819  ;;  %v3933_v57 = vpack.c.bf16 %v812_v18, %v770_v30 }
 0x1c5   :  { %v822_v62 = vpop.permute.xlu1 %821  ;;  %3934 = vmatprep.subr.bf16.mxu0 %v3933_v57  ;;  %v3955_v33 = vpack.c.bf16 %v814_v52, %v772_v6  ;;  %v3957_v14 = vpack.c.bf16 %v813_v15, %v771_v55 }
 0x1c6   :  { %v829_v46 = vsel %vm455_vm7, %v820_v53, %v822_v62  ;;  %3936 = vmatpush1.bf16.msra.mxu0 %v3935_v59 }
 0x1c7   :  { %v824_v48 = vpop.permute.xlu0 %823  ;;  %3956 = vmatprep.subr.bf16.mxu1 %v3955_v33  ;;  %v853_v40 = vmul.f32 %v836_v58, %v829_v46 }
 0x1c8   :  { %v828_v13 = vsel %vm455_vm7, %v822_v62, %v824_v48  ;;  %3958 = vmatpush1.bf16.msra.mxu1 %v3957_v14 }
 0x1c9   :  { %v854_v60 = vmul.f32 %v840_v35, %v828_v13  ;;  %v826_v9 = vpop.permute.xlu1 %825  ;;  %v3940_v31 = vpack.c.bf16 %v908_v63, %v853_v40 }
 0x1ca   :  { %v827_v12 = vsel %vm455_vm7, %v824_v48, %v826_v9  ;;  %v830_v16 = vsel %vm455_vm7, %v826_v9, %v820_v53 }
 0x1cb   :  { %v855_v10 = vmul.f32 %v844_v32, %v827_v12  ;;  %v856_v47 = vmul.f32 %v848_v39, %v830_v16  ;;  %v3937_v29 = vpack.c.bf16 %v909_v42, %v854_v60 }
 0x1cd   :  { %3939 = vmatprep.subr.msk.bf16.mxu0 %vm3938_vm14, %v3937_v29  ;;  %v3959_v8 = vpack.c.bf16 %v911_v61, %v856_v47  ;;  %v3962_v41 = vpack.c.bf16 %v910_v5, %v855_v10 }
 0x1ce   :  { %3942 = vmatpush1.bf16.msk.msra.mxu0 %vm3938_vm14, %v3940_v31 }
 0x1cf   :  { %3961 = vmatprep.subr.msk.bf16.mxu1 %vm3938_vm14, %v3959_v8 }
 0x1d0   :  { %3964 = vmatpush1.bf16.msk.msra.mxu1 %vm3938_vm14, %v3962_v41 }
 0x1d1   :  { %3893 = vmatmul.mubr.msk.f32.vlgmr.msra.gmra.mrb[0].mxu0 %vm912_vm15, %v868_v34 }
 0x1d2   :  { %1008 = vmatprep.mubr.f32.mxu0 %v7681_v28 }
 0x1d3   :  { %3899 = vmatmul.mubr.msk.f32.vlgmr.msra.gmra.mrb[0].mxu1 %vm912_vm15, %v868_v34 }
 0x1d4   :  { %1097 = vmatprep.mubr.f32.mxu1 %v7681_v28 }
 0x1d5   :  { %3894 = vmatmul.mubr.msk.f32.gmra.mrb[2].mxu0 %vm912_vm15, %v869_v45 }
 0x1d6   :  { %1014 = vmatprep.mubr.f32.mxu0 %v7681_v28 }
 0x1d7   :  { %3900 = vmatmul.mubr.msk.f32.gmra.mrb[2].mxu1 %vm912_vm15, %v869_v45 }
 0x1d8   :  { %1103 = vmatprep.mubr.f32.mxu1 %v7681_v28 }
 0x1d9   :  { %3895 = vmatmul.mubr.msk.f32.gmra.mrb[4].mxu0 %vm912_vm15, %v870_v11 }
 0x1da   :  { %1020 = vmatprep.mubr.f32.mxu0 %v7681_v28 }
 0x1db   :  { %3901 = vmatmul.mubr.msk.f32.gmra.mrb[4].mxu1 %vm912_vm15, %v870_v11 }
 0x1dc   :  { %1109 = vmatprep.mubr.f32.mxu1 %v7681_v28 }
 0x1dd   :  { %3896 = vmatmul.mubr.msk.f32.gmra.mrb[6].mxu0 %vm912_vm15, %v871_v50 }
 0x1df   :  { %3902 = vmatmul.mubr.msk.f32.gmra.mrb[6].mxu1 %vm912_vm15, %v871_v50 }
 0x2a4   :  { %v1004_v22 = vpop.f32.mrb[0].mxu0 }
 0x2a5   :  { %v5084_v36 = vmax.f32 %v1004_v22, 0.0  ;;  %v1006_v56 = vpop.f32.mrb[1].mxu0 }
 0x2a6   :  { %v5086_v38 = vmax.f32 %v1006_v56, 0.0  ;;  %v1093_v17 = vpop.f32.mrb[0].mxu1 }
 0x2a7   :  { %1540 = vst [vmem:[#allocation2 + $0x200] sm:$0xff] %v5084_v36  ;;  %1132 = vrot.lane.b32.xlu0 %v5084_v36, %s4478_s24  ;;  %v5091_v26 = vmax.f32 %v1093_v17, 0.0  ;;  %v1095_v27 = vpop.f32.mrb[1].mxu1 }
 0x2a8   :  { %1541 = vst [vmem:[#allocation2 + $0x208] sm:$0xff] %v5086_v38  ;;  %v1010_v1 = vpop.f32.mrb[2].mxu0  ;;  %v5094_v3 = vmax.f32 %v1095_v27, 0.0 }
 0x2a9   :  { %1542 = vst [vmem:[#allocation2 + $0x210] sm:$0xff] %v5091_v26  ;;  %v5097_v0 = vmax.f32 %v1010_v1, 0.0  ;;  %v1012_v2 = vpop.f32.mrb[3].mxu0 }
 0x2aa   :  { %1543 = vst [vmem:[#allocation2 + $0x218] sm:$0xff] %v5094_v3  ;;  %v5100_v51 = vmax.f32 %v1012_v2, 0.0  ;;  %v1099_v4 = vpop.f32.mrb[2].mxu1 }
 0x2ab   :  { %1544 = vst [vmem:[#allocation2 + $0x220] sm:$0xff] %v5097_v0  ;;  %v5103_v54 = vmax.f32 %v1099_v4, 0.0  ;;  %1134 = vrot.lane.b32.xlu1 %v5097_v0, %s4478_s24  ;;  %1148 = vrot.lane.b32.xlu0 %v5091_v26, %s4478_s24  ;;  %v1101_v43 = vpop.f32.mrb[3].mxu1 }
 0x2ac   :  { %1545 = vst [vmem:[#allocation2 + $0x228] sm:$0xff] %v5100_v51  ;;  %v5110_v30 = vmax.f32 %v1101_v43, 0.0  ;;  %v1016_v18 = vpop.f32.mrb[4].mxu0 }
 0x2ad   :  { %1546 = vst [vmem:[#allocation2 + $0x230] sm:$0xff] %v5103_v54  ;;  %v5113_v37 = vmax.f32 %v1016_v18, 0.0  ;;  %v1018_v19 = vpop.f32.mrb[5].mxu0 }
 0x2ae   :  { %1547 = vst [vmem:[#allocation2 + $0x238] sm:$0xff] %v5110_v30  ;;  %v5116_v44 = vmax.f32 %v1018_v19, 0.0  ;;  %v1105_v55 = vpop.f32.mrb[4].mxu1 }
 0x2af   :  { %1234 = vrot.lane.b32.xlu0 %v5084_v36, %s4479_s4  ;;  %1150 = vrot.lane.b32.xlu1 %v5103_v54, %s4478_s24  ;;  %1548 = vst [vmem:[#allocation2 + $0x240] sm:$0xff] %v5113_v37  ;;  %v5123_v49 = vmax.f32 %v1105_v55, 0.0  ;;  %v1107_v7 = vpop.f32.mrb[5].mxu1 }
 0x2b0   :  { %1549 = vst [vmem:[#allocation2 + $0x248] sm:$0xff] %v5116_v44  ;;  %v1022_v6 = vpop.f32.mrb[6].mxu0  ;;  %v5126_v15 = vmax.f32 %v1107_v7, 0.0 }
 0x2b1   :  { %v5128_v52 = vmax.f32 %v1022_v6, 0.0  ;;  %v1024_v53 = vpop.f32.mrb[7].mxu0  ;;  %1550 = vst [vmem:[#allocation2 + $0x250] sm:$0xff] %v5123_v49 }
 0x2b2   :  { %v5131_v57 = vmax.f32 %v1024_v53, 0.0  ;;  %1551 = vst [vmem:[#allocation2 + $0x258] sm:$0xff] %v5126_v15  ;;  %v1111_v58 = vpop.f32.mrb[6].mxu1 }
 0x2b3   :  { %1250 = vrot.lane.b32.xlu0 %v5091_v26, %s4479_s4  ;;  %1236 = vrot.lane.b32.xlu1 %v5097_v0, %s4479_s4  ;;  %1552 = vst [vmem:[#allocation2 + $0x260] sm:$0xff] %v5128_v52  ;;  %v5139_v59 = vmax.f32 %v1111_v58, 0.0  ;;  %v1113_v62 = vpop.f32.mrb[7].mxu1 }
 0x2b4   :  { %1553 = vst [vmem:[#allocation2 + $0x268] sm:$0xff] %v5131_v57  ;;  %v5142_v35 = vmax.f32 %v1113_v62, 0.0 }
 0x2b5   :  { %1554 = vst [vmem:[#allocation2 + $0x270] sm:$0xff] %v5139_v59 }
 0x2b6   :  { %1555 = vst [vmem:[#allocation2 + $0x278] sm:$0xff] %v5142_v35 }
 0x2b7   :  { %1336 = vrot.lane.b32.xlu0 %v5084_v36, %s4480_s10  ;;  %1252 = vrot.lane.b32.xlu1 %v5103_v54, %s4479_s4 }
 0x2bb   :  { %1352 = vrot.lane.b32.xlu0 %v5091_v26, %s4480_s10  ;;  %1338 = vrot.lane.b32.xlu1 %v5097_v0, %s4480_s10 }
 0x2bf   :  { %1438 = vrot.lane.b32.xlu0 %v5084_v36, %s4481_s11  ;;  %1354 = vrot.lane.b32.xlu1 %v5103_v54, %s4480_s10 }
 0x2c3   :  { %1454 = vrot.lane.b32.xlu0 %v5091_v26, %s4481_s11  ;;  %1440 = vrot.lane.b32.xlu1 %v5097_v0, %s4481_s11 }
 0x2c7   :  { %1556 = vrot.lane.b32.xlu0 %v5084_v36, %s4482_s12  ;;  %1456 = vrot.lane.b32.xlu1 %v5103_v54, %s4481_s11 }
 0x2cb   :  { %1572 = vrot.lane.b32.xlu0 %v5091_v26, %s4482_s12  ;;  %1558 = vrot.lane.b32.xlu1 %v5097_v0, %s4482_s12 }
 0x2cf   :  { %1658 = vrot.lane.b32.xlu0 %v5084_v36, %s4483_s13  ;;  %1574 = vrot.lane.b32.xlu1 %v5103_v54, %s4482_s12 }
 0x2d3   :  { %1674 = vrot.lane.b32.xlu0 %v5091_v26, %s4483_s13  ;;  %1660 = vrot.lane.b32.xlu1 %v5097_v0, %s4483_s13 }
 0x2d7   :  { %1760 = vrot.lane.b32.xlu0 %v5084_v36, %s4484_s14  ;;  %1676 = vrot.lane.b32.xlu1 %v5103_v54, %s4483_s13 }
 0x2db   :  { %1776 = vrot.lane.b32.xlu0 %v5091_v26, %s4484_s14  ;;  %1762 = vrot.lane.b32.xlu1 %v5097_v0, %s4484_s14 }
 0x2df   :  { %1862 = vrot.lane.b32.xlu0 %v5084_v36, %s4485_s15  ;;  %1778 = vrot.lane.b32.xlu1 %v5103_v54, %s4484_s14 }
 0x2e3   :  { %1140 = vrot.lane.b32.xlu0 %v5086_v38, %s4478_s24  ;;  %1864 = vrot.lane.b32.xlu1 %v5097_v0, %s4485_s15 }
 0x2e7   :  { %1156 = vrot.lane.b32.xlu0 %v5094_v3, %s4478_s24  ;;  %1142 = vrot.lane.b32.xlu1 %v5100_v51, %s4478_s24 }
 0x2eb   :  { %1242 = vrot.lane.b32.xlu0 %v5086_v38, %s4479_s4  ;;  %1158 = vrot.lane.b32.xlu1 %v5110_v30, %s4478_s24 }
 0x2ef   :  { %1258 = vrot.lane.b32.xlu0 %v5094_v3, %s4479_s4  ;;  %1244 = vrot.lane.b32.xlu1 %v5100_v51, %s4479_s4 }
 0x2f3   :  { %1344 = vrot.lane.b32.xlu0 %v5086_v38, %s4480_s10  ;;  %1260 = vrot.lane.b32.xlu1 %v5110_v30, %s4479_s4 }
 0x2f7   :  { %1360 = vrot.lane.b32.xlu0 %v5094_v3, %s4480_s10  ;;  %1346 = vrot.lane.b32.xlu1 %v5100_v51, %s4480_s10 }
 0x2fb   :  { %1446 = vrot.lane.b32.xlu0 %v5086_v38, %s4481_s11  ;;  %1362 = vrot.lane.b32.xlu1 %v5110_v30, %s4480_s10 }
 0x2ff   :  { %1462 = vrot.lane.b32.xlu0 %v5094_v3, %s4481_s11  ;;  %1448 = vrot.lane.b32.xlu1 %v5100_v51, %s4481_s11 }
 0x303   :  { %1564 = vrot.lane.b32.xlu0 %v5086_v38, %s4482_s12  ;;  %1464 = vrot.lane.b32.xlu1 %v5110_v30, %s4481_s11 }
 0x307   :  { %1580 = vrot.lane.b32.xlu0 %v5094_v3, %s4482_s12  ;;  %1566 = vrot.lane.b32.xlu1 %v5100_v51, %s4482_s12 }
 0x30b   :  { %1666 = vrot.lane.b32.xlu0 %v5086_v38, %s4483_s13  ;;  %1582 = vrot.lane.b32.xlu1 %v5110_v30, %s4482_s12 }
 0x30f   :  { %1682 = vrot.lane.b32.xlu0 %v5094_v3, %s4483_s13  ;;  %1668 = vrot.lane.b32.xlu1 %v5100_v51, %s4483_s13 }
 0x313   :  { %1768 = vrot.lane.b32.xlu0 %v5086_v38, %s4484_s14  ;;  %1684 = vrot.lane.b32.xlu1 %v5110_v30, %s4483_s13 }
 0x317   :  { %1784 = vrot.lane.b32.xlu0 %v5094_v3, %s4484_s14  ;;  %1770 = vrot.lane.b32.xlu1 %v5100_v51, %s4484_s14 }
 0x319   :  { %v5246_v33 = vpop.permute.xlu0 %1132 }
 0x31b   :  { %1870 = vrot.lane.b32.xlu0 %v5086_v38, %s4485_s15  ;;  %1786 = vrot.lane.b32.xlu1 %v5110_v30, %s4484_s14  ;;  %v1180_v38 = vld [vmem:[#allocation8] ss:$8 sm:$0xf] }
 0x31c   :  { %v5367_v1 = vrot.slane %v1180_v38, %v4699_v24  ;;  %v5381_v18 = vrot.slane %v1180_v38, %v4695_v21  ;;  %v5384_v19 = vrot.slane %v1180_v38, %v4697_v23 }
 0x31d   :  { %v5252_v14 = vpop.permute.xlu1 %1134  ;;  %v5254_v46 = vpop.permute.xlu0 %1148 }
 0x31f   :  { %1136 = vrot.lane.b32.xlu0 %v5113_v37, %s4478_s24  ;;  %1872 = vrot.lane.b32.xlu1 %v5100_v51, %s4485_s15 }
 0x321   :  { %v5260_v48 = vpop.permute.xlu0 %1234  ;;  %v5262_v32 = vpop.permute.xlu1 %1150 }
 0x323   :  { %1138 = vrot.lane.b32.xlu1 %v5128_v52, %s4478_s24  ;;  %1152 = vrot.lane.b32.xlu0 %v5123_v49, %s4478_s24 }
 0x325   :  { %v5268_v39 = vpop.permute.xlu0 %1250  ;;  %v5270_v40 = vpop.permute.xlu1 %1236 }
 0x327   :  { %1238 = vrot.lane.b32.xlu0 %v5113_v37, %s4479_s4  ;;  %1154 = vrot.lane.b32.xlu1 %v5139_v59, %s4478_s24 }
 0x329   :  { %v5276_v13 = vpop.permute.xlu0 %1336  ;;  %v5278_v42 = vpop.permute.xlu1 %1252 }
 0x32b   :  { %1254 = vrot.lane.b32.xlu0 %v5123_v49, %s4479_s4  ;;  %1240 = vrot.lane.b32.xlu1 %v5128_v52, %s4479_s4 }
 0x32d   :  { %v5284_v60 = vpop.permute.xlu0 %1352  ;;  %v5286_v9 = vpop.permute.xlu1 %1338 }
 0x32f   :  { %1340 = vrot.lane.b32.xlu0 %v5113_v37, %s4480_s10  ;;  %1256 = vrot.lane.b32.xlu1 %v5139_v59, %s4479_s4 }
 0x331   :  { %v5292_v63 = vpop.permute.xlu0 %1438  ;;  %v5294_v12 = vpop.permute.xlu1 %1354 }
 0x333   :  { %1356 = vrot.lane.b32.xlu0 %v5123_v49, %s4480_s10  ;;  %1342 = vrot.lane.b32.xlu1 %v5128_v52, %s4480_s10 }
 0x335   :  { %v5300_v16 = vpop.permute.xlu0 %1454  ;;  %v5302_v61 = vpop.permute.xlu1 %1440 }
 0x336   :  { %7846 = vst [vmem:[#allocation19_spill] sm:$0xff] %v5302_v61  ;;  %v5698_v61 = vld [vmem:[#allocation2 + $0x218] sm:$0xff] }
 0x337   :  { %1442 = vrot.lane.b32.xlu0 %v5113_v37, %s4481_s11  ;;  %1358 = vrot.lane.b32.xlu1 %v5139_v59, %s4480_s10  ;;  %7916 = vst [vmem:[#allocation89_spill] sm:$0xff] %v5698_v61 }
 0x339   :  { %v5308_v5 = vpop.permute.xlu0 %1556  ;;  %v5310_v10 = vpop.permute.xlu1 %1456 }
 0x33a   :  { %7847 = vst [vmem:[#allocation20_spill] sm:$0xff] %v5308_v5  ;;  %7848 = vst [vmem:[#allocation21_spill] sm:$0xff] %v5310_v10 }
 0x33b   :  { %1458 = vrot.lane.b32.xlu0 %v5123_v49, %s4481_s11  ;;  %1444 = vrot.lane.b32.xlu1 %v5128_v52, %s4481_s11 }
 0x33d   :  { %v5316_v47 = vpop.permute.xlu0 %1572  ;;  %v5318_v29 = vpop.permute.xlu1 %1558 }
 0x33e   :  { %7849 = vst [vmem:[#allocation22_spill] sm:$0xff] %v5316_v47  ;;  %7850 = vst [vmem:[#allocation23_spill] sm:$0xff] %v5318_v29  ;;  %v5664_v47 = vld [vmem:[#allocation2 + $0x228] sm:$0xff] }
 0x33f   :  { %1560 = vrot.lane.b32.xlu0 %v5113_v37, %s4482_s12  ;;  %1460 = vrot.lane.b32.xlu1 %v5139_v59, %s4481_s11 }
 0x341   :  { %v5324_v31 = vpop.permute.xlu0 %1658  ;;  %v5326_v8 = vpop.permute.xlu1 %1574 }
 0x342   :  { %7851 = vst [vmem:[#allocation24_spill] sm:$0xff] %v5324_v31  ;;  %7852 = vst [vmem:[#allocation25_spill] sm:$0xff] %v5326_v8  ;;  %v5670_v8 = vld [vmem:[#allocation2 + $0x208] sm:$0xff] }
 0x343   :  { %1576 = vrot.lane.b32.xlu0 %v5123_v49, %s4482_s12  ;;  %1562 = vrot.lane.b32.xlu1 %v5128_v52, %s4482_s12  ;;  %7903 = vst [vmem:[#allocation76_spill] sm:$0xff] %v5670_v8 }
 0x345   :  { %v5332_v41 = vpop.permute.xlu0 %1674  ;;  %v5334_v34 = vpop.permute.xlu1 %1660 }
 0x346   :  { %7853 = vst [vmem:[#allocation26_spill] sm:$0xff] %v5332_v41  ;;  %7854 = vst [vmem:[#allocation27_spill] sm:$0xff] %v5334_v34 }
 0x347   :  { %1662 = vrot.lane.b32.xlu0 %v5113_v37, %s4483_s13  ;;  %1578 = vrot.lane.b32.xlu1 %v5139_v59, %s4482_s12 }
 0x349   :  { %v5340_v45 = vpop.permute.xlu0 %1760  ;;  %v5342_v11 = vpop.permute.xlu1 %1676 }
 0x34a   :  { %7855 = vst [vmem:[#allocation28_spill] sm:$0xff] %v5340_v45  ;;  %7856 = vst [vmem:[#allocation29_spill] sm:$0xff] %v5342_v11 }
 0x34b   :  { %1678 = vrot.lane.b32.xlu0 %v5123_v49, %s4483_s13  ;;  %1664 = vrot.lane.b32.xlu1 %v5128_v52, %s4483_s13 }
 0x34d   :  { %v5348_v50 = vpop.permute.xlu0 %1776  ;;  %v5350_v22 = vpop.permute.xlu1 %1762 }
 0x34e   :  { %7857 = vst [vmem:[#allocation30_spill] sm:$0xff] %v5350_v22 }
 0x34f   :  { %1764 = vrot.lane.b32.xlu0 %v5113_v37, %s4484_s14  ;;  %1680 = vrot.lane.b32.xlu1 %v5139_v59, %s4483_s13 }
 0x351   :  { %v5356_v36 = vpop.permute.xlu0 %1862  ;;  %v5358_v56 = vpop.permute.xlu1 %1778 }
 0x352   :  { %7858 = vst [vmem:[#allocation31_spill] sm:$0xff] %v5356_v36  ;;  %7859 = vst [vmem:[#allocation32_spill] sm:$0xff] %v5358_v56 }
 0x353   :  { %1780 = vrot.lane.b32.xlu0 %v5123_v49, %s4484_s14  ;;  %1766 = vrot.lane.b32.xlu1 %v5128_v52, %s4484_s14 }
 0x355   :  { %v1141_v17 = vpop.permute.xlu0 %1140  ;;  %v5364_v27 = vpop.permute.xlu1 %1864 }
 0x356   :  { %7860 = vst [vmem:[#allocation33_spill] sm:$0xff] %v5364_v27  ;;  %v1172_v0 = vsel %vm106_vm0, %v5246_v33, %v1141_v17  ;;  %v1168_v28 = vsel %vm106_vm0, %v1141_v17, %v5254_v46 }
 0x357   :  { %1144 = vrot.lane.b32.xlu0 %v5116_v44, %s4478_s24  ;;  %1782 = vrot.lane.b32.xlu1 %v5139_v59, %s4484_s14  ;;  %v1203_v43 = vmul.f32 %v5367_v1, %v1172_v0 }
 0x359   :  { %v1157_v2 = vpop.permute.xlu0 %1156  ;;  %v1143_v51 = vpop.permute.xlu1 %1142 }
 0x35a   :  { %v1173_v4 = vsel %vm106_vm0, %v5252_v14, %v1143_v51  ;;  %v1164_v7 = vsel %vm106_vm0, %v5254_v46, %v1157_v2  ;;  %v1176_v6 = vsel %vm106_vm0, %v1157_v2, %v5246_v33  ;;  %v1169_v53 = vsel %vm106_vm0, %v1143_v51, %v5262_v32 }
 0x35b   :  { %v1207_v55 = vmul.f32 %v5367_v1, %v1173_v4  ;;  %1160 = vrot.lane.b32.xlu0 %v5126_v15, %s4478_s24  ;;  %1146 = vrot.lane.b32.xlu1 %v5131_v57, %s4478_s24  ;;  %v5403_v4 = vrot.slane %v1180_v38, %v4701_v25  ;;  %v1202_v51 = vmul.f32 %v5381_v18, %v1176_v6 }
 0x35c   :  { %v1205_v22 = vmul.f32 %v5384_v19, %v1164_v7 }
 0x35d   :  { %v5400_v58 = vpop.permute.xlu0 %1242  ;;  %v1159_v62 = vpop.permute.xlu1 %1158  ;;  %v3965_v0 = vpack.c.bf16 %v1207_v55, %v1203_v43  ;;  %v1208_v46 = vmul.f32 %v5403_v4, %v1169_v53  ;;  %v1204_v7 = vmul.f32 %v5403_v4, %v1168_v28 }
 0x35e   :  { %v1165_v33 = vsel %vm106_vm0, %v5262_v32, %v1159_v62  ;;  %v1177_v2 = vsel %vm106_vm0, %v1159_v62, %v5252_v14 }
 0x35f   :  { %v1206_v43 = vmul.f32 %v5381_v18, %v1177_v2  ;;  %v1209_v38 = vmul.f32 %v5384_v19, %v1165_v33  ;;  %1246 = vrot.lane.b32.xlu0 %v5116_v44, %s4479_s4  ;;  %1162 = vrot.lane.b32.xlu1 %v5142_v35, %s4478_s24  ;;  %v4039_v6 = vpack.c.bf16 %v1208_v46, %v1204_v7  ;;  %v5456_v2 = vld [vmem:[#allocation8 + $0x5] ss:$8 sm:$0xf] }
 0x360   :  { %3966 = vmatprep.subr.bf16.mxu0 %v3965_v0 }
 0x361   :  { %v5423_v32 = vpop.permute.xlu0 %1258  ;;  %v5425_v14 = vpop.permute.xlu1 %1244  ;;  %v3967_v17 = vpack.c.bf16 %v1206_v43, %v1202_v51  ;;  %v4037_v55 = vpack.c.bf16 %v1209_v38, %v1205_v22  ;;  %v5466_v38 = vrot.slane %v5456_v2, %v4695_v21 }
 0x363   :  { %1262 = vrot.lane.b32.xlu0 %v5126_v15, %s4479_s4  ;;  %1248 = vrot.lane.b32.xlu1 %v5131_v57, %s4479_s4  ;;  %7863 = vst [vmem:[#allocation36_spill] sm:$0xff] %v5466_v38 }
 0x364   :  { %3968 = vmatpush1.bf16.msra.mxu0 %v3967_v17  ;;  %4038 = vmatprep.subr.bf16.mxu1 %v4037_v55 }
 0x365   :  { %v5432_v53 = vpop.permute.xlu0 %1344  ;;  %v5434_v62 = vpop.permute.xlu1 %1260  ;;  %4040 = vmatpush1.bf16.msra.mxu1 %v4039_v6  ;;  %v5483_v6 = vld [vmem:[#allocation8 + $0x6] ss:$8 sm:$0xf] }
 0x366   :  { %v5510_v11 = vrot.slane %v5483_v6, %v4701_v25 }
 0x367   :  { %1348 = vrot.lane.b32.xlu0 %v5116_v44, %s4480_s10  ;;  %1264 = vrot.lane.b32.xlu1 %v5142_v35, %s4479_s4 }
 0x368   :  { %7871 = vst [vmem:[#allocation44_spill] sm:$0xff] %v5510_v11 }
 0x369   :  { %v5440_v28 = vpop.permute.xlu0 %1360  ;;  %v5442_v22 = vpop.permute.xlu1 %1346 }
 0x36b   :  { %1364 = vrot.lane.b32.xlu0 %v5126_v15, %s4480_s10  ;;  %1350 = vrot.lane.b32.xlu1 %v5131_v57, %s4480_s10 }
 0x36d   :  { %v5448_v0 = vpop.permute.xlu0 %1446  ;;  %v5450_v33 = vpop.permute.xlu1 %1362 }
 0x36f   :  { %1450 = vrot.lane.b32.xlu0 %v5116_v44, %s4481_s11  ;;  %1366 = vrot.lane.b32.xlu1 %v5142_v35, %s4480_s10 }
 0x371   :  { %v5458_v51 = vpop.permute.xlu0 %1462  ;;  %v5460_v43 = vpop.permute.xlu1 %1448 }
 0x372   :  { %7861 = vst [vmem:[#allocation34_spill] sm:$0xff] %v5458_v51  ;;  %7862 = vst [vmem:[#allocation35_spill] sm:$0xff] %v5460_v43 }
 0x373   :  { %1466 = vrot.lane.b32.xlu0 %v5126_v15, %s4481_s11  ;;  %1452 = vrot.lane.b32.xlu1 %v5131_v57, %s4481_s11 }
 0x375   :  { %v5470_v46 = vpop.permute.xlu0 %1564  ;;  %v5472_v17 = vpop.permute.xlu1 %1464 }
 0x376   :  { %7864 = vst [vmem:[#allocation37_spill] sm:$0xff] %v5470_v46  ;;  %7865 = vst [vmem:[#allocation38_spill] sm:$0xff] %v5472_v17  ;;  %v1596_v55 = vsel %vm305_vm4, %v5308_v5, %v5470_v46  ;;  %v5493_v5 = vrot.slane %v5483_v6, %v4695_v21  ;;  %v5662_v46 = vld [vmem:[#allocation2 + $0x220] sm:$0xff] }
 0x377   :  { %v1626_v7 = vmul.f32 %v5466_v38, %v1596_v55  ;;  %1878 = vrot.lane.b32.xlu0 %v5091_v26, %s4485_s15  ;;  %1468 = vrot.lane.b32.xlu1 %v5142_v35, %s4481_s11  ;;  %7900 = vst [vmem:[#allocation73_spill] sm:$0xff] %v5662_v46  ;;  %v1368_v46 = vsel %vm205_vm2, %v5284_v60, %v5440_v28 }
 0x378   :  { %7868 = vst [vmem:[#allocation41_spill] sm:$0xff] %v5493_v5 }
 0x379   :  { %1642 = vst [vmem:[#allocation2 + $0x280] sm:$0xff] %v1626_v7  ;;  %v5485_v56 = vpop.permute.xlu0 %1580  ;;  %v5487_v34 = vpop.permute.xlu1 %1566 }
 0x37a   :  { %7866 = vst [vmem:[#allocation39_spill] sm:$0xff] %v5485_v56  ;;  %7867 = vst [vmem:[#allocation40_spill] sm:$0xff] %v5487_v34  ;;  %v5666_v34 = vld [vmem:[#allocation2 + $0x238] sm:$0xff] }
 0x37b   :  { %1568 = vrot.lane.b32.xlu0 %v5116_v44, %s4482_s12  ;;  %1880 = vrot.lane.b32.xlu1 %v5103_v54, %s4485_s15  ;;  %v5514_v54 = vld [vmem:[#allocation8 + $0x7] ss:$8 sm:$0xf]  ;;  %7901 = vst [vmem:[#allocation74_spill] sm:$0xff] %v5666_v34 }
 0x37d   :  { %v5497_v26 = vpop.permute.xlu0 %1666  ;;  %v5499_v55 = vpop.permute.xlu1 %1582 }
 0x37e   :  { %7869 = vst [vmem:[#allocation42_spill] sm:$0xff] %v5497_v26  ;;  %7870 = vst [vmem:[#allocation43_spill] sm:$0xff] %v5499_v55  ;;  %v1698_v7 = vsel %vm355_vm5, %v5324_v31, %v5497_v26 }
 0x37f   :  { %v1728_v38 = vmul.f32 %v5493_v5, %v1698_v7  ;;  %1584 = vrot.lane.b32.xlu0 %v5126_v15, %s4482_s12  ;;  %1888 = vrot.lane.b32.xlu1 %v5110_v30, %s4485_s15  ;;  %v5529_v30 = vrot.slane %v5514_v54, %v4695_v21 }
 0x381   :  { %1744 = vst [vmem:[#allocation2 + $0x300] sm:$0xff] %v1728_v38  ;;  %v5516_v56 = vpop.permute.xlu0 %1682  ;;  %v5518_v55 = vpop.permute.xlu1 %1668  ;;  %7874 = vst [vmem:[#allocation47_spill] sm:$0xff] %v5529_v30  ;;  %v5533_v38 = vrot.slane %v5514_v54, %v4699_v24 }
 0x382   :  { %7872 = vst [vmem:[#allocation45_spill] sm:$0xff] %v5516_v56  ;;  %7873 = vst [vmem:[#allocation46_spill] sm:$0xff] %v5518_v55  ;;  %v1690_v7 = vsel %vm355_vm5, %v5332_v41, %v5516_v56 }
 0x383   :  { %v1730_v5 = vmul.f32 %v5510_v11, %v1690_v7  ;;  %1670 = vrot.lane.b32.xlu0 %v5116_v44, %s4483_s13  ;;  %7875 = vst [vmem:[#allocation48_spill] sm:$0xff] %v5533_v38  ;;  %1570 = vrot.lane.b32.xlu1 %v5131_v57, %s4482_s12 }
 0x385   :  { %1746 = vst [vmem:[#allocation2 + $0x310] sm:$0xff] %v1730_v5  ;;  %v1769_v31 = vpop.permute.xlu0 %1768  ;;  %v5537_v26 = vpop.permute.xlu1 %1684  ;;  %v5551_v5 = vrot.slane %v5514_v54, %v4701_v25 }
 0x386   :  { %7876 = vst [vmem:[#allocation49_spill] sm:$0xff] %v5537_v26  ;;  %v1796_v7 = vsel %vm405_vm6, %v1769_v31, %v5348_v50  ;;  %v1800_v11 = vsel %vm405_vm6, %v5340_v45, %v1769_v31  ;;  %v5555_v26 = vld [vmem:[#allocation8 + $0x20] ss:$8 sm:$0xf] }
 0x387   :  { %v1830_v56 = vmul.f32 %v5529_v30, %v1800_v11  ;;  %v1831_v41 = vmul.f32 %v5533_v38, %v1796_v7  ;;  %1686 = vrot.lane.b32.xlu0 %v5126_v15, %s4483_s13  ;;  %7877 = vst [vmem:[#allocation50_spill] sm:$0xff] %v5551_v5  ;;  %1586 = vrot.lane.b32.xlu1 %v5142_v35, %s4482_s12  ;;  %7878 = vst [vmem:[#allocation51_spill] sm:$0xff] %v5555_v26  ;;  %v1968_v30 = vld [vmem:[#allocation11 + $0x8] sm:$0xff] }
 0x388   :  { %v5570_v38 = vrot.slane %v5555_v26, %v4695_v21  ;;  %2216 = vmatprep.mubr.f32.mxu0 %v1968_v30  ;;  %2394 = vmatprep.mubr.f32.mxu1 %v1968_v30  ;;  %v5684_v26 = vld [vmem:[#allocation2 + $0x260] sm:$0xff] }
 0x389   :  { %1846 = vst [vmem:[#allocation2 + $0x380] sm:$0xff] %v1830_v56  ;;  %1847 = vst [vmem:[#allocation2 + $0x388] sm:$0xff] %v1831_v41  ;;  %v5557_v55 = vpop.permute.xlu0 %1784  ;;  %v5559_v31 = vpop.permute.xlu1 %1770 }
 0x38a   :  { %7879 = vst [vmem:[#allocation52_spill] sm:$0xff] %v5557_v55  ;;  %7880 = vst [vmem:[#allocation53_spill] sm:$0xff] %v5559_v31  ;;  %v1792_v11 = vsel %vm405_vm6, %v5348_v50, %v5557_v55 }
 0x38b   :  { %v1832_v7 = vmul.f32 %v5551_v5, %v1792_v11  ;;  %1772 = vrot.lane.b32.xlu0 %v5116_v44, %s4484_s14  ;;  %7881 = vst [vmem:[#allocation54_spill] sm:$0xff] %v5570_v38  ;;  %1672 = vrot.lane.b32.xlu1 %v5131_v57, %s4483_s13  ;;  %7910 = vst [vmem:[#allocation83_spill] sm:$0xff] %v5684_v26 }
 0x38d   :  { %1848 = vst [vmem:[#allocation2 + $0x390] sm:$0xff] %v1832_v7  ;;  %v5574_v41 = vpop.permute.xlu0 %1870  ;;  %v5576_v56 = vpop.permute.xlu1 %1786 }
 0x38e   :  { %7882 = vst [vmem:[#allocation55_spill] sm:$0xff] %v5574_v41  ;;  %7883 = vst [vmem:[#allocation56_spill] sm:$0xff] %v5576_v56  ;;  %v1902_v50 = vsel %vm455_vm7, %v5356_v36, %v5574_v41 }
 0x38f   :  { %v1932_v11 = vmul.f32 %v5570_v38, %v1902_v50  ;;  %1788 = vrot.lane.b32.xlu0 %v5126_v15, %s4484_s14  ;;  %1688 = vrot.lane.b32.xlu1 %v5142_v35, %s4483_s13 }
 0x391   :  { %1948 = vst [vmem:[#allocation2 + $0x400] sm:$0xff] %v1932_v11  ;;  %v5587_v5 = vpop.permute.xlu0 %1136  ;;  %v5589_v7 = vpop.permute.xlu1 %1872 }
 0x392   :  { %7884 = vst [vmem:[#allocation57_spill] sm:$0xff] %v5589_v7  ;;  %v1903_v56 = vsel %vm455_vm7, %v5364_v27, %v5589_v7 }
 0x393   :  { %v1936_v36 = vmul.f32 %v5570_v38, %v1903_v56  ;;  %1886 = vrot.lane.b32.xlu0 %v5094_v3, %s4485_s15  ;;  %1774 = vrot.lane.b32.xlu1 %v5131_v57, %s4484_s14 }
 0x395   :  { %1952 = vst [vmem:[#allocation2 + $0x420] sm:$0xff] %v1936_v36  ;;  %v5600_v50 = vpop.permute.xlu1 %1138  ;;  %v5602_v11 = vpop.permute.xlu0 %1152 }
 0x397   :  { %1866 = vrot.lane.b32.xlu0 %v5113_v37, %s4485_s15  ;;  %1790 = vrot.lane.b32.xlu1 %v5142_v35, %s4484_s14 }
 0x399   :  { %v5608_v56 = vpop.permute.xlu0 %1238  ;;  %v5610_v38 = vpop.permute.xlu1 %1154 }
 0x39b   :  { %1874 = vrot.lane.b32.xlu0 %v5116_v44, %s4485_s15  ;;  %1868 = vrot.lane.b32.xlu1 %v5128_v52, %s4485_s15 }
 0x39d   :  { %v5616_v3 = vpop.permute.xlu0 %1254  ;;  %v5618_v36 = vpop.permute.xlu1 %1240 }
 0x39f   :  { %1882 = vrot.lane.b32.xlu0 %v5123_v49, %s4485_s15  ;;  %1884 = vrot.lane.b32.xlu1 %v5139_v59, %s4485_s15 }
 0x3a1   :  { %v5624_v37 = vpop.permute.xlu0 %1340  ;;  %v5626_v30 = vpop.permute.xlu1 %1256 }
 0x3a2   :  { %7885 = vst [vmem:[#allocation58_spill] sm:$0xff] %v5624_v37  ;;  %v1486_v37 = vld [vmem:[#allocation8 + $0x3] ss:$8 sm:$0xf] }
 0x3a3   :  { %1890 = vrot.lane.b32.xlu0 %v5126_v15, %s4485_s15  ;;  %1876 = vrot.lane.b32.xlu1 %v5131_v57, %s4485_s15 }
 0x3a5   :  { %v5632_v44 = vpop.permute.xlu0 %1356  ;;  %v5634_v52 = vpop.permute.xlu1 %1342 }
 0x3a6   :  { %7886 = vst [vmem:[#allocation59_spill] sm:$0xff] %v5632_v44  ;;  %7887 = vst [vmem:[#allocation60_spill] sm:$0xff] %v5634_v52  ;;  %v5692_v44 = vld [vmem:[#allocation2 + $0x258] sm:$0xff] }
 0x3a7   :  { %1892 = vrot.lane.b32.xlu1 %v5142_v35, %s4485_s15  ;;  %7914 = vst [vmem:[#allocation87_spill] sm:$0xff] %v5692_v44  ;;  %v1384_v52 = vld [vmem:[#allocation8 + $0x2] ss:$8 sm:$0xf]  ;;  %v5751_v44 = vrot.slane %v1486_v37, %v4699_v24 }
 0x3a8   :  { %v5727_v51 = vrot.slane %v1384_v52, %v4699_v24  ;;  %v5730_v17 = vrot.slane %v1384_v52, %v4701_v25  ;;  %v5748_v26 = vrot.slane %v1384_v52, %v4697_v23 }
 0x3a9   :  { %v5638_v49 = vpop.permute.xlu0 %1442  ;;  %v5640_v59 = vpop.permute.xlu1 %1358 }
 0x3aa   :  { %7888 = vst [vmem:[#allocation61_spill] sm:$0xff] %v5638_v49  ;;  %7889 = vst [vmem:[#allocation62_spill] sm:$0xff] %v5640_v59  ;;  %v5694_v59 = vld [vmem:[#allocation2 + $0x278] sm:$0xff] }
 0x3ab   :  { %7915 = vst [vmem:[#allocation88_spill] sm:$0xff] %v5694_v59  ;;  %v5762_v59 = vrot.slane %v1486_v37, %v4701_v25 }
 0x3ad   :  { %v5642_v27 = vpop.permute.xlu0 %1458  ;;  %v5644_v41 = vpop.permute.xlu1 %1444 }
 0x3ae   :  { %7890 = vst [vmem:[#allocation63_spill] sm:$0xff] %v5642_v27  ;;  %7891 = vst [vmem:[#allocation64_spill] sm:$0xff] %v5644_v41  ;;  %v5686_v27 = vld [vmem:[#allocation2 + $0x270] sm:$0xff] }
 0x3af   :  { %7911 = vst [vmem:[#allocation84_spill] sm:$0xff] %v5686_v27 }
 0x3b1   :  { %v5646_v7 = vpop.permute.xlu0 %1560  ;;  %v5648_v15 = vpop.permute.xlu1 %1460 }
 0x3b2   :  { %7892 = vst [vmem:[#allocation65_spill] sm:$0xff] %v5646_v7  ;;  %7893 = vst [vmem:[#allocation66_spill] sm:$0xff] %v5648_v15  ;;  %v5668_v7 = vld [vmem:[#allocation2 + $0x230] sm:$0xff] }
 0x3b3   :  { %7902 = vst [vmem:[#allocation75_spill] sm:$0xff] %v5668_v7  ;;  %v1282_v15 = vld [vmem:[#allocation8 + $0x1] ss:$8 sm:$0xf]  ;;  %v5776_v7 = vrot.slane %v1486_v37, %v4697_v23 }
 0x3b4   :  { %v5713_v8 = vrot.slane %v1282_v15, %v4699_v24  ;;  %v5716_v43 = vrot.slane %v1282_v15, %v4701_v25  ;;  %v5719_v10 = vrot.slane %v1282_v15, %v4695_v21 }
 0x3b5   :  { %v5650_v57 = vpop.permute.xlu0 %1576  ;;  %v5652_v31 = vpop.permute.xlu1 %1562 }
 0x3b6   :  { %7894 = vst [vmem:[#allocation67_spill] sm:$0xff] %v5650_v57  ;;  %7895 = vst [vmem:[#allocation68_spill] sm:$0xff] %v5652_v31  ;;  %v5672_v57 = vld [vmem:[#allocation2 + $0x200] sm:$0xff]  ;;  %v5674_v31 = vld [vmem:[#allocation2 + $0x248] sm:$0xff] }
 0x3b7   :  { %7904 = vst [vmem:[#allocation77_spill] sm:$0xff] %v5672_v57  ;;  %7905 = vst [vmem:[#allocation78_spill] sm:$0xff] %v5674_v31 }
 0x3b9   :  { %v5654_v55 = vpop.permute.xlu0 %1662  ;;  %v5656_v45 = vpop.permute.xlu1 %1578 }
 0x3ba   :  { %7896 = vst [vmem:[#allocation69_spill] sm:$0xff] %v5654_v55  ;;  %7897 = vst [vmem:[#allocation70_spill] sm:$0xff] %v5656_v45  ;;  %v5676_v55 = vld [vmem:[#allocation2 + $0x210] sm:$0xff]  ;;  %v5678_v45 = vld [vmem:[#allocation2 + $0x240] sm:$0xff] }
 0x3bb   :  { %7906 = vst [vmem:[#allocation79_spill] sm:$0xff] %v5676_v55  ;;  %7907 = vst [vmem:[#allocation80_spill] sm:$0xff] %v5678_v45  ;;  %v1279_v55 = vsel %vm155_vm1, %v5434_v62, %v5270_v40 }
 0x3bd   :  { %v5658_v35 = vpop.permute.xlu0 %1678  ;;  %v5660_v29 = vpop.permute.xlu1 %1664 }
 0x3be   :  { %7898 = vst [vmem:[#allocation71_spill] sm:$0xff] %v5658_v35  ;;  %7899 = vst [vmem:[#allocation72_spill] sm:$0xff] %v5660_v29  ;;  %v5680_v35 = vld [vmem:[#allocation2 + $0x250] sm:$0xff]  ;;  %v5682_v29 = vld [vmem:[#allocation2 + $0x268] sm:$0xff] }
 0x3bf   :  { %7908 = vst [vmem:[#allocation81_spill] sm:$0xff] %v5680_v35  ;;  %7909 = vst [vmem:[#allocation82_spill] sm:$0xff] %v5682_v29  ;;  %v5733_v35 = vrot.slane %v1384_v52, %v4695_v21  ;;  %v1267_v52 = vsel %vm155_vm1, %v5278_v42, %v5434_v62 }
 0x3c1   :  { %v5688_v41 = vpop.permute.xlu0 %1764  ;;  %v5690_v49 = vpop.permute.xlu1 %1680 }
 0x3c2   :  { %7912 = vst [vmem:[#allocation85_spill] sm:$0xff] %v5688_v41  ;;  %7913 = vst [vmem:[#allocation86_spill] sm:$0xff] %v5690_v49  ;;  %v5724_v49 = vrot.slane %v1282_v15, %v4697_v23  ;;  %v1271_v41 = vsel %vm155_vm1, %v5425_v14, %v5278_v42  ;;  %v1275_v15 = vsel %vm155_vm1, %v5270_v40, %v5425_v14 }
 0x3c3   :  { %v5765_v14 = vrot.slane %v1486_v37, %v4695_v21  ;;  %v1278_v21 = vsel %vm155_vm1, %v5423_v32, %v5260_v48  ;;  %v5787_v31 = vmul.f32 %v5713_v8, %v1275_v15  ;;  %v5790_v42 = vmul.f32 %v5716_v43, %v1271_v41 }
 0x3c4   :  { %v5794_v40 = vrot.slane %v5456_v2, %v4701_v25  ;;  %v5810_v41 = vrot.slane %v5456_v2, %v4697_v23  ;;  %v1372_v15 = vsel %vm205_vm2, %v5432_v53, %v5284_v60  ;;  %v5824_v25 = vmul.f32 %v5724_v49, %v1267_v52 }
 0x3c5   :  { %v5735_v27 = vpop.permute.xlu0 %1780  ;;  %v5737_v45 = vpop.permute.xlu1 %1766 }
 0x3c6   :  { %7917 = vst [vmem:[#allocation90_spill] sm:$0xff] %v5735_v27  ;;  %7918 = vst [vmem:[#allocation91_spill] sm:$0xff] %v5737_v45  ;;  %v1270_v45 = vsel %vm155_vm1, %v5400_v58, %v5268_v39  ;;  %v1274_v27 = vsel %vm155_vm1, %v5260_v48, %v5400_v58  ;;  %v5780_v58 = vrot.slane %v5456_v2, %v4699_v24 }
 0x3c7   :  { %v5799_v29 = vmul.f32 %v5713_v8, %v1274_v27  ;;  %v5802_v57 = vmul.f32 %v5716_v43, %v1270_v45  ;;  %v1266_v48 = vsel %vm155_vm1, %v5268_v39, %v5423_v32  ;;  %v1376_v45 = vsel %vm205_vm2, %v5276_v13, %v5432_v53 }
 0x3c8   :  { %v5821_v27 = vmul.f32 %v5719_v10, %v1279_v55  ;;  %v5827_v39 = vmul.f32 %v5719_v10, %v1278_v21  ;;  %v5831_v32 = vrot.slane %v5483_v6, %v4699_v24  ;;  %v5835_v2 = vrot.slane %v5483_v6, %v4697_v23 }
 0x3c9   :  { %v1145_v62 = vpop.permute.xlu0 %1144  ;;  %v5796_v37 = vpop.permute.xlu1 %1782  ;;  %v5839_v53 = vrot.slane %v5514_v54, %v4697_v23  ;;  %v5842_v55 = vmul.f32 %v5724_v49, %v1266_v48  ;;  %v5852_v6 = vmul.f32 %v5727_v51, %v1376_v45  ;;  %v5855_v54 = vmul.f32 %v5730_v17, %v1372_v15 }
 0x3ca   :  { %7919 = vst [vmem:[#allocation92_spill] sm:$0xff] %v5796_v37  ;;  %7920 = vst [vmem:[#allocation93_spill] sm:$0xff] %v5835_v2  ;;  %v1174_v21 = vsel %vm106_vm0, %v5587_v5, %v1145_v62  ;;  %v3973_v37 = vpack.c.bf16 %v5787_v31, %v5799_v29  ;;  %v1380_v48 = vsel %vm205_vm2, %v5440_v28, %v5276_v13 }
 0x3cb   :  { %7921 = vst [vmem:[#allocation94_spill] sm:$0xff] %v5839_v53  ;;  %v1377_v53 = vsel %vm205_vm2, %v5286_v9, %v5442_v22  ;;  %v1373_v31 = vsel %vm205_vm2, %v5442_v22, %v5294_v12  ;;  %v4045_v45 = vpack.c.bf16 %v5824_v25, %v5842_v55  ;;  %v3975_v13 = vpack.c.bf16 %v5821_v27, %v5827_v39  ;;  %v7925_v27 = vld [vmem:[#allocation21_spill] sm:$0xff]  ;;  %v7926_v39 = vld [vmem:[#allocation35_spill] sm:$0xff] }
 0x3cc   :  { %v1211_v2 = vmul.f32 %v5367_v1, %v1174_v21  ;;  %v5886_v34 = vmul.f32 %v5733_v35, %v1380_v48  ;;  %v5889_v25 = vmul.f32 %v5727_v51, %v1377_v53  ;;  %v5898_v21 = vmul.f32 %v5730_v17, %v1373_v31 }
 0x3cd   :  { %v1161_v52 = vpop.permute.xlu0 %1160  ;;  %v1147_v29 = vpop.permute.xlu1 %1146  ;;  %v1170_v53 = vsel %vm106_vm0, %v1145_v62, %v5602_v11 }
 0x3ce   :  { %v1175_v15 = vsel %vm106_vm0, %v5600_v50, %v1147_v29  ;;  %v1171_v22 = vsel %vm106_vm0, %v1147_v29, %v5610_v38  ;;  %v1166_v55 = vsel %vm106_vm0, %v5602_v11, %v1161_v52  ;;  %v1178_v60 = vsel %vm106_vm0, %v1161_v52, %v5587_v5 }
 0x3cf   :  { %v1215_v61 = vmul.f32 %v5367_v1, %v1175_v15  ;;  %v1369_v1 = vsel %vm205_vm2, %v5294_v12, %v5450_v33  ;;  %v1381_v5 = vsel %vm205_vm2, %v5450_v33, %v5286_v9  ;;  %v1216_v52 = vmul.f32 %v5403_v4, %v1171_v22 }
 0x3d0   :  { %v1210_v15 = vmul.f32 %v5381_v18, %v1178_v60  ;;  %v1213_v11 = vmul.f32 %v5384_v19, %v1166_v55  ;;  %v5923_v9 = vmul.f32 %v5748_v26, %v1368_v46  ;;  %v1212_v33 = vmul.f32 %v5403_v4, %v1170_v53 }
 0x3d1   :  { %v1247_v28 = vpop.permute.xlu0 %1246  ;;  %v1163_v48 = vpop.permute.xlu1 %1162  ;;  %v3969_v29 = vpack.c.bf16 %v1215_v61, %v1211_v2  ;;  %v5932_v22 = vmul.f32 %v5748_v26, %v1369_v1  ;;  %v4055_v46 = vpack.c.bf16 %v5898_v21, %v5855_v54  ;;  %v1478_v4 = vsel %vm255_vm3, %v5292_v63, %v5448_v0 }
 0x3d2   :  { %v1167_v31 = vsel %vm106_vm0, %v5610_v38, %v1163_v48  ;;  %v1179_v12 = vsel %vm106_vm0, %v1163_v48, %v5600_v50  ;;  %v1276_v38 = vsel %vm155_vm1, %v5608_v56, %v1247_v28  ;;  %v3981_v50 = vpack.c.bf16 %v5889_v25, %v5852_v6 }
 0x3d3   :  { %v1214_v61 = vmul.f32 %v5381_v18, %v1179_v12  ;;  %v1217_v62 = vmul.f32 %v5384_v19, %v1167_v31  ;;  %3970 = vmatprep.subr.bf16.mxu0 %v3969_v29  ;;  %v5941_v60 = vmul.f32 %v5733_v35, %v1381_v5  ;;  %v4043_v25 = vpack.c.bf16 %v1216_v52, %v1212_v33 }
 0x3d4   :  { %v1313_v1 = vmul.f32 %v5713_v8, %v1276_v38  ;;  %v5955_v29 = vsel %vm255_vm3, %v5448_v0, %v5300_v16  ;;  %v1272_v12 = vsel %vm155_vm1, %v1247_v28, %v5616_v3 }
 0x3d5   :  { %v1263_v2 = vpop.permute.xlu0 %1262  ;;  %v1249_v18 = vpop.permute.xlu1 %1248  ;;  %v3971_v55 = vpack.c.bf16 %v1214_v61, %v1210_v15  ;;  %v4041_v19 = vpack.c.bf16 %v1217_v62, %v1213_v11  ;;  %v4053_v11 = vpack.c.bf16 %v5932_v22, %v5923_v9  ;;  %v3983_v62 = vpack.c.bf16 %v5941_v60, %v5886_v34  ;;  %v7923_v34 = vld [vmem:[#allocation58_spill] sm:$0xff] }
 0x3d6   :  { %v1277_v6 = vsel %vm155_vm1, %v5618_v36, %v1249_v18  ;;  %v1273_v53 = vsel %vm155_vm1, %v1249_v18, %v5626_v30  ;;  %v1268_v5 = vsel %vm155_vm1, %v5616_v3, %v1263_v2  ;;  %v1280_v52 = vsel %vm155_vm1, %v1263_v2, %v5608_v56  ;;  %v7927_v18 = vld [vmem:[#allocation19_spill] sm:$0xff] }
 0x3d7   :  { %v1317_v48 = vmul.f32 %v5713_v8, %v1277_v6  ;;  %3972 = vmatpush1.bf16.msra.mxu0 %v3971_v55  ;;  %4042 = vmatprep.subr.bf16.mxu1 %v4041_v19  ;;  %v5964_v8 = vmul.f32 %v5751_v44, %v1478_v4  ;;  %v1318_v61 = vmul.f32 %v5716_v43, %v1273_v53  ;;  %v7929_v19 = vld [vmem:[#allocation60_spill] sm:$0xff]  ;;  %v7930_v6 = vld [vmem:[#allocation62_spill] sm:$0xff] }
 0x3d8   :  { %3974 = vmatprep.subr.bf16.mxu0 %v3973_v37  ;;  %4044 = vmatpush1.bf16.msra.mxu1 %v4043_v25  ;;  %v1312_v3 = vmul.f32 %v5719_v10, %v1280_v52  ;;  %v1314_v33 = vmul.f32 %v5716_v43, %v1272_v12  ;;  %v1479_v55 = vsel %vm255_vm3, %v7927_v18, %v7926_v39 }
 0x3d9   :  { %v1349_v31 = vpop.permute.xlu0 %1348  ;;  %v1265_v0 = vpop.permute.xlu1 %1264  ;;  %4046 = vmatprep.subr.bf16.mxu1 %v4045_v45  ;;  %v3977_v15 = vpack.c.bf16 %v1317_v48, %v1313_v1  ;;  %v1315_v45 = vmul.f32 %v5724_v49, %v1268_v5  ;;  %v7931_v48 = vld [vmem:[#allocation59_spill] sm:$0xff] }
 0x3da   :  { %v1269_v56 = vsel %vm155_vm1, %v5626_v30, %v1265_v0  ;;  %v1281_v37 = vsel %vm155_vm1, %v1265_v0, %v5618_v36  ;;  %v7922_v30 = vld [vmem:[#allocation34_spill] sm:$0xff]  ;;  %v1378_v38 = vsel %vm205_vm2, %v7923_v34, %v1349_v31  ;;  %v4051_v4 = vpack.c.bf16 %v1318_v61, %v1314_v33 }
 0x3db   :  { %v1316_v28 = vmul.f32 %v5719_v10, %v1281_v37  ;;  %v1319_v9 = vmul.f32 %v5724_v49, %v1269_v56  ;;  %3976 = vmatpush1.bf16.msra.mxu0 %v3975_v13  ;;  %v1470_v36 = vsel %vm255_vm3, %v5300_v16, %v7922_v30  ;;  %v7924_v10 = vpack.c.bf16 %v5790_v42, %v5802_v57  ;;  %v7928_v57 = vld [vmem:[#allocation38_spill] sm:$0xff] }
 0x3dc   :  { %3978 = vmatprep.subr.bf16.mxu0 %v3977_v15  ;;  %v1482_v49 = vsel %vm255_vm3, %v7922_v30, %v5292_v63  ;;  %v1475_v16 = vsel %vm255_vm3, %v7926_v39, %v7925_v27  ;;  %v1471_v42 = vsel %vm255_vm3, %v7925_v27, %v7928_v57  ;;  %v1415_v60 = vmul.f32 %v5727_v51, %v1378_v38 }
 0x3dd   :  { %v1365_v2 = vpop.permute.xlu0 %1364  ;;  %4048 = vmatpush1.bf16.msra.mxu1 %v7924_v10  ;;  %v1351_v43 = vpop.permute.xlu1 %1350  ;;  %v3979_v13 = vpack.c.bf16 %v1316_v28, %v1312_v3  ;;  %v4049_v22 = vpack.c.bf16 %v1319_v9, %v1315_v45  ;;  %v1508_v53 = vmul.f32 %v5765_v14, %v1482_v49  ;;  %v1513_v0 = vmul.f32 %v5751_v44, %v1479_v55 }
 0x3de   :  { %v1379_v63 = vsel %vm205_vm2, %v7929_v19, %v1351_v43  ;;  %v1375_v25 = vsel %vm205_vm2, %v1351_v43, %v7930_v6  ;;  %v1370_v5 = vsel %vm205_vm2, %v7931_v48, %v1365_v2  ;;  %v1382_v52 = vsel %vm205_vm2, %v1365_v2, %v7923_v34  ;;  %v7932_v34 = vld [vmem:[#allocation61_spill] sm:$0xff] }
 0x3df   :  { %v1419_v1 = vmul.f32 %v5727_v51, %v1379_v63  ;;  %3980 = vmatpush1.bf16.msra.mxu0 %v3979_v13  ;;  %4050 = vmatprep.subr.bf16.mxu1 %v4049_v22  ;;  %v1483_v51 = vsel %vm255_vm3, %v7928_v57, %v7927_v18  ;;  %v1374_v15 = vsel %vm205_vm2, %v1349_v31, %v7931_v48  ;;  %v7934_v22 = vld [vmem:[#allocation66_spill] sm:$0xff]  ;;  %v7936_v57 = vld [vmem:[#allocation51_spill] sm:$0xff] }
 0x3e0   :  { %3982 = vmatprep.subr.bf16.mxu0 %v3981_v50  ;;  %v1515_v37 = vmul.f32 %v5776_v7, %v1471_v42  ;;  %v1420_v3 = vmul.f32 %v5730_v17, %v1375_v25  ;;  %v1414_v28 = vmul.f32 %v5733_v35, %v1382_v52  ;;  %v1417_v9 = vmul.f32 %v5748_v26, %v1370_v5  ;;  %v7937_v52 = vld [vmem:[#allocation25_spill] sm:$0xff] }
 0x3e1   :  { %v1451_v12 = vpop.permute.xlu0 %1450  ;;  %4052 = vmatpush1.bf16.msra.mxu1 %v4051_v4  ;;  %v1367_v61 = vpop.permute.xlu1 %1366  ;;  %v3985_v56 = vpack.c.bf16 %v1419_v1, %v1415_v60  ;;  %v1511_v30 = vmul.f32 %v5776_v7, %v1470_v36  ;;  %v1416_v33 = vmul.f32 %v5730_v17, %v1374_v15  ;;  %v1514_v10 = vmul.f32 %v5762_v59, %v1475_v16  ;;  %v7933_v36 = vld [vmem:[#allocation64_spill] sm:$0xff]  ;;  %v7935_v16 = vld [vmem:[#allocation63_spill] sm:$0xff] }
 0x3e2   :  { %4054 = vmatprep.subr.bf16.mxu1 %v4053_v11  ;;  %v1371_v50 = vsel %vm205_vm2, %v7930_v6, %v1367_v61  ;;  %v1383_v45 = vsel %vm205_vm2, %v1367_v61, %v7929_v19  ;;  %v1480_v38 = vsel %vm255_vm3, %v7932_v34, %v1451_v12  ;;  %v3989_v27 = vpack.c.bf16 %v1513_v0, %v5964_v8 }
 0x3e3   :  { %v1418_v31 = vmul.f32 %v5733_v35, %v1383_v45  ;;  %v1421_v11 = vmul.f32 %v5748_v26, %v1371_v50  ;;  %3984 = vmatpush1.bf16.msra.mxu0 %v3983_v62  ;;  %v1512_v35 = vmul.f32 %v5765_v14, %v1483_v51  ;;  %v4059_v39 = vpack.c.bf16 %v1420_v3, %v1416_v33  ;;  %v7942_v3 = vld [vmem:[#allocation43_spill] sm:$0xff]  ;;  %v7945_v33 = vld [vmem:[#allocation46_spill] sm:$0xff] }
 0x3e4   :  { %3986 = vmatprep.subr.bf16.mxu0 %v3985_v56  ;;  %v4061_v43 = vpack.c.bf16 %v1515_v37, %v1511_v30  ;;  %v1517_v13 = vmul.f32 %v5751_v44, %v1480_v38  ;;  %v6083_v42 = vrot.slane %v7936_v57, %v4699_v24  ;;  %v6103_v61 = vrot.slane %v7936_v57, %v4697_v23  ;;  %v7939_v56 = vld [vmem:[#allocation22_spill] sm:$0xff]  ;;  %v7940_v37 = vld [vmem:[#allocation37_spill] sm:$0xff] }
 0x3e5   :  { %v1467_v2 = vpop.permute.xlu0 %1466  ;;  %4056 = vmatpush1.bf16.msra.mxu1 %v4055_v46  ;;  %v1453_v26 = vpop.permute.xlu1 %1452  ;;  %v3987_v62 = vpack.c.bf16 %v1418_v31, %v1414_v28  ;;  %v4057_v49 = vpack.c.bf16 %v1421_v11, %v1417_v9  ;;  %v1510_v46 = vmul.f32 %v5762_v59, %v5955_v29  ;;  %v3991_v19 = vpack.c.bf16 %v1512_v35, %v1508_v53  ;;  %v7943_v9 = vld [vmem:[#allocation39_spill] sm:$0xff]  ;;  %v7944_v30 = vld [vmem:[#allocation29_spill] sm:$0xff] }
 0x3e6   :  { %v1481_v17 = vsel %vm255_vm3, %v7933_v36, %v1453_v26  ;;  %v1477_v54 = vsel %vm255_vm3, %v1453_v26, %v7934_v22  ;;  %v1472_v18 = vsel %vm255_vm3, %v7935_v16, %v1467_v2  ;;  %v1484_v8 = vsel %vm255_vm3, %v1467_v2, %v7932_v34  ;;  %v7946_v2 = vld [vmem:[#allocation20_spill] sm:$0xff]  ;;  %v7947_v26 = vld [vmem:[#allocation27_spill] sm:$0xff] }
 0x3e7   :  { %v1521_v21 = vmul.f32 %v5751_v44, %v1481_v17  ;;  %3988 = vmatpush1.bf16.msra.mxu0 %v3987_v62  ;;  %4058 = vmatprep.subr.bf16.mxu1 %v4057_v49  ;;  %v1476_v44 = vsel %vm255_vm3, %v1451_v12, %v7935_v16  ;;  %v1522_v4 = vmul.f32 %v5762_v59, %v1477_v54  ;;  %v7938_v12 = vld [vmem:[#allocation40_spill] sm:$0xff]  ;;  %v7948_v62 = vld [vmem:[#allocation49_spill] sm:$0xff]  ;;  %v7949_v17 = vld [vmem:[#allocation26_spill] sm:$0xff] }
 0x3e8   :  { %3990 = vmatprep.subr.bf16.mxu0 %v3989_v27  ;;  %v4063_v25 = vpack.c.bf16 %v1514_v10, %v1510_v46  ;;  %v1516_v1 = vmul.f32 %v5765_v14, %v1484_v8  ;;  %v1519_v48 = vmul.f32 %v5776_v7, %v1472_v18  ;;  %v1593_v0 = vsel %vm305_vm4, %v7938_v12, %v7937_v52  ;;  %v7950_v27 = vld [vmem:[#allocation42_spill] sm:$0xff]  ;;  %v7953_v16 = vld [vmem:[#allocation24_spill] sm:$0xff]  ;;  %v7954_v18 = vld [vmem:[#allocation45_spill] sm:$0xff] }
 0x3e9   :  { %v6076_v55 = vpop.permute.xlu0 %1878  ;;  %4060 = vmatpush1.bf16.msra.mxu1 %v4059_v39  ;;  %v1469_v29 = vpop.permute.xlu1 %1468  ;;  %v3993_v63 = vpack.c.bf16 %v1521_v21, %v1517_v13  ;;  %v1518_v51 = vmul.f32 %v5762_v59, %v1476_v44  ;;  %v1588_v31 = vsel %vm305_vm4, %v7939_v56, %v7943_v9  ;;  %v1589_v11 = vsel %vm305_vm4, %v7937_v52, %v7942_v3 }
 0x3ea   :  { %4062 = vmatprep.subr.bf16.mxu1 %v4061_v43  ;;  %v1473_v60 = vsel %vm255_vm3, %v7934_v22, %v1469_v29  ;;  %v1485_v6 = vsel %vm255_vm3, %v1469_v29, %v7933_v36  ;;  %v1695_v34 = vsel %vm355_vm5, %v7945_v33, %v7944_v30  ;;  %v1600_v10 = vsel %vm305_vm4, %v7943_v9, %v7946_v2  ;;  %v7951_v22 = vld [vmem:[#allocation76_spill] sm:$0xff] }
 0x3eb   :  { %v1520_v5 = vmul.f32 %v5765_v14, %v1485_v6  ;;  %v1523_v53 = vmul.f32 %v5776_v7, %v1473_v60  ;;  %3992 = vmatpush1.bf16.msra.mxu0 %v3991_v19  ;;  %v1592_v7 = vsel %vm305_vm4, %v7940_v37, %v7939_v56  ;;  %v7941_v14 = vld [vmem:[#allocation23_spill] sm:$0xff]  ;;  %v4067_v38 = vpack.c.bf16 %v1522_v4, %v1518_v51  ;;  %v7955_v19 = vld [vmem:[#allocation74_spill] sm:$0xff]  ;;  %v7961_v51 = vld [vmem:[#allocation77_spill] sm:$0xff] }
 0x3ec   :  { %3994 = vmatprep.subr.bf16.mxu0 %v3993_v63  ;;  %v1601_v50 = vsel %vm305_vm4, %v7942_v3, %v7941_v14  ;;  %v1631_v35 = vmul.f32 %v5780_v58, %v1593_v0  ;;  %v1703_v49 = vsel %vm355_vm5, %v7948_v62, %v7947_v26  ;;  %v1597_v36 = vsel %vm305_vm4, %v7941_v14, %v7938_v12  ;;  %v7956_v63 = vld [vmem:[#allocation89_spill] sm:$0xff]  ;;  %v7963_v14 = vld [vmem:[#allocation67_spill] sm:$0xff] }
 0x3ed   :  { %v1569_v15 = vpop.permute.xlu0 %1568  ;;  %4064 = vmatpush1.bf16.msra.mxu1 %v4063_v25  ;;  %v6113_v45 = vpop.permute.xlu1 %1880  ;;  %v3995_v59 = vpack.c.bf16 %v1520_v5, %v1516_v1  ;;  %v4065_v28 = vpack.c.bf16 %v1523_v53, %v1519_v48  ;;  %v1694_v39 = vsel %vm355_vm5, %v7950_v27, %v7949_v17  ;;  %v1633_v43 = vmul.f32 %v5810_v41, %v1601_v50  ;;  %v7958_v25 = vld [vmem:[#allocation93_spill] sm:$0xff]  ;;  %v7959_v5 = vld [vmem:[#allocation36_spill] sm:$0xff] }
 0x3ee   :  { %v7952_v54 = vpack.c.bf16 %v5664_v47, %v7951_v22  ;;  %v1627_v21 = vmul.f32 %v5780_v58, %v1592_v7  ;;  %v6150_v46 = vmul.f32 %v5794_v40, %v1589_v11  ;;  %v1702_v8 = vsel %vm355_vm5, %v7954_v18, %v7953_v16  ;;  %v2059_v48 = vld [vmem:[#allocation2 + $0x280] sm:$0xff]  ;;  %v7968_v11 = vld [vmem:[#allocation79_spill] sm:$0xff] }
 0x3ef   :  { %3996 = vmatpush1.bf16.msra.mxu0 %v3995_v59  ;;  %4066 = vmatprep.subr.bf16.mxu1 %v4065_v28  ;;  %v6157_v44 = vmul.f32 %v5831_v32, %v1695_v34  ;;  %v7957_v47 = vpack.c.bf16 %v7955_v19, %v7956_v63  ;;  %v1628_v4 = vmul.f32 %v5794_v40, %v1588_v31  ;;  %v7960_v0 = vld [vmem:[#allocation73_spill] sm:$0xff]  ;;  %v7964_v59 = vld [vmem:[#allocation82_spill] sm:$0xff]  ;;  %v7967_v31 = vld [vmem:[#allocation75_spill] sm:$0xff] }
 0x3f0   :  { %3998 = vmatprep.subr.bf16.mxu0 %v7952_v54  ;;  %v1629_v60 = vmul.f32 %v5810_v41, %v1600_v10  ;;  %v1699_v6 = vsel %vm355_vm5, %v7947_v26, %v7945_v33  ;;  %v6171_v1 = vmul.f32 %v7958_v25, %v1703_v49  ;;  %v1630_v53 = vmul.f32 %v7959_v5, %v1597_v36  ;;  %v7965_v28 = vld [vmem:[#allocation78_spill] sm:$0xff]  ;;  %v7970_v34 = vld [vmem:[#allocation41_spill] sm:$0xff]  ;;  %v7971_v10 = vld [vmem:[#allocation88_spill] sm:$0xff] }
 0x3f1   :  { %v1585_v13 = vpop.permute.xlu0 %1584  ;;  %4068 = vmatpush1.bf16.msra.mxu1 %v4067_v38  ;;  %v6159_v29 = vpop.permute.xlu1 %1888  ;;  %v6175_v52 = vmul.f32 %v5831_v32, %v1694_v39  ;;  %v1691_v12 = vsel %vm355_vm5, %v7944_v30, %v7948_v62  ;;  %v7962_v56 = vpack.c.bf16 %v7960_v0, %v7961_v51  ;;  %v4005_v37 = vpack.c.bf16 %v1631_v35, %v1627_v21  ;;  %v7972_v35 = vld [vmem:[#allocation87_spill] sm:$0xff]  ;;  %v6205_v17 = vld [vmem:[#allocation2 + $0x300] sm:$0xff] }
 0x3f2   :  { %4070 = vmatprep.subr.bf16.mxu1 %v7957_v47  ;;  %v6185_v7 = vmul.f32 %v7958_v25, %v1702_v8  ;;  %v1594_v3 = vsel %vm305_vm4, %v1569_v15, %v7963_v14  ;;  %v7966_v9 = vpack.c.bf16 %v7964_v59, %v7965_v28  ;;  %v7969_v30 = vpack.c.bf16 %v7967_v31, %v7968_v11  ;;  %v7974_v27 = vld [vmem:[#allocation44_spill] sm:$0xff]  ;;  %v7987_v51 = vld [vmem:[#allocation53_spill] sm:$0xff]  ;;  %v7989_v59 = vld [vmem:[#allocation94_spill] sm:$0xff] }
 0x3f3   :  { %4000 = vmatpush1.bf16.msra.mxu0 %v7962_v56  ;;  %v4077_v33 = vpack.c.bf16 %v1633_v43, %v1629_v60  ;;  %v6197_v38 = vmul.f32 %v7970_v34, %v1699_v6  ;;  %v7973_v26 = vpack.c.bf16 %v7971_v10, %v7972_v35  ;;  %v4007_v62 = vpack.c.bf16 %v1630_v53, %v2059_v48  ;;  %v7975_v43 = vld [vmem:[#allocation70_spill] sm:$0xff]  ;;  %v7976_v54 = vld [vmem:[#allocation68_spill] sm:$0xff]  ;;  %v7990_v10 = vld [vmem:[#allocation47_spill] sm:$0xff] }
 0x3f4   :  { %4002 = vmatprep.subr.bf16.mxu0 %v7966_v9  ;;  %v4079_v49 = vpack.c.bf16 %v6150_v46, %v1628_v4  ;;  %v4013_v36 = vpack.c.bf16 %v6157_v44, %v6175_v52  ;;  %v6208_v39 = vmul.f32 %v7974_v27, %v1691_v12  ;;  %v4085_v16 = vpack.c.bf16 %v6171_v1, %v6185_v7  ;;  %v7977_v46 = vld [vmem:[#allocation28_spill] sm:$0xff]  ;;  %v7979_v44 = vld [vmem:[#allocation65_spill] sm:$0xff]  ;;  %v7980_v4 = vld [vmem:[#allocation83_spill] sm:$0xff] }
 0x3f5   :  { %v1671_v50 = vpop.permute.xlu0 %1670  ;;  %4072 = vmatpush1.bf16.msra.mxu1 %v7969_v30  ;;  %v1571_v2 = vpop.permute.xlu1 %1570  ;;  %v7978_v18 = vld [vmem:[#allocation52_spill] sm:$0xff]  ;;  %v1598_v19 = vsel %vm305_vm4, %v7979_v44, %v1569_v15  ;;  %v1635_v63 = vmul.f32 %v5780_v58, %v1594_v3  ;;  %v1590_v1 = vsel %vm305_vm4, %v7963_v14, %v1585_v13  ;;  %v1602_v48 = vsel %vm305_vm4, %v1585_v13, %v7979_v44  ;;  %v7984_v15 = vld [vmem:[#allocation81_spill] sm:$0xff]  ;;  %v7988_v7 = vld [vmem:[#allocation30_spill] sm:$0xff] }
 0x3f6   :  { %4074 = vmatprep.subr.bf16.mxu1 %v7973_v26  ;;  %v1595_v22 = vsel %vm305_vm4, %v1571_v2, %v7975_v43  ;;  %v1599_v21 = vsel %vm305_vm4, %v7976_v54, %v1571_v2  ;;  %v1804_v8 = vsel %vm405_vm6, %v7978_v18, %v7977_v46  ;;  %v7981_v60 = vld [vmem:[#allocation80_spill] sm:$0xff]  ;;  %v1801_v14 = vsel %vm405_vm6, %v7988_v7, %v7987_v51  ;;  %v2077_v18 = vld [vmem:[#allocation2 + $0x310] sm:$0xff]  ;;  %v7994_v44 = vld [vmem:[#allocation69_spill] sm:$0xff] }
 0x3f7   :  { %v1639_v47 = vmul.f32 %v5780_v58, %v1595_v22  ;;  %v7982_v6 = vpack.c.bf16 %v7980_v4, %v7981_v60  ;;  %v7983_v52 = vld [vmem:[#allocation84_spill] sm:$0xff]  ;;  %v4015_v58 = vpack.c.bf16 %v6197_v38, %v6205_v17  ;;  %v1638_v13 = vmul.f32 %v7959_v5, %v1599_v21  ;;  %v7992_v17 = vld [vmem:[#allocation71_spill] sm:$0xff]  ;;  %v2092_v60 = vld [vmem:[#allocation2 + $0x388] sm:$0xff] }
 0x3f8   :  { %v7985_v12 = vpack.c.bf16 %v7983_v52, %v7984_v15  ;;  %v7986_v0 = vld [vmem:[#allocation32_spill] sm:$0xff]  ;;  %v6251_v28 = vmul.f32 %v7989_v59, %v1804_v8  ;;  %v1634_v9 = vmul.f32 %v7959_v5, %v1598_v19  ;;  %v1636_v30 = vmul.f32 %v5794_v40, %v1590_v1 }
 0x3f9   :  { %4004 = vmatpush1.bf16.msra.mxu0 %v7982_v6  ;;  %v1687_v53 = vpop.permute.xlu0 %1686  ;;  %v1797_v56 = vsel %vm405_vm6, %v7987_v51, %v7986_v0  ;;  %v4009_v3 = vpack.c.bf16 %v1639_v47, %v1635_v63  ;;  %v1637_v38 = vmul.f32 %v5810_v41, %v1602_v48  ;;  %v6265_v35 = vmul.f32 %v7990_v10, %v1801_v14  ;;  %v7991_v5 = vld [vmem:[#allocation48_spill] sm:$0xff] }
 0x3fa   :  { %4006 = vmatprep.subr.bf16.mxu0 %v4005_v37  ;;  %4076 = vmatpush1.bf16.msra.mxu1 %v7985_v12  ;;  %v1587_v37 = vpop.permute.xlu1 %1586  ;;  %v6268_v26 = vmul.f32 %v7991_v5, %v1797_v56  ;;  %v1700_v19 = vsel %vm355_vm5, %v7994_v44, %v1671_v50  ;;  %v7996_v47 = vld [vmem:[#allocation72_spill] sm:$0xff]  ;;  %v1692_v1 = vsel %vm355_vm5, %v7992_v17, %v1687_v53 }
 0x3fb   :  { %4078 = vmatprep.subr.bf16.mxu1 %v4077_v33  ;;  %v1591_v31 = vsel %vm305_vm4, %v7975_v43, %v1587_v37  ;;  %v1603_v11 = vsel %vm305_vm4, %v1587_v37, %v7976_v54  ;;  %v1696_v43 = vsel %vm355_vm5, %v1671_v50, %v7992_v17  ;;  %v7993_v54 = vld [vmem:[#allocation56_spill] sm:$0xff]  ;;  %v1704_v52 = vsel %vm355_vm5, %v1687_v53, %v7994_v44  ;;  %v2093_v37 = vld [vmem:[#allocation2 + $0x390] sm:$0xff] }
 0x3fc   :  { %v1640_v33 = vmul.f32 %v5794_v40, %v1591_v31  ;;  %v1641_v2 = vmul.f32 %v5810_v41, %v1603_v11  ;;  %v1805_v40 = vsel %vm405_vm6, %v7993_v54, %v7988_v7  ;;  %v1793_v8 = vsel %vm405_vm6, %v7986_v0, %v7993_v54  ;;  %v7997_v0 = vld [vmem:[#allocation50_spill] sm:$0xff] }
 0x3fd   :  { %4008 = vmatpush1.bf16.msra.mxu0 %v4007_v62  ;;  %v1773_v22 = vpop.permute.xlu0 %1772  ;;  %v4011_v62 = vpack.c.bf16 %v1638_v13, %v1634_v9  ;;  %v1737_v6 = vmul.f32 %v5831_v32, %v1696_v43  ;;  %v1837_v50 = vmul.f32 %v7989_v59, %v1805_v40  ;;  %v4087_v12 = vpack.c.bf16 %v6208_v39, %v2077_v18  ;;  %v2091_v13 = vld [vmem:[#allocation2 + $0x380] sm:$0xff] }
 0x3fe   :  { %4010 = vmatprep.subr.bf16.mxu0 %v4009_v3  ;;  %4080 = vmatpush1.bf16.msra.mxu1 %v4079_v49  ;;  %v1673_v41 = vpop.permute.xlu1 %1672  ;;  %v4081_v21 = vpack.c.bf16 %v1641_v2, %v1637_v38  ;;  %v4083_v46 = vpack.c.bf16 %v1640_v33, %v1636_v30  ;;  %v7995_v49 = vld [vmem:[#allocation86_spill] sm:$0xff]  ;;  %v6301_v51 = vmul.f32 %v7997_v0, %v1793_v8  ;;  %v8003_v8 = vld [vmem:[#allocation55_spill] sm:$0xff] }
 0x3ff   :  { %v1697_v63 = vsel %vm355_vm5, %v1673_v41, %v7995_v49  ;;  %v1701_v4 = vsel %vm355_vm5, %v7996_v47, %v1673_v41  ;;  %v4021_v14 = vpack.c.bf16 %v6268_v26, %v2092_v60  ;;  %v1736_v3 = vmul.f32 %v7970_v34, %v1700_v19  ;;  %v7999_v26 = vld [vmem:[#allocation57_spill] sm:$0xff] }
 0x400   :  { %v1741_v48 = vmul.f32 %v5831_v32, %v1697_v63  ;;  %4082 = vmatprep.subr.bf16.mxu1 %v4081_v21  ;;  %v1740_v56 = vmul.f32 %v7970_v34, %v1701_v4  ;;  %v1738_v53 = vmul.f32 %v7974_v27, %v1692_v1  ;;  %v1739_v9 = vmul.f32 %v7958_v25, %v1704_v52  ;;  %v8005_v4 = vld [vmem:[#allocation33_spill] sm:$0xff] }
 0x401   :  { %4012 = vmatpush1.bf16.msra.mxu0 %v4011_v62  ;;  %v1789_v15 = vpop.permute.xlu0 %1788  ;;  %v4093_v38 = vpack.c.bf16 %v1837_v50, %v6251_v28  ;;  %v4023_v33 = vpack.c.bf16 %v6265_v35, %v2091_v13  ;;  %v4095_v2 = vpack.c.bf16 %v6301_v51, %v2093_v37  ;;  %v1899_v17 = vsel %vm455_vm7, %v7999_v26, %v6113_v45  ;;  %v8001_v28 = vld [vmem:[#allocation92_spill] sm:$0xff]  ;;  %v8002_v62 = vld [vmem:[#allocation91_spill] sm:$0xff] }
 0x402   :  { %4014 = vmatprep.subr.bf16.mxu0 %v4013_v36  ;;  %4084 = vmatpush1.bf16.msra.mxu1 %v4083_v46  ;;  %v1689_v7 = vpop.permute.xlu1 %1688  ;;  %v4017_v32 = vpack.c.bf16 %v1741_v48, %v1737_v6  ;;  %v4019_v54 = vpack.c.bf16 %v1740_v56, %v1736_v3  ;;  %v1898_v44 = vsel %vm455_vm7, %v8003_v8, %v6076_v55 }
 0x403   :  { %4086 = vmatprep.subr.bf16.mxu1 %v4085_v16  ;;  %v1693_v36 = vsel %vm355_vm5, %v7995_v49, %v1689_v7  ;;  %v1705_v39 = vsel %vm355_vm5, %v1689_v7, %v7996_v47  ;;  %v7998_v16 = vld [vmem:[#allocation90_spill] sm:$0xff]  ;;  %v1937_v19 = vmul.f32 %v6083_v42, %v1899_v17  ;;  %v8004_v49 = vld [vmem:[#allocation31_spill] sm:$0xff]  ;;  %v1895_v37 = vsel %vm455_vm7, %v6113_v45, %v6159_v29  ;;  %v2107_v45 = vld [vmem:[#allocation2 + $0x400] sm:$0xff] }
 0x404   :  { %v1798_v31 = vsel %vm405_vm6, %v1773_v22, %v7998_v16  ;;  %v1742_v11 = vmul.f32 %v7974_v27, %v1693_v36  ;;  %v1743_v34 = vmul.f32 %v7958_v25, %v1705_v39  ;;  %v8000_v25 = vld [vmem:[#allocation85_spill] sm:$0xff]  ;;  %v1794_v46 = vsel %vm405_vm6, %v7998_v16, %v1789_v15  ;;  %v1970_v17 = vld [vmem:[#allocation11 + $0x18] sm:$0xff] }
 0x405   :  { %4016 = vmatpush1.bf16.msra.mxu0 %v4015_v58  ;;  %v1887_v30 = vpop.permute.xlu0 %1886  ;;  %v1802_v58 = vsel %vm405_vm6, %v8000_v25, %v1773_v22  ;;  %v1839_v41 = vmul.f32 %v7991_v5, %v1798_v31  ;;  %v1806_v18 = vsel %vm405_vm6, %v1789_v15, %v8000_v25  ;;  %v1840_v50 = vmul.f32 %v7997_v0, %v1794_v46  ;;  %v2111_v16 = vld [vmem:[#allocation2 + $0x420] sm:$0xff]  ;;  %v1967_v31 = vld [vmem:[#allocation11] sm:$0xff] }
 0x406   :  { %4018 = vmatprep.subr.bf16.mxu0 %v4017_v32  ;;  %4088 = vmatpush1.bf16.msra.mxu1 %v4087_v12  ;;  %v1775_v43 = vpop.permute.xlu1 %1774  ;;  %v4089_v27 = vpack.c.bf16 %v1743_v34, %v1739_v9  ;;  %v4091_v40 = vpack.c.bf16 %v1742_v11, %v1738_v53  ;;  %v1906_v63 = vsel %vm455_vm7, %v1887_v30, %v8004_v49  ;;  %v1973_v46 = vld [vmem:[#allocation11 + $0x30] sm:$0xff] }
 0x407   :  { %v1799_v35 = vsel %vm405_vm6, %v1775_v43, %v8001_v28  ;;  %v1803_v21 = vsel %vm405_vm6, %v8002_v62, %v1775_v43  ;;  %v1838_v60 = vmul.f32 %v7990_v10, %v1802_v58  ;;  %v1841_v52 = vmul.f32 %v7989_v59, %v1806_v18 }
 0x408   :  { %v1843_v22 = vmul.f32 %v7991_v5, %v1799_v35  ;;  %4090 = vmatprep.subr.bf16.mxu1 %v4089_v27  ;;  %v1907_v5 = vsel %vm455_vm7, %v6159_v29, %v8005_v4  ;;  %v1842_v6 = vmul.f32 %v7990_v10, %v1803_v21  ;;  %v1894_v51 = vsel %vm455_vm7, %v6076_v55, %v1887_v30 }
 0x409   :  { %4020 = vmatpush1.bf16.msra.mxu0 %v4019_v54  ;;  %v6351_v47 = vpop.permute.xlu0 %1866  ;;  %v1935_v10 = vmul.f32 %v6103_v61, %v1906_v63  ;;  %v1933_v32 = vmul.f32 %v6083_v42, %v1898_v44  ;;  %v1939_v55 = vmul.f32 %v6103_v61, %v1907_v5  ;;  %v4031_v30 = vpack.c.bf16 %v2111_v16, %v2107_v45  ;;  %v1974_v54 = vld [vmem:[#allocation11 + $0x38] sm:$0xff] }
 0x40a   :  { %4022 = vmatprep.subr.bf16.mxu0 %v4021_v14  ;;  %4092 = vmatpush1.bf16.msra.mxu1 %v4091_v40  ;;  %v1791_v1 = vpop.permute.xlu1 %1790  ;;  %v4025_v48 = vpack.c.bf16 %v1843_v22, %v1839_v41  ;;  %v8006_v14 = vld [vmem:[#allocation18_spill] sm:$0xff]  ;;  %v1977_v22 = vld [vmem:[#allocation11 + $0x50] sm:$0xff] }
 0x40b   :  { %4094 = vmatprep.subr.bf16.mxu1 %v4093_v38  ;;  %v1795_v15 = vsel %vm405_vm6, %v8001_v28, %v1791_v1  ;;  %v1807_v12 = vsel %vm405_vm6, %v1791_v1, %v8002_v62  ;;  %v1923_v13 = vrot.slane %v7936_v57, %v8006_v14  ;;  %v4029_v9 = vpack.c.bf16 %v1937_v19, %v1933_v32  ;;  %v1971_v38 = vld [vmem:[#allocation11 + $0x20] sm:$0xff]  ;;  %v8007_v40 = vld [vmem:[#allocation54_spill] sm:$0xff] }
 0x40c   :  { %v1844_v56 = vmul.f32 %v7997_v0, %v1795_v15  ;;  %v1845_v7 = vmul.f32 %v7989_v59, %v1807_v12  ;;  %v4027_v0 = vpack.c.bf16 %v1842_v6, %v1838_v60  ;;  %v4101_v57 = vpack.c.bf16 %v1939_v55, %v1935_v10  ;;  %v1969_v12 = vld [vmem:[#allocation11 + $0x10] sm:$0xff]  ;;  %v1975_v10 = vld [vmem:[#allocation11 + $0x40] sm:$0xff] }
 0x40d   :  { %4024 = vmatpush1.bf16.msra.mxu0 %v4023_v33  ;;  %v1875_v3 = vpop.permute.xlu0 %1874  ;;  %v1934_v39 = vmul.f32 %v1923_v13, %v1894_v51  ;;  %v1938_v11 = vmul.f32 %v1923_v13, %v1895_v37  ;;  %v8008_v15 = vmov 0.0   ;;  %v1972_v51 = vld [vmem:[#allocation11 + $0x28] sm:$0xff] }
 0x40e   :  { %4026 = vmatprep.subr.bf16.mxu0 %v4025_v48  ;;  %4096 = vmatpush1.bf16.msra.mxu1 %v4095_v2  ;;  %v1869_v53 = vpop.permute.xlu1 %1868  ;;  %v4097_v36 = vpack.c.bf16 %v1845_v7, %v1841_v52  ;;  %v4099_v59 = vpack.c.bf16 %v1844_v56, %v1840_v50  ;;  %v1904_v2 = vsel %vm455_vm7, %v6351_v47, %v1875_v3  ;;  %v2123_v50 = vld [vmem:[#allocation2 + $0x480] sm:$0x1]  ;;  %v2126_v52 = vld [vmem:[#allocation2 + $0x498] sm:$0x1]  ;;  %v1978_v56 = vld [vmem:[#allocation11 + $0x58] sm:$0xff] }
 0x40f   :  { %v4103_v33 = vpack.c.bf16 %v1938_v11, %v1934_v39  ;;  %v1940_v25 = vmul.f32 %v8007_v40, %v1904_v2 }
 0x410   :  { %4098 = vmatprep.subr.bf16.mxu1 %v4097_v36 }
 0x411   :  { %4028 = vmatpush1.bf16.msra.mxu0 %v4027_v0  ;;  %v1883_v34 = vpop.permute.xlu0 %1882 }
 0x412   :  { %4030 = vmatprep.subr.bf16.mxu0 %v4029_v9  ;;  %4100 = vmatpush1.bf16.msra.mxu1 %v4099_v59  ;;  %v1885_v29 = vpop.permute.xlu1 %1884  ;;  %v1900_v26 = vsel %vm455_vm7, %v1875_v3, %v1883_v34 }
 0x413   :  { %4102 = vmatprep.subr.bf16.mxu1 %v4101_v57  ;;  %v1941_v58 = vmul.f32 %v6083_v42, %v1900_v26 }
 0x414   :  { %2217 = vmatmul.mubr.f32.vlgmr.msra.gmra.mrb[8].mxu0 %v1967_v31 }
 0x415   :  { %4032 = vmatpush1.bf16.msra.mxu0 %v4031_v30  ;;  %2395 = vmatmul.mubr.f32.vlgmr.msra.gmra.mrb[8].mxu1 %v1967_v31  ;;  %v1891_v43 = vpop.permute.xlu0 %1890 }
 0x416   :  { %4104 = vmatpush1.bf16.msra.mxu1 %v4103_v33  ;;  %2222 = vmatprep.mubr.f32.mxu0 %v1971_v38  ;;  %v1877_v27 = vpop.permute.xlu1 %1876  ;;  %v1896_v35 = vsel %vm455_vm7, %v1883_v34, %v1891_v43  ;;  %v1908_v18 = vsel %vm455_vm7, %v1891_v43, %v6351_v47  ;;  %v1976_v47 = vld [vmem:[#allocation11 + $0x48] sm:$0xff] }
 0x417   :  { %2400 = vmatprep.mubr.f32.mxu1 %v1971_v38  ;;  %v1901_v41 = vsel %vm455_vm7, %v1877_v27, %v1885_v29  ;;  %v1905_v28 = vsel %vm455_vm7, %v1869_v53, %v1877_v27  ;;  %v1942_v49 = vmul.f32 %v1923_v13, %v1896_v35  ;;  %v1943_v5 = vmul.f32 %v6103_v61, %v1908_v18 }
 0x418   :  { %2223 = vmatmul.mubr.f32.gmra.mrb[10].mxu0 %v1970_v17  ;;  %v1944_v62 = vmul.f32 %v8007_v40, %v1905_v28  ;;  %v1945_v21 = vmul.f32 %v6083_v42, %v1901_v41  ;;  %v2124_v42 = vld [vmem:[#allocation2 + $0x488] sm:$0x1] }
 0x419   :  { %2228 = vmatprep.mubr.f32.mxu0 %v1974_v54  ;;  %2401 = vmatmul.mubr.f32.gmra.mrb[10].mxu1 %v1970_v17 }
 0x41a   :  { %2406 = vmatprep.mubr.f32.mxu1 %v1974_v54  ;;  %v1893_v8 = vpop.permute.xlu1 %1892  ;;  %v4033_v44 = vpack.c.bf16 %v1945_v21, %v1941_v58  ;;  %v4035_v19 = vpack.c.bf16 %v1944_v62, %v1940_v25 }
 0x41b   :  { %v1897_v63 = vsel %vm455_vm7, %v1885_v29, %v1893_v8  ;;  %v1909_v4 = vsel %vm455_vm7, %v1893_v8, %v1869_v53 }
 0x41c   :  { %2229 = vmatmul.mubr.f32.gmra.mrb[12].mxu0 %v1973_v46  ;;  %v1946_v60 = vmul.f32 %v1923_v13, %v1897_v63  ;;  %v1947_v6 = vmul.f32 %v6103_v61, %v1909_v4  ;;  %4034 = vmatprep.subr.bf16.mxu0 %v4033_v44  ;;  %v2125_v61 = vld [vmem:[#allocation2 + $0x490] sm:$0x1] }
 0x41d   :  { %2234 = vmatprep.mubr.f32.mxu0 %v1977_v22  ;;  %4036 = vmatpush1.bf16.msra.mxu0 %v4035_v19 }
 0x41e   :  { %2407 = vmatmul.mubr.f32.gmra.mrb[12].mxu1 %v1973_v46  ;;  %v4105_v1 = vpack.c.bf16 %v1947_v6, %v1943_v5  ;;  %3903 = vmatprep.subr.msk.mxu0 %vm925_vm13, %v2124_v42  ;;  %v4107_v48 = vpack.c.bf16 %v1946_v60, %v1942_v49 }
 0x41f   :  { %2412 = vmatprep.mubr.f32.mxu1 %v1977_v22 }
 0x420   :  { %2235 = vmatmul.mubr.f32.gmra.mrb[14].mxu0 %v1976_v47  ;;  %4106 = vmatprep.subr.bf16.mxu1 %v4105_v1 }
 0x421   :  { %2305 = vmatprep.mubr.f32.mxu0 %v8008_v15  ;;  %4108 = vmatpush1.bf16.msra.mxu1 %v4107_v48 }
 0x422   :  { %3904 = vmatpush1.msk.msra.mxu0 %vm925_vm13, %v2123_v50  ;;  %2413 = vmatmul.mubr.f32.gmra.mrb[14].mxu1 %v1976_v47 }
 0x423   :  { %3909 = vmatprep.subr.msk.mxu1 %vm925_vm13, %v2126_v52  ;;  %2483 = vmatprep.mubr.f32.mxu1 %v8008_v15 }
 0x424   :  { %3905 = vmatmul.mubr.msk.f32.vlgmr.msra.gmra.mrb[8].mxu0 %vm2127_vm8, %v1969_v12 }
 0x425   :  { %2311 = vmatprep.mubr.f32.mxu0 %v8008_v15  ;;  %3910 = vmatpush1.msk.msra.mxu1 %vm925_vm13, %v2125_v61 }
 0x426   :  { %3911 = vmatmul.mubr.msk.f32.vlgmr.msra.gmra.mrb[8].mxu1 %vm2127_vm8, %v1969_v12 }
 0x427   :  { %2489 = vmatprep.mubr.f32.mxu1 %v8008_v15 }
 0x428   :  { %3906 = vmatmul.mubr.msk.f32.gmra.mrb[10].mxu0 %vm2127_vm8, %v1972_v51 }
 0x429   :  { %2317 = vmatprep.mubr.f32.mxu0 %v8008_v15 }
 0x42a   :  { %3912 = vmatmul.mubr.msk.f32.gmra.mrb[10].mxu1 %vm2127_vm8, %v1972_v51 }
 0x42b   :  { %2495 = vmatprep.mubr.f32.mxu1 %v8008_v15 }
 0x42c   :  { %3907 = vmatmul.mubr.msk.f32.gmra.mrb[12].mxu0 %vm2127_vm8, %v1975_v10 }
 0x42d   :  { %2323 = vmatprep.mubr.f32.mxu0 %v8008_v15 }
 0x42e   :  { %3913 = vmatmul.mubr.msk.f32.gmra.mrb[12].mxu1 %vm2127_vm8, %v1975_v10 }
 0x42f   :  { %2501 = vmatprep.mubr.f32.mxu1 %v8008_v15 }
 0x430   :  { %3908 = vmatmul.mubr.msk.f32.gmra.mrb[14].mxu0 %vm2127_vm8, %v1978_v56 }
 0x432   :  { %3914 = vmatmul.mubr.msk.f32.gmra.mrb[14].mxu1 %vm2127_vm8, %v1978_v56 }
 0x4f7   :  { %v2307_v7 = vpop.f32.mrb[8].mxu0 }
 0x4f8   :  { %v6425_v32 = vmax.f32 %v2307_v7, 0.0  ;;  %v2309_v13 = vpop.f32.mrb[9].mxu0 }
 0x4f9   :  { %v6427_v37 = vmax.f32 %v2309_v13, 0.0  ;;  %v2485_v3 = vpop.f32.mrb[8].mxu1  ;;  %v2572_v13 = vld [vmem:[#allocation8] ss:$8 sm:$0xf] }
 0x4fa   :  { %2932 = vst [vmem:[#allocation2 + $0x200] sm:$0xff] %v6425_v32  ;;  %2524 = vrot.lane.b32.xlu0 %v6425_v32, %s4478_s24  ;;  %v6433_v55 = vmax.f32 %v2485_v3, 0.0  ;;  %v2487_v0 = vpop.f32.mrb[9].mxu1 }
 0x4fb   :  { %2933 = vst [vmem:[#allocation2 + $0x208] sm:$0xff] %v6427_v37  ;;  %v2313_v53 = vpop.f32.mrb[10].mxu0  ;;  %v6437_v59 = vmax.f32 %v2487_v0, 0.0 }
 0x4fc   :  { %v6435_v36 = vmax.f32 %v2313_v53, 0.0  ;;  %v2315_v39 = vpop.f32.mrb[11].mxu0  ;;  %2934 = vst [vmem:[#allocation2 + $0x210] sm:$0xff] %v6433_v55  ;;  %v6706_v53 = vrot.slane %v2572_v13, %v8006_v14 }
 0x4fd   :  { %v6440_v9 = vmax.f32 %v2315_v39, 0.0  ;;  %2935 = vst [vmem:[#allocation2 + $0x218] sm:$0xff] %v6437_v59  ;;  %v2491_v16 = vpop.f32.mrb[10].mxu1 }
 0x4fe   :  { %2936 = vst [vmem:[#allocation2 + $0x220] sm:$0xff] %v6435_v36  ;;  %2526 = vrot.lane.b32.xlu1 %v6435_v36, %s4478_s24  ;;  %2540 = vrot.lane.b32.xlu0 %v6433_v55, %s4478_s24  ;;  %v2514_v57 = vmax.f32 %v2491_v16, 0.0  ;;  %v2493_v11 = vpop.f32.mrb[11].mxu1  ;;  %8011 = vst [vmem:[#allocation21_spill] sm:$0xff] %v6706_v53 }
 0x4ff   :  { %2937 = vst [vmem:[#allocation2 + $0x228] sm:$0xff] %v6440_v9  ;;  %v2319_v31 = vpop.f32.mrb[12].mxu0  ;;  %v6451_v45 = vmax.f32 %v2493_v11, 0.0 }
 0x500   :  { %v6449_v34 = vmax.f32 %v2319_v31, 0.0  ;;  %v2321_v29 = vpop.f32.mrb[13].mxu0  ;;  %2938 = vst [vmem:[#allocation2 + $0x230] sm:$0xff] %v2514_v57 }
 0x501   :  { %v6453_v30 = vmax.f32 %v2321_v29, 0.0  ;;  %2939 = vst [vmem:[#allocation2 + $0x238] sm:$0xff] %v6451_v45  ;;  %v2497_v38 = vpop.f32.mrb[12].mxu1 }
 0x502   :  { %2940 = vst [vmem:[#allocation2 + $0x240] sm:$0xff] %v6449_v34  ;;  %2626 = vrot.lane.b32.xlu0 %v6425_v32, %s4479_s4  ;;  %2542 = vrot.lane.b32.xlu1 %v2514_v57, %s4478_s24  ;;  %v6461_v33 = vmax.f32 %v2497_v38, 0.0  ;;  %v2499_v26 = vpop.f32.mrb[13].mxu1 }
 0x503   :  { %2941 = vst [vmem:[#allocation2 + $0x248] sm:$0xff] %v6453_v30  ;;  %v2325_v2 = vpop.f32.mrb[14].mxu0  ;;  %v6465_v43 = vmax.f32 %v2499_v26, 0.0 }
 0x504   :  { %8009 = vst [vmem:[#allocation34_spill] sm:$0xff] %v6461_v33  ;;  %v6463_v17 = vmax.f32 %v2325_v2, 0.0  ;;  %v2327_v54 = vpop.f32.mrb[15].mxu0  ;;  %2942 = vst [vmem:[#allocation2 + $0x250] sm:$0xff] %v6461_v33 }
 0x505   :  { %v6468_v27 = vmax.f32 %v2327_v54, 0.0  ;;  %2943 = vst [vmem:[#allocation2 + $0x258] sm:$0xff] %v6465_v43  ;;  %v2503_v40 = vpop.f32.mrb[14].mxu1 }
 0x506   :  { %2944 = vst [vmem:[#allocation2 + $0x260] sm:$0xff] %v6463_v17  ;;  %2642 = vrot.lane.b32.xlu0 %v6433_v55, %s4479_s4  ;;  %2628 = vrot.lane.b32.xlu1 %v6435_v36, %s4479_s4  ;;  %v6477_v25 = vmax.f32 %v2503_v40, 0.0  ;;  %v2505_v58 = vpop.f32.mrb[15].mxu1 }
 0x507   :  { %2945 = vst [vmem:[#allocation2 + $0x268] sm:$0xff] %v6468_v27  ;;  %v6479_v41 = vmax.f32 %v2505_v58, 0.0 }
 0x508   :  { %2946 = vst [vmem:[#allocation2 + $0x270] sm:$0xff] %v6477_v25 }
 0x509   :  { %2947 = vst [vmem:[#allocation2 + $0x278] sm:$0xff] %v6479_v41 }
 0x50a   :  { %2728 = vrot.lane.b32.xlu0 %v6425_v32, %s4480_s10  ;;  %2644 = vrot.lane.b32.xlu1 %v2514_v57, %s4479_s4 }
 0x50e   :  { %2744 = vrot.lane.b32.xlu0 %v6433_v55, %s4480_s10  ;;  %2730 = vrot.lane.b32.xlu1 %v6435_v36, %s4480_s10 }
 0x512   :  { %2830 = vrot.lane.b32.xlu0 %v6425_v32, %s4481_s11  ;;  %2746 = vrot.lane.b32.xlu1 %v2514_v57, %s4480_s10 }
 0x516   :  { %2846 = vrot.lane.b32.xlu0 %v6433_v55, %s4481_s11  ;;  %2832 = vrot.lane.b32.xlu1 %v6435_v36, %s4481_s11 }
 0x51a   :  { %2948 = vrot.lane.b32.xlu0 %v6425_v32, %s4482_s12  ;;  %2848 = vrot.lane.b32.xlu1 %v2514_v57, %s4481_s11 }
 0x51e   :  { %2964 = vrot.lane.b32.xlu0 %v6433_v55, %s4482_s12  ;;  %2950 = vrot.lane.b32.xlu1 %v6435_v36, %s4482_s12 }
 0x522   :  { %3050 = vrot.lane.b32.xlu0 %v6425_v32, %s4483_s13  ;;  %2966 = vrot.lane.b32.xlu1 %v2514_v57, %s4482_s12 }
 0x526   :  { %3066 = vrot.lane.b32.xlu0 %v6433_v55, %s4483_s13  ;;  %3052 = vrot.lane.b32.xlu1 %v6435_v36, %s4483_s13 }
 0x52a   :  { %3152 = vrot.lane.b32.xlu0 %v6425_v32, %s4484_s14  ;;  %3068 = vrot.lane.b32.xlu1 %v2514_v57, %s4483_s13 }
 0x52e   :  { %3168 = vrot.lane.b32.xlu0 %v6433_v55, %s4484_s14  ;;  %3154 = vrot.lane.b32.xlu1 %v6435_v36, %s4484_s14 }
 0x532   :  { %3254 = vrot.lane.b32.xlu0 %v6425_v32, %s4485_s15  ;;  %3170 = vrot.lane.b32.xlu1 %v2514_v57, %s4484_s14 }
 0x536   :  { %3270 = vrot.lane.b32.xlu0 %v6433_v55, %s4485_s15  ;;  %3256 = vrot.lane.b32.xlu1 %v6435_v36, %s4485_s15  ;;  %v6703_v55 = vrot.slane %v2572_v13, %v4699_v24 }
 0x538   :  { %8010 = vst [vmem:[#allocation58_spill] sm:$0xff] %v6703_v55 }
 0x53a   :  { %2532 = vrot.lane.b32.xlu0 %v6427_v37, %s4478_s24  ;;  %3272 = vrot.lane.b32.xlu1 %v2514_v57, %s4485_s15  ;;  %v2674_v57 = vld [vmem:[#allocation8 + $0x1] ss:$8 sm:$0xf] }
 0x53b   :  { %v6731_v2 = vrot.slane %v2674_v57, %v4699_v24  ;;  %v6734_v26 = vrot.slane %v2674_v57, %v8006_v14 }
 0x53e   :  { %2548 = vrot.lane.b32.xlu0 %v6437_v59, %s4478_s24  ;;  %2534 = vrot.lane.b32.xlu1 %v6440_v9, %s4478_s24 }
 0x542   :  { %2634 = vrot.lane.b32.xlu0 %v6427_v37, %s4479_s4  ;;  %2550 = vrot.lane.b32.xlu1 %v6451_v45, %s4478_s24 }
 0x546   :  { %2650 = vrot.lane.b32.xlu0 %v6437_v59, %s4479_s4  ;;  %2636 = vrot.lane.b32.xlu1 %v6440_v9, %s4479_s4 }
 0x54a   :  { %2736 = vrot.lane.b32.xlu0 %v6427_v37, %s4480_s10  ;;  %2652 = vrot.lane.b32.xlu1 %v6451_v45, %s4479_s4 }
 0x54e   :  { %2752 = vrot.lane.b32.xlu0 %v6437_v59, %s4480_s10  ;;  %2738 = vrot.lane.b32.xlu1 %v6440_v9, %s4480_s10 }
 0x552   :  { %2838 = vrot.lane.b32.xlu0 %v6427_v37, %s4481_s11  ;;  %2754 = vrot.lane.b32.xlu1 %v6451_v45, %s4480_s10 }
 0x556   :  { %2854 = vrot.lane.b32.xlu0 %v6437_v59, %s4481_s11  ;;  %2840 = vrot.lane.b32.xlu1 %v6440_v9, %s4481_s11 }
 0x55a   :  { %2956 = vrot.lane.b32.xlu0 %v6427_v37, %s4482_s12  ;;  %2856 = vrot.lane.b32.xlu1 %v6451_v45, %s4481_s11 }
 0x55e   :  { %2972 = vrot.lane.b32.xlu0 %v6437_v59, %s4482_s12  ;;  %2958 = vrot.lane.b32.xlu1 %v6440_v9, %s4482_s12 }
 0x562   :  { %3058 = vrot.lane.b32.xlu0 %v6427_v37, %s4483_s13  ;;  %2974 = vrot.lane.b32.xlu1 %v6451_v45, %s4482_s12 }
 0x566   :  { %3074 = vrot.lane.b32.xlu0 %v6437_v59, %s4483_s13  ;;  %3060 = vrot.lane.b32.xlu1 %v6440_v9, %s4483_s13 }
 0x56a   :  { %3160 = vrot.lane.b32.xlu0 %v6427_v37, %s4484_s14  ;;  %3076 = vrot.lane.b32.xlu1 %v6451_v45, %s4483_s13 }
 0x56c   :  { %v6576_v28 = vpop.permute.xlu0 %2524 }
 0x56e   :  { %3176 = vrot.lane.b32.xlu0 %v6437_v59, %s4484_s14  ;;  %3162 = vrot.lane.b32.xlu1 %v6440_v9, %s4484_s14 }
 0x570   :  { %v6582_v35 = vpop.permute.xlu1 %2526  ;;  %v6584_v62 = vpop.permute.xlu0 %2540 }
 0x572   :  { %3262 = vrot.lane.b32.xlu0 %v6427_v37, %s4485_s15  ;;  %3178 = vrot.lane.b32.xlu1 %v6451_v45, %s4484_s14 }
 0x574   :  { %v6590_v21 = vpop.permute.xlu0 %2626  ;;  %v6592_v46 = vpop.permute.xlu1 %2542 }
 0x576   :  { %3278 = vrot.lane.b32.xlu0 %v6437_v59, %s4485_s15  ;;  %3264 = vrot.lane.b32.xlu1 %v6440_v9, %s4485_s15  ;;  %v8012_v9 = vld [vmem:[#allocation17_spill] sm:$0xff] }
 0x577   :  { %v6717_v16 = vrot.slane %v2572_v13, %v8012_v9  ;;  %v6757_v15 = vrot.slane %v2674_v57, %v8012_v9 }
 0x578   :  { %v6598_v18 = vpop.permute.xlu0 %2642  ;;  %v6600_v22 = vpop.permute.xlu1 %2628 }
 0x579   :  { %8013 = vst [vmem:[#allocation35_spill] sm:$0xff] %v6717_v16 }
 0x57a   :  { %2528 = vrot.lane.b32.xlu0 %v6449_v34, %s4478_s24  ;;  %3280 = vrot.lane.b32.xlu1 %v6451_v45, %s4485_s15  ;;  %v6728_v45 = vrot.slane %v2572_v13, %v4697_v23 }
 0x57c   :  { %v6606_v8 = vpop.permute.xlu0 %2728  ;;  %v6608_v44 = vpop.permute.xlu1 %2644  ;;  %8014 = vst [vmem:[#allocation19_spill] sm:$0xff] %v6728_v45 }
 0x57e   :  { %2530 = vrot.lane.b32.xlu1 %v6463_v17, %s4478_s24  ;;  %2544 = vrot.lane.b32.xlu0 %v6461_v33, %s4478_s24 }
 0x580   :  { %v6614_v19 = vpop.permute.xlu0 %2744  ;;  %v6616_v49 = vpop.permute.xlu1 %2730 }
 0x582   :  { %2630 = vrot.lane.b32.xlu0 %v6449_v34, %s4479_s4  ;;  %2546 = vrot.lane.b32.xlu1 %v6477_v25, %s4478_s24 }
 0x584   :  { %v6622_v63 = vpop.permute.xlu0 %2830  ;;  %v6624_v4 = vpop.permute.xlu1 %2746 }
 0x586   :  { %2646 = vrot.lane.b32.xlu0 %v6461_v33, %s4479_s4  ;;  %2632 = vrot.lane.b32.xlu1 %v6463_v17, %s4479_s4 }
 0x588   :  { %v6630_v42 = vpop.permute.xlu0 %2846  ;;  %v6632_v5 = vpop.permute.xlu1 %2832 }
 0x58a   :  { %2732 = vrot.lane.b32.xlu0 %v6449_v34, %s4480_s10  ;;  %2648 = vrot.lane.b32.xlu1 %v6477_v25, %s4479_s4 }
 0x58c   :  { %v6638_v60 = vpop.permute.xlu0 %2948  ;;  %v6640_v6 = vpop.permute.xlu1 %2848 }
 0x58e   :  { %2748 = vrot.lane.b32.xlu0 %v6461_v33, %s4480_s10  ;;  %2734 = vrot.lane.b32.xlu1 %v6463_v17, %s4480_s10 }
 0x590   :  { %v6646_v47 = vpop.permute.xlu0 %2964  ;;  %v6648_v1 = vpop.permute.xlu1 %2950 }
 0x592   :  { %2834 = vrot.lane.b32.xlu0 %v6449_v34, %s4481_s11  ;;  %2750 = vrot.lane.b32.xlu1 %v6477_v25, %s4480_s10 }
 0x594   :  { %v6654_v48 = vpop.permute.xlu0 %3050  ;;  %v6656_v50 = vpop.permute.xlu1 %2966 }
 0x596   :  { %2850 = vrot.lane.b32.xlu0 %v6461_v33, %s4481_s11  ;;  %2836 = vrot.lane.b32.xlu1 %v6463_v17, %s4481_s11 }
 0x598   :  { %v6662_v52 = vpop.permute.xlu0 %3066  ;;  %v6664_v12 = vpop.permute.xlu1 %3052 }
 0x59a   :  { %2952 = vrot.lane.b32.xlu0 %v6449_v34, %s4482_s12  ;;  %2852 = vrot.lane.b32.xlu1 %v6477_v25, %s4481_s11 }
 0x59c   :  { %v6670_v61 = vpop.permute.xlu0 %3152  ;;  %v6672_v51 = vpop.permute.xlu1 %3068 }
 0x59e   :  { %2968 = vrot.lane.b32.xlu0 %v6461_v33, %s4482_s12  ;;  %2954 = vrot.lane.b32.xlu1 %v6463_v17, %s4482_s12 }
 0x5a0   :  { %v6678_v10 = vpop.permute.xlu0 %3168  ;;  %v6680_v56 = vpop.permute.xlu1 %3154 }
 0x5a2   :  { %3054 = vrot.lane.b32.xlu0 %v6449_v34, %s4483_s13  ;;  %2970 = vrot.lane.b32.xlu1 %v6477_v25, %s4482_s12 }
 0x5a4   :  { %v6686_v7 = vpop.permute.xlu0 %3254  ;;  %v6688_v32 = vpop.permute.xlu1 %3170 }
 0x5a6   :  { %3070 = vrot.lane.b32.xlu0 %v6461_v33, %s4483_s13  ;;  %3056 = vrot.lane.b32.xlu1 %v6463_v17, %s4483_s13 }
 0x5a8   :  { %v6694_v37 = vpop.permute.xlu0 %3270  ;;  %v6696_v3 = vpop.permute.xlu1 %3256 }
 0x5aa   :  { %3156 = vrot.lane.b32.xlu0 %v6449_v34, %s4484_s14  ;;  %3072 = vrot.lane.b32.xlu1 %v6477_v25, %s4483_s13 }
 0x5ac   :  { %v2533_v0 = vpop.permute.xlu0 %2532  ;;  %v6708_v36 = vpop.permute.xlu1 %3272 }
 0x5ad   :  { %v2560_v59 = vsel %vm106_vm0, %v2533_v0, %v6584_v62  ;;  %v2564_v39 = vsel %vm106_vm0, %v6576_v28, %v2533_v0 }
 0x5ae   :  { %v2595_v31 = vmul.f32 %v6703_v55, %v2564_v39  ;;  %v6721_v11 = vmul.f32 %v6706_v53, %v2560_v59  ;;  %3172 = vrot.lane.b32.xlu0 %v6461_v33, %s4484_s14  ;;  %3158 = vrot.lane.b32.xlu1 %v6463_v17, %s4484_s14 }
 0x5b0   :  { %v2549_v29 = vpop.permute.xlu0 %2548  ;;  %v2535_v38 = vpop.permute.xlu1 %2534 }
 0x5b1   :  { %v2556_v54 = vsel %vm106_vm0, %v6584_v62, %v2549_v29  ;;  %v2568_v40 = vsel %vm106_vm0, %v2549_v29, %v6576_v28  ;;  %v2561_v58 = vsel %vm106_vm0, %v2535_v38, %v6592_v46  ;;  %v2565_v13 = vsel %vm106_vm0, %v6582_v35, %v2535_v38 }
 0x5b2   :  { %v2594_v0 = vmul.f32 %v6717_v16, %v2568_v40  ;;  %v2597_v59 = vmul.f32 %v6728_v45, %v2556_v54  ;;  %v2599_v39 = vmul.f32 %v6703_v55, %v2565_v13  ;;  %v2600_v62 = vmul.f32 %v6706_v53, %v2561_v58  ;;  %2536 = vrot.lane.b32.xlu0 %v6453_v30, %s4478_s24  ;;  %v2776_v55 = vld [vmem:[#allocation8 + $0x2] ss:$8 sm:$0xf] }
 0x5b3   :  { %3174 = vrot.lane.b32.xlu1 %v6477_v25, %s4484_s14  ;;  %v6760_v38 = vrot.slane %v2674_v57, %v4697_v23 }
 0x5b4   :  { %v2635_v28 = vpop.permute.xlu0 %2634  ;;  %v2551_v29 = vpop.permute.xlu1 %2550  ;;  %v4109_v40 = vpack.c.bf16 %v2599_v39, %v2595_v31 }
 0x5b5   :  { %v2662_v54 = vsel %vm155_vm1, %v2635_v28, %v6598_v18  ;;  %v2666_v58 = vsel %vm155_vm1, %v6590_v21, %v2635_v28  ;;  %v2557_v13 = vsel %vm106_vm0, %v6592_v46, %v2551_v29  ;;  %v2569_v53 = vsel %vm106_vm0, %v2551_v29, %v6582_v35 }
 0x5b6   :  { %v6775_v57 = vmul.f32 %v6731_v2, %v2666_v58  ;;  %v6778_v31 = vmul.f32 %v6734_v26, %v2662_v54  ;;  %v2598_v39 = vmul.f32 %v6717_v16, %v2569_v53  ;;  %v2601_v33 = vmul.f32 %v6728_v45, %v2557_v13  ;;  %2552 = vrot.lane.b32.xlu0 %v6465_v43, %s4478_s24 }
 0x5b7   :  { %2538 = vrot.lane.b32.xlu1 %v6468_v27, %s4478_s24  ;;  %4110 = vmatprep.subr.bf16.mxu0 %v4109_v40  ;;  %v6787_v28 = vrot.slane %v2776_v55, %v4699_v24  ;;  %v6790_v29 = vrot.slane %v2776_v55, %v8006_v14 }
 0x5b8   :  { %8015 = vst [vmem:[#allocation38_spill] sm:$0xff] %v6778_v31  ;;  %v2651_v46 = vpop.permute.xlu0 %2650  ;;  %v2637_v35 = vpop.permute.xlu1 %2636  ;;  %v4111_v54 = vpack.c.bf16 %v2598_v39, %v2594_v0  ;;  %v4181_v58 = vpack.c.bf16 %v2601_v33, %v2597_v59 }
 0x5b9   :  { %v2658_v53 = vsel %vm155_vm1, %v6598_v18, %v2651_v46  ;;  %v2670_v13 = vsel %vm155_vm1, %v2651_v46, %v6590_v21  ;;  %v2663_v40 = vsel %vm155_vm1, %v2637_v35, %v6608_v44  ;;  %v2667_v45 = vsel %vm155_vm1, %v6600_v22, %v2637_v35 }
 0x5ba   :  { %v6805_v16 = vmul.f32 %v6757_v15, %v2670_v13  ;;  %v6808_v33 = vmul.f32 %v6760_v38, %v2658_v53  ;;  %v6811_v18 = vmul.f32 %v6731_v2, %v2667_v45  ;;  %v6814_v0 = vmul.f32 %v6734_v26, %v2663_v40  ;;  %2638 = vrot.lane.b32.xlu0 %v6453_v30, %s4479_s4 }
 0x5bb   :  { %2554 = vrot.lane.b32.xlu1 %v6479_v41, %s4478_s24  ;;  %4112 = vmatpush1.bf16.msra.mxu0 %v4111_v54  ;;  %v4183_v21 = vpack.c.bf16 %v2600_v62, %v6721_v11  ;;  %v6822_v46 = vrot.slane %v2776_v55, %v8012_v9  ;;  %v6825_v45 = vrot.slane %v2776_v55, %v4697_v23 }
 0x5bc   :  { %8016 = vst [vmem:[#allocation60_spill] sm:$0xff] %v6805_v16  ;;  %8017 = vst [vmem:[#allocation62_spill] sm:$0xff] %v6814_v0  ;;  %v2737_v59 = vpop.permute.xlu0 %2736  ;;  %v2653_v39 = vpop.permute.xlu1 %2652  ;;  %4182 = vmatprep.subr.bf16.mxu1 %v4181_v58  ;;  %v2878_v58 = vld [vmem:[#allocation8 + $0x3] ss:$8 sm:$0xf] }
 0x5bd   :  { %8018 = vst [vmem:[#allocation59_spill] sm:$0xff] %v6825_v45  ;;  %v2764_v54 = vsel %vm205_vm2, %v2737_v59, %v6614_v19  ;;  %v2768_v11 = vsel %vm205_vm2, %v6606_v8, %v2737_v59  ;;  %v2659_v55 = vsel %vm155_vm1, %v6608_v44, %v2653_v39  ;;  %v2671_v62 = vsel %vm155_vm1, %v2653_v39, %v6600_v22 }
 0x5be   :  { %4184 = vmatpush1.bf16.msra.mxu1 %v4183_v21  ;;  %v6844_v13 = vmul.f32 %v6787_v28, %v2768_v11  ;;  %v6847_v40 = vmul.f32 %v6790_v29, %v2764_v54  ;;  %v6850_v53 = vmul.f32 %v6757_v15, %v2671_v62  ;;  %v6853_v59 = vmul.f32 %v6760_v38, %v2659_v55 }
 0x5bf   :  { %2654 = vrot.lane.b32.xlu0 %v6465_v43, %s4479_s4  ;;  %2640 = vrot.lane.b32.xlu1 %v6468_v27, %s4479_s4  ;;  %v6860_v21 = vrot.slane %v2878_v58, %v4699_v24  ;;  %v6863_v39 = vrot.slane %v2878_v58, %v8006_v14 }
 0x5c0   :  { %8019 = vst [vmem:[#allocation61_spill] sm:$0xff] %v6844_v13  ;;  %8020 = vst [vmem:[#allocation64_spill] sm:$0xff] %v6847_v40  ;;  %v2753_v22 = vpop.permute.xlu0 %2752  ;;  %v2739_v44 = vpop.permute.xlu1 %2738 }
 0x5c1   :  { %8021 = vst [vmem:[#allocation66_spill] sm:$0xff] %v6850_v53  ;;  %8022 = vst [vmem:[#allocation63_spill] sm:$0xff] %v6863_v39  ;;  %v2760_v55 = vsel %vm205_vm2, %v6614_v19, %v2753_v22  ;;  %v2772_v62 = vsel %vm205_vm2, %v2753_v22, %v6606_v8  ;;  %v2765_v35 = vsel %vm205_vm2, %v2739_v44, %v6624_v4 }
 0x5c2   :  { %v2769_v31 = vsel %vm205_vm2, %v6616_v49, %v2739_v44  ;;  %v6882_v54 = vmul.f32 %v6822_v46, %v2772_v62  ;;  %v6885_v11 = vmul.f32 %v6825_v45, %v2760_v55  ;;  %v6891_v0 = vmul.f32 %v6790_v29, %v2765_v35  ;;  %v2996_v35 = vld [vmem:[#allocation8 + $0x5] ss:$8 sm:$0xf] }
 0x5c3   :  { %v6888_v19 = vmul.f32 %v6787_v28, %v2769_v31  ;;  %2740 = vrot.lane.b32.xlu0 %v6453_v30, %s4480_s10  ;;  %2656 = vrot.lane.b32.xlu1 %v6479_v41, %s4479_s4  ;;  %v6900_v44 = vrot.slane %v2878_v58, %v8012_v9  ;;  %v6903_v31 = vrot.slane %v2878_v58, %v4697_v23 }
 0x5c4   :  { %8023 = vst [vmem:[#allocation51_spill] sm:$0xff] %v6882_v54  ;;  %8025 = vst [vmem:[#allocation40_spill] sm:$0xff] %v6891_v0  ;;  %v2839_v8 = vpop.permute.xlu0 %2838  ;;  %v2755_v22 = vpop.permute.xlu1 %2754 }
 0x5c5   :  { %8024 = vst [vmem:[#allocation25_spill] sm:$0xff] %v6888_v19  ;;  %2819 = vst [vmem:[#allocation2 + $0x128] sm:$0xff] %v6888_v19  ;;  %v2866_v62 = vsel %vm255_vm3, %v2839_v8, %v6630_v42  ;;  %v2870_v16 = vsel %vm255_vm3, %v6622_v63, %v2839_v8  ;;  %v2761_v53 = vsel %vm205_vm2, %v6624_v4, %v2755_v22 }
 0x5c6   :  { %2820 = vst [vmem:[#allocation2 + $0x130] sm:$0xff] %v6891_v0  ;;  %v2773_v58 = vsel %vm205_vm2, %v2755_v22, %v6616_v49  ;;  %v6922_v13 = vmul.f32 %v6860_v21, %v2870_v16  ;;  %v6925_v55 = vmul.f32 %v6863_v39, %v2866_v62  ;;  %v6931_v8 = vmul.f32 %v6825_v45, %v2761_v53 }
 0x5c7   :  { %v6928_v40 = vmul.f32 %v6822_v46, %v2773_v58  ;;  %2756 = vrot.lane.b32.xlu0 %v6465_v43, %s4480_s10  ;;  %2742 = vrot.lane.b32.xlu1 %v6468_v27, %s4480_s10  ;;  %v6940_v16 = vrot.slane %v2996_v35, %v8012_v9  ;;  %v6943_v22 = vrot.slane %v2996_v35, %v4699_v24 }
 0x5c8   :  { %8026 = vst [vmem:[#allocation22_spill] sm:$0xff] %v6922_v13  ;;  %8027 = vst [vmem:[#allocation37_spill] sm:$0xff] %v6925_v55  ;;  %v2855_v49 = vpop.permute.xlu0 %2854  ;;  %v2841_v4 = vpop.permute.xlu1 %2840 }
 0x5c9   :  { %8028 = vst [vmem:[#allocation23_spill] sm:$0xff] %v6928_v40  ;;  %2818 = vst [vmem:[#allocation2 + $0x120] sm:$0xff] %v6928_v40  ;;  %v2862_v58 = vsel %vm255_vm3, %v6630_v42, %v2855_v49  ;;  %v2874_v0 = vsel %vm255_vm3, %v2855_v49, %v6622_v63  ;;  %v2867_v19 = vsel %vm255_vm3, %v2841_v4, %v6640_v6 }
 0x5ca   :  { %2821 = vst [vmem:[#allocation2 + $0x138] sm:$0xff] %v6931_v8  ;;  %8029 = vst [vmem:[#allocation43_spill] sm:$0xff] %v6943_v22  ;;  %v2871_v45 = vsel %vm255_vm3, %v6632_v5, %v2841_v4  ;;  %v6962_v53 = vmul.f32 %v6900_v44, %v2874_v0  ;;  %v6965_v62 = vmul.f32 %v6903_v31, %v2862_v58 }
 0x5cb   :  { %v6968_v42 = vmul.f32 %v6860_v21, %v2871_v45  ;;  %v6971_v54 = vmul.f32 %v6863_v39, %v2867_v19  ;;  %2842 = vrot.lane.b32.xlu0 %v6453_v30, %s4481_s11  ;;  %2758 = vrot.lane.b32.xlu1 %v6479_v41, %s4480_s10  ;;  %v6978_v0 = vrot.slane %v2996_v35, %v8006_v14  ;;  %v3098_v45 = vld [vmem:[#allocation8 + $0x6] ss:$8 sm:$0xf] }
 0x5cc   :  { %8030 = vst [vmem:[#allocation39_spill] sm:$0xff] %v6962_v53  ;;  %v2957_v63 = vpop.permute.xlu0 %2956  ;;  %v2857_v49 = vpop.permute.xlu1 %2856  ;;  %v6981_v4 = vrot.slane %v2996_v35, %v4697_v23 }
 0x5cd   :  { %8031 = vst [vmem:[#allocation29_spill] sm:$0xff] %v6968_v42  ;;  %8032 = vst [vmem:[#allocation46_spill] sm:$0xff] %v6971_v54  ;;  %v2984_v58 = vsel %vm305_vm4, %v2957_v63, %v6646_v47  ;;  %v2988_v40 = vsel %vm305_vm4, %v6638_v60, %v2957_v63  ;;  %v2863_v39 = vsel %vm255_vm3, %v6640_v6, %v2857_v49 }
 0x5ce   :  { %v2875_v35 = vsel %vm255_vm3, %v2857_v49, %v6632_v5  ;;  %v3018_v13 = vmul.f32 %v6940_v16, %v2988_v40  ;;  %v7001_v19 = vmul.f32 %v6943_v22, %v2984_v58  ;;  %v7007_v54 = vmul.f32 %v6903_v31, %v2863_v39 }
 0x5cf   :  { %v7004_v55 = vmul.f32 %v6900_v44, %v2875_v35  ;;  %2858 = vrot.lane.b32.xlu0 %v6465_v43, %s4481_s11  ;;  %2844 = vrot.lane.b32.xlu1 %v6468_v27, %s4481_s11  ;;  %v7014_v40 = vrot.slane %v3098_v45, %v8012_v9  ;;  %v7017_v63 = vrot.slane %v3098_v45, %v4699_v24 }
 0x5d0   :  { %8033 = vst [vmem:[#allocation20_spill] sm:$0xff] %v7001_v19  ;;  %3034 = vst [vmem:[#allocation2 + $0x280] sm:$0xff] %v3018_v13  ;;  %v2973_v5 = vpop.permute.xlu0 %2972  ;;  %v2959_v6 = vpop.permute.xlu1 %2958 }
 0x5d1   :  { %v2980_v58 = vsel %vm305_vm4, %v6646_v47, %v2973_v5  ;;  %v2992_v13 = vsel %vm305_vm4, %v2973_v5, %v6638_v60  ;;  %v2985_v35 = vsel %vm305_vm4, %v2959_v6, %v6656_v50  ;;  %v2989_v42 = vsel %vm305_vm4, %v6648_v1, %v2959_v6 }
 0x5d2   :  { %v7036_v49 = vmul.f32 %v6978_v0, %v2980_v58  ;;  %v7039_v39 = vmul.f32 %v6981_v4, %v2992_v13  ;;  %v7042_v47 = vmul.f32 %v6940_v16, %v2989_v42  ;;  %v7045_v53 = vmul.f32 %v6943_v22, %v2985_v35 }
 0x5d3   :  { %3258 = vrot.lane.b32.xlu0 %v6449_v34, %s4485_s15  ;;  %2860 = vrot.lane.b32.xlu1 %v6479_v41, %s4481_s11  ;;  %v7052_v6 = vrot.slane %v3098_v45, %v8006_v14  ;;  %v7055_v58 = vrot.slane %v3098_v45, %v4697_v23 }
 0x5d4   :  { %8034 = vst [vmem:[#allocation27_spill] sm:$0xff] %v7036_v49  ;;  %8035 = vst [vmem:[#allocation49_spill] sm:$0xff] %v7039_v39  ;;  %v3059_v60 = vpop.permute.xlu0 %3058  ;;  %v2975_v5 = vpop.permute.xlu1 %2974 }
 0x5d5   :  { %8036 = vst [vmem:[#allocation26_spill] sm:$0xff] %v7042_v47  ;;  %8037 = vst [vmem:[#allocation42_spill] sm:$0xff] %v7045_v53  ;;  %v3086_v13 = vsel %vm355_vm5, %v3059_v60, %v6662_v52  ;;  %v3090_v34 = vsel %vm355_vm5, %v6654_v48, %v3059_v60  ;;  %v2981_v35 = vsel %vm305_vm4, %v6656_v50, %v2975_v5  ;;  %v3200_v47 = vld [vmem:[#allocation8 + $0x7] ss:$8 sm:$0xf] }
 0x5d6   :  { %8038 = vst [vmem:[#allocation76_spill] sm:$0xff] %v7052_v6  ;;  %8039 = vst [vmem:[#allocation24_spill] sm:$0xff] %v7055_v58  ;;  %v2993_v45 = vsel %vm305_vm4, %v2975_v5, %v6648_v1  ;;  %v3120_v22 = vmul.f32 %v7014_v40, %v3090_v34  ;;  %v7073_v42 = vmul.f32 %v7017_v63, %v3086_v13 }
 0x5d7   :  { %v7076_v19 = vmul.f32 %v6978_v0, %v2981_v35  ;;  %v7079_v53 = vmul.f32 %v6981_v4, %v2993_v45  ;;  %2960 = vrot.lane.b32.xlu0 %v6453_v30, %s4482_s12  ;;  %3260 = vrot.lane.b32.xlu1 %v6463_v17, %s4485_s15  ;;  %v7086_v60 = vrot.slane %v3200_v47, %v8012_v9 }
 0x5d8   :  { %8040 = vst [vmem:[#allocation45_spill] sm:$0xff] %v7073_v42  ;;  %3136 = vst [vmem:[#allocation2 + $0x300] sm:$0xff] %v3120_v22  ;;  %v3075_v1 = vpop.permute.xlu0 %3074  ;;  %v3061_v50 = vpop.permute.xlu1 %3060  ;;  %v7089_v5 = vrot.slane %v3200_v47, %v4699_v24 }
 0x5d9   :  { %8041 = vst [vmem:[#allocation74_spill] sm:$0xff] %v7076_v19  ;;  %8042 = vst [vmem:[#allocation89_spill] sm:$0xff] %v7079_v53  ;;  %v3082_v35 = vsel %vm355_vm5, %v6662_v52, %v3075_v1  ;;  %v3094_v17 = vsel %vm355_vm5, %v3075_v1, %v6654_v48  ;;  %v3087_v22 = vsel %vm355_vm5, %v3061_v50, %v6672_v51  ;;  %v8071_v19 = vld [vmem:[#allocation35_spill] sm:$0xff] }
 0x5da   :  { %8043 = vst [vmem:[#allocation93_spill] sm:$0xff] %v7086_v60  ;;  %8044 = vst [vmem:[#allocation36_spill] sm:$0xff] %v7089_v5  ;;  %v3091_v45 = vsel %vm355_vm5, %v6664_v12, %v3061_v50  ;;  %v3122_v13 = vmul.f32 %v7052_v6, %v3082_v35  ;;  %v3123_v34 = vmul.f32 %v7055_v58, %v3094_v17 }
 0x5db   :  { %v7110_v49 = vmul.f32 %v7014_v40, %v3091_v45  ;;  %v7113_v52 = vmul.f32 %v7017_v63, %v3087_v22  ;;  %2976 = vrot.lane.b32.xlu0 %v6465_v43, %s4482_s12  ;;  %3276 = vrot.lane.b32.xlu1 %v6477_v25, %s4485_s15  ;;  %v7120_v50 = vrot.slane %v3200_v47, %v8006_v14 }
 0x5dc   :  { %3138 = vst [vmem:[#allocation2 + $0x310] sm:$0xff] %v3122_v13  ;;  %3139 = vst [vmem:[#allocation2 + $0x318] sm:$0xff] %v3123_v34  ;;  %v3161_v48 = vpop.permute.xlu0 %3160  ;;  %v3077_v1 = vpop.permute.xlu1 %3076  ;;  %v7123_v35 = vrot.slane %v3200_v47, %v4697_v23  ;;  %v3302_v34 = vld [vmem:[#allocation8 + $0x20] ss:$8 sm:$0xf] }
 0x5dd   :  { %8045 = vst [vmem:[#allocation73_spill] sm:$0xff] %v7110_v49  ;;  %8046 = vst [vmem:[#allocation77_spill] sm:$0xff] %v7113_v52  ;;  %v3188_v22 = vsel %vm405_vm6, %v3161_v48, %v6678_v10  ;;  %v3192_v25 = vsel %vm405_vm6, %v6670_v61, %v3161_v48  ;;  %v3083_v13 = vsel %vm355_vm5, %v6672_v51, %v3077_v1 }
 0x5de   :  { %8047 = vst [vmem:[#allocation67_spill] sm:$0xff] %v7120_v50  ;;  %8048 = vst [vmem:[#allocation82_spill] sm:$0xff] %v7123_v35  ;;  %v3095_v47 = vsel %vm355_vm5, %v3077_v1, %v6664_v12  ;;  %v3222_v45 = vmul.f32 %v7086_v60, %v3192_v25  ;;  %v3223_v17 = vmul.f32 %v7089_v5, %v3188_v22 }
 0x5df   :  { %v7142_v49 = vmul.f32 %v7052_v6, %v3083_v13  ;;  %v7145_v42 = vmul.f32 %v7055_v58, %v3095_v47  ;;  %3062 = vrot.lane.b32.xlu0 %v6453_v30, %s4483_s13  ;;  %2962 = vrot.lane.b32.xlu1 %v6468_v27, %s4482_s12  ;;  %v7152_v48 = vrot.slane %v3302_v34, %v8012_v9  ;;  %v8072_v6 = vld [vmem:[#allocation19_spill] sm:$0xff] }
 0x5e0   :  { %3238 = vst [vmem:[#allocation2 + $0x380] sm:$0xff] %v3222_v45  ;;  %3239 = vst [vmem:[#allocation2 + $0x388] sm:$0xff] %v3223_v17  ;;  %v3177_v12 = vpop.permute.xlu0 %3176  ;;  %v3163_v51 = vpop.permute.xlu1 %3162  ;;  %v7155_v1 = vrot.slane %v3302_v34, %v4699_v24 }
 0x5e1   :  { %8049 = vst [vmem:[#allocation78_spill] sm:$0xff] %v7142_v49  ;;  %8050 = vst [vmem:[#allocation75_spill] sm:$0xff] %v7145_v42  ;;  %v3184_v22 = vsel %vm405_vm6, %v6678_v10, %v3177_v12  ;;  %v3196_v25 = vsel %vm405_vm6, %v3177_v12, %v6670_v61  ;;  %v3189_v17 = vsel %vm405_vm6, %v3163_v51, %v6688_v32  ;;  %v8069_v42 = vld [vmem:[#allocation58_spill] sm:$0xff] }
 0x5e2   :  { %8051 = vst [vmem:[#allocation79_spill] sm:$0xff] %v7152_v48  ;;  %8052 = vst [vmem:[#allocation41_spill] sm:$0xff] %v7155_v1  ;;  %v3193_v9 = vsel %vm405_vm6, %v6680_v56, %v3163_v51  ;;  %v3224_v13 = vmul.f32 %v7120_v50, %v3184_v22  ;;  %v3225_v24 = vmul.f32 %v7123_v35, %v3196_v25 }
 0x5e3   :  { %v3226_v47 = vmul.f32 %v7086_v60, %v3193_v9  ;;  %v7173_v10 = vmul.f32 %v7089_v5, %v3189_v17  ;;  %3078 = vrot.lane.b32.xlu0 %v6465_v43, %s4483_s13  ;;  %2978 = vrot.lane.b32.xlu1 %v6479_v41, %s4482_s12  ;;  %v7180_v12 = vrot.slane %v3302_v34, %v8006_v14 }
 0x5e4   :  { %3240 = vst [vmem:[#allocation2 + $0x390] sm:$0xff] %v3224_v13  ;;  %3241 = vst [vmem:[#allocation2 + $0x398] sm:$0xff] %v3225_v24  ;;  %v3263_v61 = vpop.permute.xlu0 %3262  ;;  %v3179_v45 = vpop.permute.xlu1 %3178  ;;  %v7183_v51 = vrot.slane %v3302_v34, %v4697_v23 }
 0x5e5   :  { %8053 = vst [vmem:[#allocation88_spill] sm:$0xff] %v7173_v10  ;;  %3242 = vst [vmem:[#allocation2 + $0x3a0] sm:$0xff] %v3226_v47  ;;  %v3290_v22 = vsel %vm455_vm7, %v3263_v61, %v6694_v37  ;;  %v3294_v25 = vsel %vm455_vm7, %v6686_v7, %v3263_v61  ;;  %v3185_v17 = vsel %vm405_vm6, %v6688_v32, %v3179_v45 }
 0x5e6   :  { %8054 = vst [vmem:[#allocation87_spill] sm:$0xff] %v7180_v12  ;;  %8055 = vst [vmem:[#allocation44_spill] sm:$0xff] %v7183_v51  ;;  %v3197_v14 = vsel %vm405_vm6, %v3179_v45, %v6680_v56  ;;  %v3324_v9 = vmul.f32 %v7152_v48, %v3294_v25  ;;  %v3325_v23 = vmul.f32 %v7155_v1, %v3290_v22 }
 0x5e7   :  { %v3228_v34 = vmul.f32 %v7120_v50, %v3185_v17  ;;  %v7201_v13 = vmul.f32 %v7123_v35, %v3197_v14  ;;  %3164 = vrot.lane.b32.xlu0 %v6453_v30, %s4484_s14  ;;  %3064 = vrot.lane.b32.xlu1 %v6468_v27, %s4483_s13 }
 0x5e8   :  { %3340 = vst [vmem:[#allocation2 + $0x400] sm:$0xff] %v3324_v9  ;;  %3341 = vst [vmem:[#allocation2 + $0x408] sm:$0xff] %v3325_v23  ;;  %v3279_v32 = vpop.permute.xlu0 %3278  ;;  %v3265_v56 = vpop.permute.xlu1 %3264  ;;  %v7232_v9 = vld [vmem:[%s7678_s5] sm:$0x77] }
 0x5e9   :  { %8056 = vst [vmem:[#allocation70_spill] sm:$0xff] %v7201_v13  ;;  %3244 = vst [vmem:[#allocation2 + $0x3b0] sm:$0xff] %v3228_v34  ;;  %v3286_v24 = vsel %vm455_vm7, %v6694_v37, %v3279_v32  ;;  %v3298_v47 = vsel %vm455_vm7, %v3279_v32, %v6686_v7  ;;  %v3291_v61 = vsel %vm455_vm7, %v3265_v56, %v6708_v36 }
 0x5ea   :  { %v3295_v45 = vsel %vm455_vm7, %v6696_v3, %v3265_v56  ;;  %v3326_v22 = vmul.f32 %v7180_v12, %v3286_v24  ;;  %v3327_v25 = vmul.f32 %v7183_v51, %v3298_v47  ;;  %v7223_v37 = vmul.f32 %v7155_v1, %v3291_v61  ;;  %8058 = vst [vmem:[#allocation28_spill] sm:$0xff] %v7232_v9 }
 0x5eb   :  { %v3328_v17 = vmul.f32 %v7152_v48, %v3295_v45  ;;  %3180 = vrot.lane.b32.xlu0 %v6465_v43, %s4484_s14  ;;  %3080 = vrot.lane.b32.xlu1 %v6479_v41, %s4483_s13  ;;  %v3508_v32 = vcombine.high %v7232_v9, %v7232_v9 }
 0x5ec   :  { %8057 = vst [vmem:[#allocation68_spill] sm:$0xff] %v7223_v37  ;;  %3342 = vst [vmem:[#allocation2 + $0x410] sm:$0xff] %v3326_v22  ;;  %v2529_v7 = vpop.permute.xlu0 %2528  ;;  %v3281_v14 = vpop.permute.xlu1 %3280 }
 0x5ed   :  { %3343 = vst [vmem:[#allocation2 + $0x418] sm:$0xff] %v3327_v25  ;;  %3344 = vst [vmem:[#allocation2 + $0x420] sm:$0xff] %v3328_v17  ;;  %v3287_v23 = vsel %vm455_vm7, %v6708_v36, %v3281_v14  ;;  %v3299_v34 = vsel %vm455_vm7, %v3281_v14, %v6696_v3  ;;  %3588 = vmatprep.mubr.f32.mxu0 %v3508_v32  ;;  %3730 = vmatprep.mubr.f32.mxu1 %v3508_v32  ;;  %v8060_v3 = vld [vmem:[#allocation34_spill] sm:$0xff] }
 0x5ee   :  { %v3330_v56 = vmul.f32 %v7180_v12, %v3287_v23  ;;  %v7244_v24 = vmul.f32 %v7183_v51, %v3299_v34 }
 0x5ef   :  { %3266 = vrot.lane.b32.xlu0 %v6453_v30, %s4485_s15  ;;  %3166 = vrot.lane.b32.xlu1 %v6468_v27, %s4484_s14 }
 0x5f0   :  { %8059 = vst [vmem:[#allocation52_spill] sm:$0xff] %v7244_v24  ;;  %3346 = vst [vmem:[#allocation2 + $0x430] sm:$0xff] %v3330_v56  ;;  %v2531_v36 = vpop.permute.xlu1 %2530  ;;  %v2545_v47 = vpop.permute.xlu0 %2544 }
 0x5f3   :  { %3274 = vrot.lane.b32.xlu0 %v8060_v3, %s4485_s15  ;;  %3182 = vrot.lane.b32.xlu1 %v6479_v41, %s4484_s14 }
 0x5f4   :  { %v2631_v61 = vpop.permute.xlu0 %2630  ;;  %v2547_v45 = vpop.permute.xlu1 %2546 }
 0x5f7   :  { %3282 = vrot.lane.b32.xlu0 %v6465_v43, %s4485_s15  ;;  %3268 = vrot.lane.b32.xlu1 %v6468_v27, %s4485_s15 }
 0x5f8   :  { %v2647_v30 = vpop.permute.xlu0 %2646  ;;  %v7258_v22 = vpop.permute.xlu1 %2632 }
 0x5fb   :  { %3284 = vrot.lane.b32.xlu1 %v6479_v41, %s4485_s15 }
 0x5fc   :  { %v7262_v25 = vpop.permute.xlu0 %2732  ;;  %v7264_v17 = vpop.permute.xlu1 %2648 }
 0x600   :  { %v7266_v14 = vpop.permute.xlu0 %2748  ;;  %v7268_v23 = vpop.permute.xlu1 %2734 }
 0x604   :  { %v7270_v34 = vpop.permute.xlu0 %2834  ;;  %v7272_v43 = vpop.permute.xlu1 %2750 }
 0x608   :  { %v7274_v32 = vpop.permute.xlu0 %2850  ;;  %v7276_v27 = vpop.permute.xlu1 %2836 }
 0x60c   :  { %v7278_v56 = vpop.permute.xlu0 %2952  ;;  %v7280_v3 = vpop.permute.xlu1 %2852 }
 0x610   :  { %v7282_v41 = vpop.permute.xlu0 %2968  ;;  %v7284_v9 = vpop.permute.xlu1 %2954 }
 0x611   :  { %8061 = vst [vmem:[#allocation65_spill] sm:$0xff] %v7284_v9 }
 0x614   :  { %v7286_v24 = vpop.permute.xlu0 %3054  ;;  %v7288_v51 = vpop.permute.xlu1 %2970 }
 0x615   :  { %8062 = vst [vmem:[#allocation83_spill] sm:$0xff] %v7288_v51 }
 0x618   :  { %v7290_v12 = vpop.permute.xlu0 %3070  ;;  %v7292_v37 = vpop.permute.xlu1 %3056 }
 0x619   :  { %8063 = vst [vmem:[#allocation80_spill] sm:$0xff] %v7292_v37  ;;  %v8070_v37 = vld [vmem:[#allocation21_spill] sm:$0xff] }
 0x61c   :  { %v7294_v1 = vpop.permute.xlu0 %3156  ;;  %v7296_v13 = vpop.permute.xlu1 %3072 }
 0x61d   :  { %8064 = vst [vmem:[#allocation84_spill] sm:$0xff] %v7294_v1  ;;  %8065 = vst [vmem:[#allocation81_spill] sm:$0xff] %v7296_v13 }
 0x620   :  { %v7298_v10 = vpop.permute.xlu0 %3172  ;;  %v7300_v48 = vpop.permute.xlu1 %3158 }
 0x621   :  { %8066 = vst [vmem:[#allocation32_spill] sm:$0xff] %v7298_v10  ;;  %8067 = vst [vmem:[#allocation53_spill] sm:$0xff] %v7300_v48 }
 0x624   :  { %v2537_v35 = vpop.permute.xlu0 %2536 }
 0x625   :  { %v2562_v50 = vsel %vm106_vm0, %v2537_v35, %v2545_v47  ;;  %v2566_v49 = vsel %vm106_vm0, %v2529_v7, %v2537_v35  ;;  %v7306_v52 = vpop.permute.xlu1 %3174 }
 0x626   :  { %8068 = vst [vmem:[#allocation30_spill] sm:$0xff] %v7306_v52  ;;  %v2603_v5 = vmul.f32 %v8069_v42, %v2566_v49  ;;  %v2604_v60 = vmul.f32 %v8070_v37, %v2562_v50 }
 0x628   :  { %v2553_v1 = vpop.permute.xlu0 %2552 }
 0x629   :  { %v2558_v13 = vsel %vm106_vm0, %v2545_v47, %v2553_v1  ;;  %v2570_v48 = vsel %vm106_vm0, %v2553_v1, %v2529_v7  ;;  %v2539_v10 = vpop.permute.xlu1 %2538 }
 0x62a   :  { %v2602_v58 = vmul.f32 %v8071_v19, %v2570_v48  ;;  %v2605_v39 = vmul.f32 %v8072_v6, %v2558_v13  ;;  %v2563_v35 = vsel %vm106_vm0, %v2539_v10, %v2547_v45  ;;  %v2567_v49 = vsel %vm106_vm0, %v2531_v36, %v2539_v10 }
 0x62b   :  { %v2607_v50 = vmul.f32 %v8069_v42, %v2567_v49  ;;  %v2608_v52 = vmul.f32 %v8070_v37, %v2563_v35 }
 0x62c   :  { %v2639_v53 = vpop.permute.xlu0 %2638 }
 0x62d   :  { %v2664_v47 = vsel %vm155_vm1, %v2639_v53, %v2647_v30  ;;  %v2668_v1 = vsel %vm155_vm1, %v2631_v61, %v2639_v53  ;;  %v2555_v48 = vpop.permute.xlu1 %2554  ;;  %v4113_v7 = vpack.c.bf16 %v2607_v50, %v2603_v5  ;;  %v4187_v51 = vpack.c.bf16 %v2608_v52, %v2604_v60 }
 0x62e   :  { %v2705_v13 = vmul.f32 %v6731_v2, %v2668_v1  ;;  %v2706_v9 = vmul.f32 %v6734_v26, %v2664_v47  ;;  %v2559_v10 = vsel %vm106_vm0, %v2547_v45, %v2555_v48  ;;  %v2571_v42 = vsel %vm106_vm0, %v2555_v48, %v2531_v36 }
 0x62f   :  { %v2606_v37 = vmul.f32 %v8071_v19, %v2571_v42  ;;  %v2609_v35 = vmul.f32 %v8072_v6, %v2559_v10  ;;  %4114 = vmatprep.subr.bf16.mxu0 %v4113_v7 }
 0x631   :  { %v2655_v49 = vpop.permute.xlu0 %2654  ;;  %v2641_v50 = vpop.permute.xlu1 %2640  ;;  %v4115_v47 = vpack.c.bf16 %v2606_v37, %v2602_v58  ;;  %v4185_v1 = vpack.c.bf16 %v2609_v35, %v2605_v39  ;;  %v8073_v39 = vpack.c.bf16 %v6811_v18, %v6775_v57  ;;  %v8075_v37 = vld [vmem:[#allocation66_spill] sm:$0xff] }
 0x632   :  { %v2660_v53 = vsel %vm155_vm1, %v2647_v30, %v2655_v49  ;;  %v2672_v5 = vsel %vm155_vm1, %v2655_v49, %v2631_v61  ;;  %v2665_v19 = vsel %vm155_vm1, %v2641_v50, %v7264_v17  ;;  %v2669_v6 = vsel %vm155_vm1, %v7258_v22, %v2641_v50  ;;  %v8078_v35 = vld [vmem:[#allocation62_spill] sm:$0xff] }
 0x633   :  { %v2704_v45 = vmul.f32 %v6757_v15, %v2672_v5  ;;  %v2707_v36 = vmul.f32 %v6760_v38, %v2660_v53  ;;  %v2709_v60 = vmul.f32 %v6731_v2, %v2669_v6  ;;  %v2710_v52 = vmul.f32 %v6734_v26, %v2665_v19  ;;  %4116 = vmatpush1.bf16.msra.mxu0 %v4115_v47  ;;  %v8079_v49 = vld [vmem:[#allocation38_spill] sm:$0xff] }
 0x634   :  { %4186 = vmatprep.subr.bf16.mxu1 %v4185_v1  ;;  %4118 = vmatprep.subr.bf16.mxu0 %v8073_v39  ;;  %v8074_v2 = vpack.c.bf16 %v6853_v59, %v6808_v33  ;;  %v8076_v33 = vld [vmem:[#allocation60_spill] sm:$0xff]  ;;  %v8080_v53 = vpack.c.bf16 %v8078_v35, %v8079_v49  ;;  %v8081_v1 = vld [vmem:[#allocation59_spill] sm:$0xff] }
 0x635   :  { %v2741_v58 = vpop.permute.xlu0 %2740  ;;  %4188 = vmatpush1.bf16.msra.mxu1 %v4187_v51  ;;  %v2657_v48 = vpop.permute.xlu1 %2656  ;;  %v4121_v26 = vpack.c.bf16 %v2709_v60, %v2705_v13  ;;  %v8077_v59 = vpack.c.bf16 %v8075_v37, %v8076_v33  ;;  %v4195_v5 = vpack.c.bf16 %v2710_v52, %v2706_v9  ;;  %v8090_v37 = vld [vmem:[#allocation40_spill] sm:$0xff] }
 0x636   :  { %v2766_v61 = vsel %vm205_vm2, %v2741_v58, %v7266_v14  ;;  %v2770_v30 = vsel %vm205_vm2, %v7262_v25, %v2741_v58  ;;  %4190 = vmatprep.subr.bf16.mxu1 %v8074_v2  ;;  %v2661_v18 = vsel %vm155_vm1, %v7264_v17, %v2657_v48  ;;  %v2673_v51 = vsel %vm155_vm1, %v2657_v48, %v7258_v22  ;;  %v8086_v48 = vld [vmem:[#allocation63_spill] sm:$0xff]  ;;  %v8091_v33 = vld [vmem:[#allocation64_spill] sm:$0xff] }
 0x637   :  { %v2807_v7 = vmul.f32 %v6787_v28, %v2770_v30  ;;  %v2808_v57 = vmul.f32 %v6790_v29, %v2766_v61  ;;  %v2708_v10 = vmul.f32 %v6757_v15, %v2673_v51  ;;  %v2711_v42 = vmul.f32 %v6760_v38, %v2661_v18  ;;  %4120 = vmatpush1.bf16.msra.mxu0 %v8077_v59 }
 0x638   :  { %4122 = vmatprep.subr.bf16.mxu0 %v4121_v26  ;;  %v8092_v59 = vpack.c.bf16 %v8090_v37, %v8091_v33 }
 0x639   :  { %v2757_v13 = vpop.permute.xlu0 %2756  ;;  %4192 = vmatpush1.bf16.msra.mxu1 %v8080_v53  ;;  %v2743_v38 = vpop.permute.xlu1 %2742  ;;  %v4123_v22 = vpack.c.bf16 %v2708_v10, %v2704_v45  ;;  %v4193_v50 = vpack.c.bf16 %v2711_v42, %v2707_v36  ;;  %v8082_v45 = vld [vmem:[#allocation25_spill] sm:$0xff]  ;;  %v8087_v42 = vld [vmem:[#allocation23_spill] sm:$0xff] }
 0x63a   :  { %v2762_v17 = vsel %vm205_vm2, %v7266_v14, %v2757_v13  ;;  %v2774_v15 = vsel %vm205_vm2, %v2757_v13, %v7262_v25  ;;  %v2767_v6 = vsel %vm205_vm2, %v2743_v38, %v7272_v43  ;;  %v2771_v9 = vsel %vm205_vm2, %v7268_v23, %v2743_v38  ;;  %v8083_v36 = vld [vmem:[#allocation61_spill] sm:$0xff] }
 0x63b   :  { %v2806_v47 = vmul.f32 %v6822_v46, %v2774_v15  ;;  %v2809_v19 = vmul.f32 %v8081_v1, %v2762_v17  ;;  %v2811_v14 = vmul.f32 %v6787_v28, %v2771_v9  ;;  %v2812_v60 = vmul.f32 %v6790_v29, %v2767_v6  ;;  %4124 = vmatpush1.bf16.msra.mxu0 %v4123_v22  ;;  %v8093_v38 = vld [vmem:[#allocation29_spill] sm:$0xff]  ;;  %v8094_v22 = vld [vmem:[#allocation22_spill] sm:$0xff] }
 0x63c   :  { %4194 = vmatprep.subr.bf16.mxu1 %v4193_v50  ;;  %v8084_v52 = vpack.c.bf16 %v8082_v45, %v8083_v36  ;;  %v8085_v28 = vpack.c.bf16 %v6931_v8, %v6885_v11  ;;  %v8088_v11 = vld [vmem:[#allocation51_spill] sm:$0xff]  ;;  %v8095_v50 = vpack.c.bf16 %v8093_v38, %v8094_v22  ;;  %v3427_v45 = vld [vmem:[#allocation2 + $0x228] sm:$0xff] }
 0x63d   :  { %v2843_v25 = vpop.permute.xlu0 %2842  ;;  %4196 = vmatpush1.bf16.msra.mxu1 %v4195_v5  ;;  %v2759_v61 = vpop.permute.xlu1 %2758  ;;  %v4129_v29 = vpack.c.bf16 %v2811_v14, %v2807_v7  ;;  %v8089_v8 = vpack.c.bf16 %v8087_v42, %v8088_v11  ;;  %v4203_v13 = vpack.c.bf16 %v2812_v60, %v2808_v57  ;;  %v8097_v60 = vld [vmem:[#allocation39_spill] sm:$0xff]  ;;  %v8100_v36 = vld [vmem:[#allocation37_spill] sm:$0xff] }
 0x63e   :  { %4126 = vmatprep.subr.bf16.mxu0 %v8084_v52  ;;  %v2868_v58 = vsel %vm255_vm3, %v2843_v25, %v7274_v32  ;;  %v2872_v39 = vsel %vm255_vm3, %v7270_v34, %v2843_v25  ;;  %4198 = vmatprep.subr.bf16.mxu1 %v8085_v28  ;;  %v2763_v26 = vsel %vm205_vm2, %v7272_v43, %v2759_v61  ;;  %v8102_v28 = vld [vmem:[#allocation43_spill] sm:$0xff] }
 0x63f   :  { %v2909_v30 = vmul.f32 %v6860_v21, %v2872_v39  ;;  %v2910_v2 = vmul.f32 %v8086_v48, %v2868_v58  ;;  %v2775_v18 = vsel %vm205_vm2, %v2759_v61, %v7268_v23  ;;  %v2813_v10 = vmul.f32 %v8081_v1, %v2763_v26  ;;  %4128 = vmatpush1.bf16.msra.mxu0 %v8089_v8  ;;  %v3423_v39 = vld [vmem:[#allocation2 + $0x208] sm:$0xff]  ;;  %v3425_v26 = vld [vmem:[#allocation2 + $0x218] sm:$0xff]  ;;  %v3428_v42 = vld [vmem:[#allocation2 + $0x230] sm:$0xff] }
 0x640   :  { %v2810_v51 = vmul.f32 %v6822_v46, %v2775_v18  ;;  %4130 = vmatprep.subr.bf16.mxu0 %v4129_v29  ;;  %v8096_v1 = vpack.c.bf16 %v7007_v54, %v6965_v62  ;;  %v8098_v25 = vpack.c.bf16 %v7004_v55, %v8097_v60  ;;  %v8099_v62 = vld [vmem:[#allocation46_spill] sm:$0xff]  ;;  %v3426_v18 = vld [vmem:[#allocation2 + $0x220] sm:$0xff] }
 0x641   :  { %v2859_v7 = vpop.permute.xlu0 %2858  ;;  %4200 = vmatpush1.bf16.msra.mxu1 %v8092_v59  ;;  %v2845_v23 = vpop.permute.xlu1 %2844  ;;  %v4201_v49 = vpack.c.bf16 %v2813_v10, %v2809_v19  ;;  %v8101_v52 = vpack.c.bf16 %v8099_v62, %v8100_v36  ;;  %v3435_v10 = vld [vmem:[#allocation2 + $0x268] sm:$0xff]  ;;  %v3422_v8 = vld [vmem:[#allocation2 + $0x200] sm:$0xff] }
 0x642   :  { %v2864_v43 = vsel %vm255_vm3, %v7274_v32, %v2859_v7  ;;  %v2876_v46 = vsel %vm255_vm3, %v2859_v7, %v7270_v34  ;;  %v4131_v35 = vpack.c.bf16 %v2810_v51, %v2806_v47  ;;  %v2869_v17 = vsel %vm255_vm3, %v2845_v23, %v7280_v3  ;;  %v3437_v7 = vld [vmem:[#allocation2 + $0x278] sm:$0xff]  ;;  %v3438_v60 = vld [vmem:[#allocation2 + $0x280] sm:$0xff]  ;;  %v8105_v62 = vld [vmem:[#allocation42_spill] sm:$0xff] }
 0x643   :  { %v2908_v53 = vmul.f32 %v6900_v44, %v2876_v46  ;;  %v2911_v5 = vmul.f32 %v6903_v31, %v2864_v43  ;;  %v2873_v57 = vsel %vm255_vm3, %v7276_v27, %v2845_v23  ;;  %v2914_v15 = vmul.f32 %v8086_v48, %v2869_v17  ;;  %4202 = vmatprep.subr.bf16.mxu1 %v4201_v49  ;;  %v3424_v43 = vld [vmem:[#allocation2 + $0x210] sm:$0xff]  ;;  %v8106_v36 = vld [vmem:[#allocation20_spill] sm:$0xff] }
 0x644   :  { %v2913_v32 = vmul.f32 %v6860_v21, %v2873_v57  ;;  %4132 = vmatpush1.bf16.msra.mxu0 %v4131_v35  ;;  %v4143_v59 = vpack.c.bf16 %v3426_v18, %v3422_v8  ;;  %v4215_v49 = vpack.c.bf16 %v3428_v42, %v3424_v43  ;;  %v8113_v18 = vld [vmem:[#allocation24_spill] sm:$0xff]  ;;  %v8115_v8 = vld [vmem:[#allocation27_spill] sm:$0xff] }
 0x645   :  { %v7436_v34 = vpop.permute.xlu0 %3258  ;;  %4134 = vmatprep.subr.bf16.mxu0 %v8095_v50  ;;  %4204 = vmatpush1.bf16.msra.mxu1 %v4203_v13  ;;  %v2861_v47 = vpop.permute.xlu1 %2860  ;;  %v4211_v48 = vpack.c.bf16 %v2914_v15, %v2910_v2  ;;  %v3431_v13 = vld [vmem:[#allocation2 + $0x248] sm:$0xff]  ;;  %v8118_v43 = vld [vmem:[#allocation84_spill] sm:$0xff] }
 0x646   :  { %4206 = vmatprep.subr.bf16.mxu1 %v8096_v1  ;;  %v4137_v19 = vpack.c.bf16 %v2913_v32, %v2909_v30  ;;  %v2865_v21 = vsel %vm255_vm3, %v7280_v3, %v2861_v47  ;;  %v2877_v6 = vsel %vm255_vm3, %v2861_v47, %v7276_v27  ;;  %v3429_v3 = vld [vmem:[#allocation2 + $0x238] sm:$0xff]  ;;  %v4141_v30 = vpack.c.bf16 %v3427_v45, %v3423_v39  ;;  %v3432_v32 = vld [vmem:[#allocation2 + $0x250] sm:$0xff] }
 0x647   :  { %v2912_v9 = vmul.f32 %v6900_v44, %v2877_v6  ;;  %v2915_v14 = vmul.f32 %v6903_v31, %v2865_v21  ;;  %v4213_v51 = vpack.c.bf16 %v3429_v3, %v3425_v26  ;;  %v4145_v35 = vpack.c.bf16 %v3435_v10, %v3431_v13  ;;  %v8103_v21 = vld [vmem:[#allocation83_spill] sm:$0xff]  ;;  %v8111_v39 = vld [vmem:[#allocation26_spill] sm:$0xff] }
 0x648   :  { %4136 = vmatpush1.bf16.msra.mxu0 %v8098_v25 }
 0x649   :  { %v2961_v54 = vpop.permute.xlu0 %2960  ;;  %4138 = vmatprep.subr.bf16.mxu0 %v4137_v19  ;;  %4208 = vmatpush1.bf16.msra.mxu1 %v8101_v52  ;;  %v7464_v31 = vpop.permute.xlu1 %3260  ;;  %v4139_v55 = vpack.c.bf16 %v2912_v9, %v2908_v53  ;;  %v4209_v58 = vpack.c.bf16 %v2915_v14, %v2911_v5  ;;  %v3433_v53 = vld [vmem:[#allocation2 + $0x258] sm:$0xff]  ;;  %v3434_v5 = vld [vmem:[#allocation2 + $0x260] sm:$0xff]  ;;  %v8107_v52 = vpack.c.bf16 %v8105_v62, %v8106_v36 }
 0x64a   :  { %v2986_v27 = vsel %vm305_vm4, %v2961_v54, %v7282_v41  ;;  %v2990_v44 = vsel %vm305_vm4, %v7278_v56, %v2961_v54  ;;  %v4217_v17 = vpack.c.bf16 %v3437_v7, %v3433_v53  ;;  %v8104_v9 = vld [vmem:[#allocation65_spill] sm:$0xff]  ;;  %v8129_v36 = vld [vmem:[#allocation67_spill] sm:$0xff] }
 0x64b   :  { %v7467_v61 = vmul.f32 %v6940_v16, %v2990_v44  ;;  %v7470_v29 = vmul.f32 %v8102_v28, %v2986_v27  ;;  %4210 = vmatprep.subr.bf16.mxu1 %v4209_v58  ;;  %v3454_v53 = vld [vmem:[#allocation2 + $0x300] sm:$0xff] }
 0x64c   :  { %4140 = vmatpush1.bf16.msra.mxu0 %v4139_v55  ;;  %v8108_v55 = vld [vmem:[#allocation89_spill] sm:$0xff] }
 0x64d   :  { %v2977_v11 = vpop.permute.xlu0 %2976  ;;  %4142 = vmatprep.subr.bf16.mxu0 %v4141_v30  ;;  %4212 = vmatpush1.bf16.msra.mxu1 %v4211_v48  ;;  %v7478_v33 = vpop.permute.xlu1 %3276  ;;  %v8112_v48 = vld [vmem:[#allocation76_spill] sm:$0xff] }
 0x64e   :  { %v2982_v37 = vsel %vm305_vm4, %v7282_v41, %v2977_v11  ;;  %v2994_v2 = vsel %vm305_vm4, %v2977_v11, %v7278_v56  ;;  %4214 = vmatprep.subr.bf16.mxu1 %v4213_v51  ;;  %v3436_v41 = vld [vmem:[#allocation2 + $0x270] sm:$0xff]  ;;  %v3430_v56 = vld [vmem:[#allocation2 + $0x240] sm:$0xff] }
 0x64f   :  { %v7481_v46 = vmul.f32 %v6978_v0, %v2982_v37  ;;  %v3029_v23 = vmul.f32 %v6981_v4, %v2994_v2  ;;  %v4147_v50 = vpack.c.bf16 %v3434_v5, %v3430_v56  ;;  %v4219_v47 = vpack.c.bf16 %v3436_v41, %v3432_v32  ;;  %v3457_v2 = vld [vmem:[#allocation2 + $0x318] sm:$0xff]  ;;  %v8119_v5 = vld [vmem:[#allocation93_spill] sm:$0xff] }
 0x650   :  { %4144 = vmatpush1.bf16.msra.mxu0 %v4143_v59  ;;  %v8117_v59 = vld [vmem:[#allocation32_spill] sm:$0xff] }
 0x651   :  { %v3063_v57 = vpop.permute.xlu0 %3062  ;;  %4146 = vmatprep.subr.bf16.mxu0 %v4145_v35  ;;  %4216 = vmatpush1.bf16.msra.mxu1 %v4215_v49  ;;  %v2963_v22 = vpop.permute.xlu1 %2962  ;;  %v8122_v32 = vld [vmem:[#allocation80_spill] sm:$0xff] }
 0x652   :  { %v3088_v15 = vsel %vm355_vm5, %v3063_v57, %v7290_v12  ;;  %v3092_v38 = vsel %vm355_vm5, %v7286_v24, %v3063_v57  ;;  %4218 = vmatprep.subr.bf16.mxu1 %v4217_v17  ;;  %v2987_v6 = vsel %vm305_vm4, %v2963_v22, %v8103_v21  ;;  %v2991_v14 = vsel %vm305_vm4, %v8104_v9, %v2963_v22  ;;  %v8120_v17 = vld [vmem:[#allocation36_spill] sm:$0xff]  ;;  %v8123_v22 = vld [vmem:[#allocation75_spill] sm:$0xff] }
 0x653   :  { %v7491_v1 = vmul.f32 %v7014_v40, %v3092_v38  ;;  %v7494_v19 = vmul.f32 %v7017_v63, %v3088_v15  ;;  %v3030_v25 = vmul.f32 %v6940_v16, %v2991_v14  ;;  %v3031_v45 = vmul.f32 %v8102_v28, %v2987_v6  ;;  %v8109_v16 = vld [vmem:[#allocation49_spill] sm:$0xff]  ;;  %v3456_v38 = vld [vmem:[#allocation2 + $0x310] sm:$0xff] }
 0x654   :  { %4148 = vmatpush1.bf16.msra.mxu0 %v4147_v50  ;;  %v8110_v58 = vpack.c.bf16 %v8108_v55, %v8109_v16  ;;  %v4151_v28 = vpack.c.bf16 %v8111_v39, %v3438_v60  ;;  %v4229_v50 = vpack.c.bf16 %v8123_v22, %v3457_v2  ;;  %v8125_v6 = vld [vmem:[#allocation45_spill] sm:$0xff] }
 0x655   :  { %v3079_v54 = vpop.permute.xlu0 %3078  ;;  %4150 = vmatprep.subr.bf16.mxu0 %v8107_v52  ;;  %4220 = vmatpush1.bf16.msra.mxu1 %v4219_v47  ;;  %v2979_v44 = vpop.permute.xlu1 %2978  ;;  %v4153_v30 = vpack.c.bf16 %v3031_v45, %v7470_v29  ;;  %v8114_v29 = vld [vmem:[#allocation74_spill] sm:$0xff]  ;;  %v4155_v37 = vpack.c.bf16 %v3030_v25, %v7467_v61  ;;  %v8121_v61 = vld [vmem:[#allocation81_spill] sm:$0xff] }
 0x656   :  { %v3084_v3 = vsel %vm355_vm5, %v7290_v12, %v3079_v54  ;;  %v3096_v27 = vsel %vm355_vm5, %v3079_v54, %v7286_v24  ;;  %4222 = vmatprep.subr.bf16.mxu1 %v8110_v58  ;;  %v2983_v12 = vsel %vm305_vm4, %v8103_v21, %v2979_v44  ;;  %v2995_v24 = vsel %vm305_vm4, %v2979_v44, %v8104_v9  ;;  %v8124_v21 = vld [vmem:[#allocation77_spill] sm:$0xff]  ;;  %v8128_v54 = vld [vmem:[#allocation78_spill] sm:$0xff] }
 0x657   :  { %v7519_v26 = vmul.f32 %v8112_v48, %v3084_v3  ;;  %v3131_v51 = vmul.f32 %v8113_v18, %v3096_v27  ;;  %v3032_v10 = vmul.f32 %v6978_v0, %v2983_v12  ;;  %v3033_v42 = vmul.f32 %v6981_v4, %v2995_v24  ;;  %v8127_v14 = vld [vmem:[#allocation73_spill] sm:$0xff]  ;;  %v8130_v3 = vld [vmem:[#allocation82_spill] sm:$0xff] }
 0x658   :  { %4152 = vmatpush1.bf16.msra.mxu0 %v4151_v28  ;;  %v8116_v7 = vpack.c.bf16 %v8114_v29, %v8115_v8  ;;  %v8126_v9 = vpack.c.bf16 %v8124_v21, %v8125_v6  ;;  %v4159_v60 = vpack.c.bf16 %v8127_v14, %v3454_v53  ;;  %v4231_v62 = vpack.c.bf16 %v8128_v54, %v3456_v38  ;;  %v3471_v58 = vld [vmem:[#allocation2 + $0x388] sm:$0xff]  ;;  %v3473_v28 = vld [vmem:[#allocation2 + $0x398] sm:$0xff] }
 0x659   :  { %v3165_v11 = vpop.permute.xlu0 %3164  ;;  %4154 = vmatprep.subr.bf16.mxu0 %v4153_v30  ;;  %v3065_v35 = vpop.permute.xlu1 %3064  ;;  %v4225_v4 = vpack.c.bf16 %v3033_v42, %v3029_v23  ;;  %v4227_v49 = vpack.c.bf16 %v3032_v10, %v7481_v46  ;;  %v8133_v8 = vld [vmem:[#allocation53_spill] sm:$0xff]  ;;  %v3489_v6 = vld [vmem:[#allocation2 + $0x418] sm:$0xff] }
 0x65a   :  { %4224 = vmatpush1.bf16.msra.mxu1 %v8116_v7  ;;  %v3190_v13 = vsel %vm405_vm6, %v3165_v11, %v8117_v59  ;;  %v3194_v0 = vsel %vm405_vm6, %v8118_v43, %v3165_v11  ;;  %v3089_v56 = vsel %vm355_vm5, %v3065_v35, %v8121_v61  ;;  %v3093_v15 = vsel %vm355_vm5, %v8122_v32, %v3065_v35  ;;  %v8131_v11 = vld [vmem:[#allocation79_spill] sm:$0xff]  ;;  %v3470_v35 = vld [vmem:[#allocation2 + $0x380] sm:$0xff] }
 0x65b   :  { %v7542_v41 = vmul.f32 %v8119_v5, %v3194_v0  ;;  %v7545_v57 = vmul.f32 %v8120_v17, %v3190_v13  ;;  %v3132_v23 = vmul.f32 %v7014_v40, %v3093_v15  ;;  %v3133_v46 = vmul.f32 %v7017_v63, %v3089_v56  ;;  %4226 = vmatprep.subr.bf16.mxu1 %v4225_v4  ;;  %v3487_v56 = vld [vmem:[#allocation2 + $0x408] sm:$0xff]  ;;  %v8139_v54 = vld [vmem:[#allocation44_spill] sm:$0xff] }
 0x65c   :  { %4156 = vmatpush1.bf16.msra.mxu0 %v4155_v37  ;;  %v8134_v37 = vld [vmem:[#allocation88_spill] sm:$0xff] }
 0x65d   :  { %v3181_v47 = vpop.permute.xlu0 %3180  ;;  %4158 = vmatprep.subr.bf16.mxu0 %v8126_v9  ;;  %v3081_v63 = vpop.permute.xlu1 %3080  ;;  %v4161_v45 = vpack.c.bf16 %v3133_v46, %v7494_v19  ;;  %v4163_v24 = vpack.c.bf16 %v3132_v23, %v7491_v1  ;;  %v4165_v2 = vpack.c.bf16 %v8134_v37, %v3471_v58  ;;  %v3504_v37 = vld [vmem:[#allocation2 + $0x490] sm:$0x1] }
 0x65e   :  { %4228 = vmatpush1.bf16.msra.mxu1 %v4227_v49  ;;  %v3186_v25 = vsel %vm405_vm6, %v8117_v59, %v3181_v47  ;;  %v3198_v40 = vsel %vm405_vm6, %v3181_v47, %v8118_v43  ;;  %v3085_v44 = vsel %vm355_vm5, %v8121_v61, %v3081_v63  ;;  %v3097_v55 = vsel %vm355_vm5, %v3081_v63, %v8122_v32  ;;  %v3474_v59 = vld [vmem:[#allocation2 + $0x3a0] sm:$0xff]  ;;  %v3476_v43 = vld [vmem:[#allocation2 + $0x3b0] sm:$0xff] }
 0x65f   :  { %4230 = vmatprep.subr.bf16.mxu1 %v4229_v50  ;;  %v7569_v52 = vmul.f32 %v8129_v36, %v3186_v25  ;;  %v7572_v27 = vmul.f32 %v8130_v3, %v3198_v40  ;;  %v3134_v16 = vmul.f32 %v8112_v48, %v3085_v44  ;;  %v3135_v19 = vmul.f32 %v8113_v18, %v3097_v55  ;;  %v8132_v18 = vld [vmem:[#allocation30_spill] sm:$0xff]  ;;  %v8137_v47 = vld [vmem:[#allocation68_spill] sm:$0xff]  ;;  %v8138_v63 = vld [vmem:[#allocation87_spill] sm:$0xff] }
 0x660   :  { %4160 = vmatpush1.bf16.msra.mxu0 %v4159_v60  ;;  %v4167_v53 = vpack.c.bf16 %v3474_v59, %v3470_v35  ;;  %v4173_v21 = vpack.c.bf16 %v8137_v47, %v3487_v56  ;;  %v3492_v55 = vld [vmem:[#allocation2 + $0x430] sm:$0xff] }
 0x661   :  { %v3267_v39 = vpop.permute.xlu0 %3266  ;;  %4162 = vmatprep.subr.bf16.mxu0 %v4161_v45  ;;  %v3167_v12 = vpop.permute.xlu1 %3166  ;;  %v4233_v10 = vpack.c.bf16 %v3135_v19, %v3131_v51  ;;  %v4235_v42 = vpack.c.bf16 %v3134_v16, %v7519_v26  ;;  %v8135_v26 = vld [vmem:[#allocation70_spill] sm:$0xff]  ;;  %v3486_v16 = vld [vmem:[#allocation2 + $0x400] sm:$0xff] }
 0x662   :  { %4232 = vmatpush1.bf16.msra.mxu1 %v4231_v62  ;;  %v3296_v30 = vsel %vm455_vm7, %v7436_v34, %v3267_v39  ;;  %v3191_v29 = vsel %vm405_vm6, %v3167_v12, %v8132_v18  ;;  %v3195_v7 = vsel %vm405_vm6, %v8133_v8, %v3167_v12  ;;  %v4237_v51 = vpack.c.bf16 %v8135_v26, %v3473_v28  ;;  %v3488_v28 = vld [vmem:[#allocation2 + $0x410] sm:$0xff] }
 0x663   :  { %v7588_v48 = vmul.f32 %v8131_v11, %v3296_v30  ;;  %v3234_v13 = vmul.f32 %v8119_v5, %v3195_v7  ;;  %v3235_v1 = vmul.f32 %v8120_v17, %v3191_v29  ;;  %4234 = vmatprep.subr.bf16.mxu1 %v4233_v10  ;;  %v3472_v5 = vld [vmem:[#allocation2 + $0x390] sm:$0xff]  ;;  %v8136_v17 = vld [vmem:[#allocation41_spill] sm:$0xff]  ;;  %v4247_v10 = vpack.c.bf16 %v3492_v55, %v3488_v28 }
 0x664   :  { %4164 = vmatpush1.bf16.msra.mxu0 %v4163_v24  ;;  %v4239_v23 = vpack.c.bf16 %v3476_v43, %v3472_v5  ;;  %v8141_v24 = vld [vmem:[#allocation28_spill] sm:$0xff]  ;;  %v8142_v7 = vmov 0.0  }
 0x665   :  { %v3275_v0 = vpop.permute.xlu0 %3274  ;;  %4166 = vmatprep.subr.bf16.mxu0 %v4165_v2  ;;  %v3183_v49 = vpop.permute.xlu1 %3182  ;;  %v4169_v61 = vpack.c.bf16 %v3235_v1, %v7545_v57  ;;  %v4171_v57 = vpack.c.bf16 %v3234_v13, %v7542_v41 }
 0x666   :  { %4236 = vmatpush1.bf16.msra.mxu1 %v4235_v42  ;;  %v3292_v4 = vsel %vm455_vm7, %v3267_v39, %v3275_v0  ;;  %v3187_v15 = vsel %vm405_vm6, %v8132_v18, %v3183_v49  ;;  %v3199_v38 = vsel %vm405_vm6, %v3183_v49, %v8133_v8  ;;  %v3503_v8 = vld [vmem:[#allocation2 + $0x488] sm:$0x1] }
 0x667   :  { %4238 = vmatprep.subr.bf16.mxu1 %v4237_v51  ;;  %v3333_v32 = vmul.f32 %v8136_v17, %v3292_v4  ;;  %v3236_v46 = vmul.f32 %v8129_v36, %v3187_v15  ;;  %v3237_v22 = vmul.f32 %v8130_v3, %v3199_v38  ;;  %v3490_v3 = vld [vmem:[#allocation2 + $0x420] sm:$0xff] }
 0x668   :  { %4168 = vmatpush1.bf16.msra.mxu0 %v4167_v53  ;;  %v4175_v58 = vpack.c.bf16 %v3490_v3, %v3486_v16 }
 0x669   :  { %v3283_v50 = vpop.permute.xlu0 %3282  ;;  %4170 = vmatprep.subr.bf16.mxu0 %v4169_v61  ;;  %v3269_v60 = vpop.permute.xlu1 %3268  ;;  %v4241_v25 = vpack.c.bf16 %v3237_v22, %v7572_v27  ;;  %v4243_v40 = vpack.c.bf16 %v3236_v46, %v7569_v52  ;;  %v8140_v52 = vld [vmem:[#allocation52_spill] sm:$0xff] }
 0x66a   :  { %4240 = vmatpush1.bf16.msra.mxu1 %v4239_v23  ;;  %v3288_v9 = vsel %vm455_vm7, %v3275_v0, %v3283_v50  ;;  %v3300_v14 = vsel %vm455_vm7, %v3283_v50, %v7436_v34  ;;  %v3293_v41 = vsel %vm455_vm7, %v3269_v60, %v7478_v33  ;;  %v3297_v36 = vsel %vm455_vm7, %v7464_v31, %v3269_v60 }
 0x66b   :  { %v3334_v45 = vmul.f32 %v8138_v63, %v3288_v9  ;;  %v3335_v62 = vmul.f32 %v8139_v54, %v3300_v14  ;;  %v3336_v34 = vmul.f32 %v8131_v11, %v3297_v36  ;;  %v3337_v44 = vmul.f32 %v8136_v17, %v3293_v41  ;;  %4242 = vmatprep.subr.bf16.mxu1 %v4241_v25 }
 0x66c   :  { %4172 = vmatpush1.bf16.msra.mxu0 %v4171_v57  ;;  %v4245_v27 = vpack.c.bf16 %v8140_v52, %v3489_v6 }
 0x66d   :  { %4174 = vmatprep.subr.bf16.mxu0 %v4173_v21  ;;  %v3285_v19 = vpop.permute.xlu1 %3284  ;;  %v4177_v39 = vpack.c.bf16 %v3337_v44, %v3333_v32  ;;  %v4179_v18 = vpack.c.bf16 %v3336_v34, %v7588_v48  ;;  %v3357_v48 = vld [vmem:[%s7678_s5 + $0x8] sm:$0x7]  ;;  %s4489_s5 = smov [#allocation12]  }
 0x66e   :  { %4244 = vmatpush1.bf16.msra.mxu1 %v4243_v40  ;;  %v3289_v30 = vsel %vm455_vm7, %v7478_v33, %v3285_v19  ;;  %v3301_v12 = vsel %vm455_vm7, %v3285_v19, %v7464_v31  ;;  %v3502_v31 = vld [vmem:[#allocation2 + $0x480] sm:$0x1]  ;;  %s3880_s1 = sshll.u32 %s4489_s5, 4  ;;  %s3881_s1 = int_to_ptr.vmem [resolvable:$true] %s3880_s1 }
 0x66f   :  { %4246 = vmatprep.subr.bf16.mxu1 %v4245_v27  ;;  %3589 = vmatmul.mubr.f32.vlgmr.msra.gmra.mrb[16].mxu0 %v8141_v24  ;;  %v3338_v42 = vmul.f32 %v8138_v63, %v3289_v30  ;;  %v3339_v11 = vmul.f32 %v8139_v54, %v3301_v12  ;;  %s4437_s19 = scalar_lea.vmem %s3881_s1, 256  ;;  %p4442_p13 = scmp.lt.s32.totalorder %s3881_s1, %s3881_s1 }
 0x670   :  { %4176 = vmatpush1.bf16.msra.mxu0 %v4175_v58  ;;  %3659 = vmatprep.mubr.f32.mxu0 %v8142_v7  ;;  %p4438_p12 = scmp.ne.s32.totalorder %s3881_s1, %s4437_s19  ;;  %p4443_p0 = scmp.lt.s32.totalorder %s4437_s19, %s4437_s19 }
 0x671   :  { %3731 = vmatmul.mubr.f32.vlgmr.msra.gmra.mrb[16].mxu1 %v8141_v24  ;;  %4178 = vmatprep.subr.bf16.mxu0 %v4177_v39  ;;  %v4249_v29 = vpack.c.bf16 %v3339_v11, %v3335_v62  ;;  %v4251_v33 = vpack.c.bf16 %v3338_v42, %v3334_v45 }
 0x672   :  { %4248 = vmatpush1.bf16.msra.mxu1 %v4247_v10  ;;  %3801 = vmatprep.mubr.f32.mxu1 %v8142_v7  ;;  %p4444_p1 = por %p4443_p0, %p4442_p13 }
 0x673   :  { %4250 = vmatprep.subr.bf16.mxu1 %v4249_v29 }
 0x674   :  { %4180 = vmatpush1.bf16.msra.mxu0 %v4179_v18  ;;  %p4445_p2 = pnand %p4444_p1, %p4438_p12 }
 0x675   :  { %3915 = vmatprep.subr.msk.mxu0 %vm925_vm13, %v3503_v8 }
 0x676   :  { %4252 = vmatpush1.bf16.msra.mxu1 %v4251_v33 }
 0x677   :  { %3918 = vmatprep.subr.msk.mxu1 %vm925_vm13, %v3505_v20 }
 0x678   :  { %3916 = vmatpush1.msk.msra.mxu0 %vm925_vm13, %v3502_v31 }
 0x679   :  { %3917 = vmatmul.mubr.msk.f32.vlgmr.msra.gmra.mrb[16].mxu0 %vm2127_vm8, %v3357_v48 }
 0x67a   :  { %3919 = vmatpush1.msk.msra.mxu1 %vm925_vm13, %v3504_v37 }
 0x67b   :  { %3920 = vmatmul.mubr.msk.f32.vlgmr.msra.gmra.mrb[16].mxu1 %vm2127_vm8, %v3357_v48 }
 0x74c   :  { %v3661_v2 = vpop.f32.mrb[16].mxu0 }
 0x74d   :  { %v3812_v59 = vmin.f32 %v3661_v2, 20.0  ;;  %v3663_v13 = vpop.f32.mrb[17].mxu0  ;;  %vm3808_vm0 = vcmp.gt.f32.partialorder %v3661_v2, 20.0 }
 0x74e   :  { %v3803_v1 = vpop.f32.mrb[16].mxu1  ;;  %v3813_v26 = vmin.f32 %v3663_v13, 20.0  ;;  %vm3809_vm1 = vcmp.gt.f32.partialorder %v3663_v13, 20.0 }
 0x74f   :  { %v3814_v51 = vmin.f32 %v3803_v1, 20.0  ;;  %v7654_v43 = vpop.f32.mrb[17].mxu1  ;;  %v3816_v0 = vmul.f32 1.442695, %v3812_v59  ;;  %vm3810_vm4 = vcmp.gt.f32.partialorder %v3803_v1, 20.0 }
 0x750   :  { %v3815_v35 = vmin.f32 %v7654_v43, 20.0  ;;  %v3818_v4 = vmul.f32 1.442695, %v3813_v26  ;;  %vm3811_vm7 = vcmp.gt.f32.partialorder %v7654_v43, 20.0 }
 0x751   :  { %v3820_v49 = vmul.f32 1.442695, %v3814_v51  ;;  %4299 = vpow2.f32 %v3816_v0 }
 0x752   :  { %v3822_v53 = vmul.f32 1.442695, %v3815_v35  ;;  %4301 = vpow2.f32 %v3818_v4 }
 0x753   :  { %4303 = vpow2.f32 %v3820_v49 }
 0x754   :  { %4305 = vpow2.f32 %v3822_v53 }
 0x75b   :  { %v4300_v61 = vpop.eup %4299 }
 0x75c   :  { %v4302_v5 = vpop.eup %4301  ;;  %v3824_v56 = vadd.f32 1.0, %v4300_v61  ;;  %v3827_v46 = vmul.f32 -0.5, %v4300_v61  ;;  %v3830_v21 = vand.u32 2147483647, %v4300_v61 }
 0x75d   :  { %v4304_v17 = vpop.eup %4303  ;;  %v3833_v32 = vadd.f32 1.0, %v4302_v5  ;;  %v3836_v22 = vmul.f32 -0.5, %v4302_v5  ;;  %v3839_v9 = vand.u32 2147483647, %v4302_v5 }
 0x75e   :  { %v4306_v15 = vpop.eup %4305  ;;  %4307 = vlog2.f32 %v3824_v56  ;;  %v3842_v38 = vadd.f32 1.0, %v4304_v17  ;;  %v3845_v50 = vmul.f32 -0.5, %v4304_v17  ;;  %v3828_v57 = vadd.f32 1.0, %v3827_v46 }
 0x75f   :  { %4309 = vlog2.f32 %v3833_v32  ;;  %v3851_v23 = vadd.f32 1.0, %v4306_v15  ;;  %v3854_v47 = vmul.f32 -0.5, %v4306_v15  ;;  %v3837_v6 = vadd.f32 1.0, %v3836_v22 }
 0x760   :  { %4311 = vlog2.f32 %v3842_v38  ;;  %v3846_v14 = vadd.f32 1.0, %v3845_v50  ;;  %v3848_v25 = vand.u32 2147483647, %v4304_v17  ;;  %v3829_v45 = vmul.f32 %v4300_v61, %v3828_v57 }
 0x761   :  { %4313 = vlog2.f32 %v3851_v23  ;;  %v3855_v54 = vadd.f32 1.0, %v3854_v47  ;;  %vm3831_vm2 = vcmp.lt.f32.partialorder %v3830_v21, 0.0004427343  ;;  %v3838_v36 = vmul.f32 %v4302_v5, %v3837_v6 }
 0x762   :  { %v3857_v3 = vand.u32 2147483647, %v4306_v15  ;;  %vm3840_vm3 = vcmp.lt.f32.partialorder %v3839_v9, 0.0004427343  ;;  %v3847_v52 = vmul.f32 %v4304_v17, %v3846_v14  ;;  %vm3849_vm5 = vcmp.lt.f32.partialorder %v3848_v25, 0.0004427343 }
 0x763   :  { %v3856_v28 = vmul.f32 %v4306_v15, %v3855_v54 }
 0x764   :  { %vm3858_vm6 = vcmp.lt.f32.partialorder %v3857_v3, 0.0004427343 }
 0x768   :  { %v4308_v60 = vpop.eup %4307 }
 0x769   :  { %v4310_v40 = vpop.eup %4309  ;;  %v3826_v63 = vmul.f32 0.6931472, %v4308_v60 }
 0x76a   :  { %v4312_v62 = vpop.eup %4311  ;;  %v3835_v41 = vmul.f32 0.6931472, %v4310_v40 }
 0x76b   :  { %v3832_v34 = vsel %vm3831_vm2, %v3829_v45, %v3826_v63  ;;  %v3844_v44 = vmul.f32 0.6931472, %v4312_v62  ;;  %v4314_v27 = vpop.eup %4313 }
 0x76c   :  { %v3860_v55 = vsel %vm3808_vm0, %v3661_v2, %v3832_v34  ;;  %v3841_v16 = vsel %vm3840_vm3, %v3838_v36, %v3835_v41  ;;  %v3853_v39 = vmul.f32 0.6931472, %v4314_v27 }
 0x76d   :  { %v3861_v19 = vsel %vm3809_vm1, %v3663_v13, %v3841_v16  ;;  %v3850_v58 = vsel %vm3849_vm5, %v3847_v52, %v3844_v44 }
 0x76e   :  { %v3868_v30 = vcombine.low %v3860_v55, %v3861_v19  ;;  %v3862_v12 = vsel %vm3810_vm4, %v3803_v1, %v3850_v58  ;;  %v3859_v24 = vsel %vm3858_vm6, %v3856_v28, %v3853_v39 }
 0x76f   :  { %v3863_v10 = vsel %vm3811_vm7, %v7654_v43, %v3859_v24 }
 0x770   :  { %3872 = vst [vmem:[#allocation12] sm:$0x77] %v3868_v30  ;;  %v3869_v42 = vcombine.low %v3862_v12, %v3863_v10 }
 0x772   :  { %3873 = vst [vmem:[#allocation12 + $0x8] sm:$0x77] %v3869_v42 }
 0x773   :  { %4448 = shalt.err (!%p4445_p2)
}
 0x774   :  { %s4449_s22 = scalar_lea.hbm %s7679_s6, 256 }
 0x775   :  { %p4450_p3 = scmp.ne.s32.totalorder %s7679_s6, %s4449_s22  ;;  %p4453_p4 = scmp.lt.u32.totalorder %s4449_s22, %s7679_s6 }
 0x777   :  { %p4455_p5 = pnand %p4453_p4, %p4450_p3 }
 0x779   :  { %4458 = shalt.err (!%p4455_p5)
}
 0x77a   :  { %3883 = dma.vmem_to_hbm [thread:$0]  %s3881_s1, 256, %s7679_s6, [#allocation5]  }
 0x77b   :  { %4465 = dma.done.wait [#allocation5], 256  }
 0x77c   :  { %4466 = vsyncadd [#allocation5], 4294967040 }
 0x77d   :  { %3887 = vsyncpa [#allocation4], 1 }
 0x77e   :  { %3888 = vsyncpa [#allocation7], 1 }
 0x77f   :  { %3889 = vsyncpa [#allocation10], 1 }
 0x780   :  { %3890 = vsyncpa [#allocation5], 1 }

</bundles_post_ra>
